<compile_context>
chip_gen: v6e
topology: v6e:2x2x1
jax: 0.10.0
libtpu: 0.0.40
codegen_flags: <defaults>
</compile_context>

<pallas_src>
import functools
import math

import jax
import jax.numpy as jnp
from jax.experimental import pallas as pl
from jax.experimental.pallas import tpu as pltpu


def _round_up(x, m):
    return (x + m - 1) // m * m


# ---------------------------------------------------------------------------
# Pallas kernels (tap-decomposed convolutions, all matmuls accumulate in f32)
# ---------------------------------------------------------------------------
def _conv_kernel(x_ref, w_ref, b_ref, *rest, taps, m, relu_in, relu_out,
                 shift_off):
    """out = relu?( sum_t x[d_t:d_t+m] @ W_t  + b ).

    shift_off is None : write the m rows directly ("raw" layout).
    shift_off = Ws+1  : mask the pad columns to 0 and write into a zeroed
                        (Hp*Ws)-row buffer shifted by Ws+1, producing exactly
                        the zero-padded layout the next 3x3 layer consumes.
    """
    o_ref = rest[-1]
    acc = None
    for ti, d in enumerate(taps):
        xd = x_ref[0, d:d + m, :]
        if relu_in:
            xd = jnp.maximum(xd, 0)
        term = jnp.dot(xd, w_ref[ti], preferred_element_type=jnp.float32)
        acc = term if acc is None else acc + term
    acc = acc + b_ref[...].astype(jnp.float32)
    if relu_out:
        acc = jnp.maximum(acc, 0.0)
    if shift_off is None:
        o_ref[0] = acc.astype(o_ref.dtype)
    else:
        mask_ref = rest[0]
        acc = acc * mask_ref[...]                       # zero the pad columns
        o_ref[0] = jnp.zeros(o_ref.shape[1:], o_ref.dtype)
        o_ref[0, pl.ds(shift_off, m), :] = acc.astype(o_ref.dtype)


def _resblock_kernel(x_ref, w3_ref, w1_ref, mask_ref, o_ref, *, taps, m,
                     center, shift_off):
    """out = x + Conv1x1(ReLU(Conv3x3(ReLU(x)))), written re-padded for the
    next residual block (shifted store + pad-column masking)."""
    acc = None
    for ti, d in enumerate(taps):
        xd = jnp.maximum(x_ref[0, d:d + m, :], 0)       # ReLU before the 3x3
        term = jnp.dot(xd, w3_ref[ti], preferred_element_type=jnp.float32)
        acc = term if acc is None else acc + term
    hid = jnp.maximum(acc, 0.0).astype(w1_ref.dtype)
    r = jnp.dot(hid, w1_ref[0], preferred_element_type=jnp.float32)
    res = x_ref[0, center:center + m, :].astype(jnp.float32)   # centre tap
    val = (res + r) * mask_ref[...]
    o_ref[0] = jnp.zeros(o_ref.shape[1:], o_ref.dtype)
    o_ref[0, pl.ds(shift_off, m), :] = val.astype(o_ref.dtype)


def _resblock_prequant_kernel(x_ref, w3_ref, w1_ref, wq_ref, bq_ref, o_ref, *,
                              taps, m, center):
    """Last residual block fused with the stack's final ReLU and the 1x1
    pre_quantization conv:  z = relu(x + resblock(x)) @ Wq + bq."""
    acc = None
    for ti, d in enumerate(taps):
        xd = jnp.maximum(x_ref[0, d:d + m, :], 0)
        term = jnp.dot(xd, w3_ref[ti], preferred_element_type=jnp.float32)
        acc = term if acc is None else acc + term
    hid = jnp.maximum(acc, 0.0).astype(w1_ref.dtype)
    r = jnp.dot(hid, w1_ref[0], preferred_element_type=jnp.float32)
    res = x_ref[0, center:center + m, :].astype(jnp.float32)
    val = jnp.maximum(res + r, 0.0).astype(wq_ref.dtype)        # final ReLU
    z = jnp.dot(val, wq_ref[0], preferred_element_type=jnp.float32)
    z = z + bq_ref[...].astype(jnp.float32)
    o_ref[0] = z.astype(o_ref.dtype)


# ---------------------------------------------------------------------------
# pallas_call wrappers (grid over batch; x streamed once per layer)
# ---------------------------------------------------------------------------
def _conv_call(x2, w_taps, bias, *, taps, m, out_rows, relu_in=False,
               relu_out=False, shift_off=None, mask=None,
               out_dtype=jnp.bfloat16):
    n, r_in, cin = x2.shape
    nt, k, co = w_taps.shape
    kernel = functools.partial(_conv_kernel, taps=taps, m=m, relu_in=relu_in,
                               relu_out=relu_out, shift_off=shift_off)
    in_specs = [pl.BlockSpec((1, r_in, cin), lambda i: (i, 0, 0)),
                pl.BlockSpec((nt, k, co), lambda i: (0, 0, 0)),
                pl.BlockSpec((1, co), lambda i: (0, 0))]
    args = [x2, w_taps, bias]
    if shift_off is not None:
        in_specs.append(pl.BlockSpec((m, 1), lambda i: (0, 0)))
        args.append(mask)
    return pl.pallas_call(
        kernel,
        out_shape=jax.ShapeDtypeStruct((n, out_rows, co), out_dtype),
        grid=(n,),
        in_specs=in_specs,
        out_specs=pl.BlockSpec((1, out_rows, co), lambda i: (i, 0, 0)),
        compiler_params=pltpu.CompilerParams(
            dimension_semantics=("parallel",)),
    )(*args)


def _resblock_call(x2, w3, w1, mask, *, taps, m, center, out_rows, shift_off,
                   out_dtype=jnp.bfloat16):
    n, r_in, c = x2.shape
    nt, k3, cr = w3.shape
    co = w1.shape[-1]
    kernel = functools.partial(_resblock_kernel, taps=taps, m=m,
                               center=center, shift_off=shift_off)
    return pl.pallas_call(
        kernel,
        out_shape=jax.ShapeDtypeStruct((n, out_rows, co), out_dtype),
        grid=(n,),
        in_specs=[pl.BlockSpec((1, r_in, c), lambda i: (i, 0, 0)),
                  pl.BlockSpec((nt, k3, cr), lambda i: (0, 0, 0)),
                  pl.BlockSpec((1, cr, co), lambda i: (0, 0, 0)),
                  pl.BlockSpec((m, 1), lambda i: (0, 0))],
        out_specs=pl.BlockSpec((1, out_rows, co), lambda i: (i, 0, 0)),
        compiler_params=pltpu.CompilerParams(
            dimension_semantics=("parallel",)),
    )(x2, w3, w1, mask)


def _resblock_prequant_call(x2, w3, w1, wq, bq, *, taps, m, center):
    n, r_in, c = x2.shape
    nt, k3, cr = w3.shape
    e = wq.shape[-1]
    kernel = functools.partial(_resblock_prequant_kernel, taps=taps, m=m,
                               center=center)
    return pl.pallas_call(
        kernel,
        out_shape=jax.ShapeDtypeStruct((n, m, e), jnp.float32),
        grid=(n,),
        in_specs=[pl.BlockSpec((1, r_in, c), lambda i: (i, 0, 0)),
                  pl.BlockSpec((nt, k3, cr), lambda i: (0, 0, 0)),
                  pl.BlockSpec((1, cr, c), lambda i: (0, 0, 0)),
                  pl.BlockSpec((1, c, e), lambda i: (0, 0, 0)),
                  pl.BlockSpec((1, e), lambda i: (0, 0))],
        out_specs=pl.BlockSpec((1, m, e), lambda i: (i, 0, 0)),
        compiler_params=pltpu.CompilerParams(
            dimension_semantics=("parallel",)),
    )(x2, w3, w1, wq, bq)


# ---------------------------------------------------------------------------
# Wrapper-side layout prep (cheap 1x XLA copies; no im2col blowup)
# ---------------------------------------------------------------------------
def _space_to_depth_pad1(x):
    """pad 1 + 2x2 space-to-depth: k4/s2/p1 conv becomes a 2x2/s1 conv."""
    n, h, w, c = x.shape
    xp = jnp.pad(x, ((0, 0), (1, 1), (1, 1), (0, 0)))
    hy, wy = (h + 2) // 2, (w + 2) // 2
    y = xp.reshape(n, hy, 2, wy, 2, c)
    y = jnp.transpose(y, (0, 1, 3, 2, 4, 5)).reshape(n, hy, wy, 4 * c)
    return y, hy, wy


def _flatten_rows(x_nhwc, rows_alloc):
    n, h, w, c = x_nhwc.shape
    x2 = x_nhwc.reshape(n, h * w, c)
    pad = rows_alloc - h * w
    if pad > 0:
        x2 = jnp.pad(x2, ((0, 0), (0, pad), (0, 0)))
    return x2


# ---------------------------------------------------------------------------
# Parameter init + packing (packing happens ONCE here, outside the forward)
# ---------------------------------------------------------------------------
def _conv_init(key, co, ci, k, bias=True):
    k1, k2 = jax.random.split(key)
    bound = 1.0 / math.sqrt(ci * k * k)
    w = jax.random.uniform(k1, (co, ci, k, k), jnp.float32, -bound, bound)
    b = (jax.random.uniform(k2, (co,), jnp.float32, -bound, bound)
         if bias else None)
    return w, b


def _pack_taps(w):                       # (co, ci, kh, kw) -> (kh*kw, ci, co)
    co, ci, kh, kw = w.shape
    return jnp.transpose(w, (2, 3, 1, 0)).reshape(kh * kw, ci, co) \
              .astype(jnp.bfloat16)


def _pack_s2d_taps(w):                   # (co, ci, 4, 4) -> (4, 4*ci, co)
    co, ci, _, _ = w.shape
    w6 = w.reshape(co, ci, 2, 2, 2, 2)               # (co, ci, a, b, c, d)
    w6 = jnp.transpose(w6, (2, 4, 3, 5, 1, 0))       # (a, c, b, d, ci, co)
    return w6.reshape(4, 4 * ci, co).astype(jnp.bfloat16)


def _pack_bias(b):
    return b.reshape(1, -1).astype(jnp.float32)


def init_params(key, h_dim, res_h_dim, n_res_layers, embedding_dim,
                n_dimension_changes):
    """Returns (packed params for the Pallas forward, raw PyTorch-shaped params)."""
    keys = jax.random.split(key, 2 + n_dimension_changes + 2 * n_res_layers)
    ki = iter(keys)
    raw = {"down": [], "res": []}
    packed = {"down": [], "res": []}
    chans = [3, h_dim // 2] + [h_dim] * (n_dimension_changes - 1)
    for d in range(n_dimension_changes):
        w, b = _conv_init(next(ki), chans[d + 1], chans[d], 4)
        raw["down"].append((w, b))
        packed["down"].append((_pack_s2d_taps(w), _pack_bias(b)))
    w, b = _conv_init(next(ki), h_dim, h_dim, 3)
    raw["conv_final"] = (w, b)
    packed["conv_final"] = (_pack_taps(w), _pack_bias(b))
    for _ in range(n_res_layers):
        w3, _ = _conv_init(next(ki), res_h_dim, h_dim, 3, bias=False)
        w1, _ = _conv_init(next(ki), h_dim, res_h_dim, 1, bias=False)
        raw["res"].append((w3, w1))
        packed["res"].append((_pack_taps(w3), _pack_taps(w1)))
    w, b = _conv_init(next(ki), embedding_dim, h_dim, 1)
    raw["pre_quant"] = (w, b)
    packed["pre_quant"] = (_pack_taps(w), _pack_bias(b))
    return packed, raw


# ---------------------------------------------------------------------------
# E2EEncoder forward (Pallas)
# ---------------------------------------------------------------------------
@jax.jit
def e2e_encoder_forward(params, x_nchw):
    x = jnp.transpose(x_nchw, (0, 2, 3, 1)).astype(jnp.bfloat16)   # NHWC

    # --- downsampling convs (k4 s2 p1 + ReLU) as 2x2/s1 tap convs ----------
    for w_taps, b in params["down"]:
        n = x.shape[0]
        y, hy, wy = _space_to_depth_pad1(x)
        ho, wo = hy - 1, wy - 1
        m = ho * wy
        rows = _round_up(hy * wy + wy, 8)
        x2 = _flatten_rows(y, rows)
        co = w_taps.shape[-1]
        out = _conv_call(x2, w_taps, b, taps=(0, 1, wy, wy + 1), m=m,
                         out_rows=m, relu_out=True)
        x = out.reshape(n, ho, wy, co)[:, :, :wo, :]

    # --- trunk 3x3 conv + residual stack + fused pre-quant -----------------
    n, h, wd, c = x.shape
    ws = wd + 2
    m = h * ws
    rows = _round_up((h + 2) * ws + ws, 8)
    taps3 = tuple(i * ws + j for i in range(3) for j in range(3))
    center = ws + 1
    col = (jnp.arange(ws) < wd).astype(jnp.float32)
    mask = jnp.tile(col, (h,)).reshape(m, 1)

    x2 = _flatten_rows(jnp.pad(x, ((0, 0), (1, 1), (1, 1), (0, 0))), rows)
    wf, bf = params["conv_final"]
    wq, bq = params["pre_quant"]
    n_res = len(params["res"])

    if n_res == 0:
        a = _conv_call(x2, wf, bf, taps=taps3, m=m, out_rows=m)
        z2 = _conv_call(a, wq, bq, taps=(0,), m=m, out_rows=m,
                        relu_in=True, out_dtype=jnp.float32)
    else:
        # conv_final output is written directly in the padded layout the first
        # residual block consumes (shifted store + pad-column masking).
        a = _conv_call(x2, wf, bf, taps=taps3, m=m, out_rows=rows,
                       shift_off=center, mask=mask)
        for w3, w1 in params["res"][:-1]:
            a = _resblock_call(a, w3, w1, mask, taps=taps3, m=m,
                               center=center, out_rows=rows, shift_off=center)
        w3, w1 = params["res"][-1]
        z2 = _resblock_prequant_call(a, w3, w1, wq, bq, taps=taps3, m=m,
                                     center=center)

    e = z2.shape[-1]
    z = z2.reshape(n, h, ws, e)[:, :, :wd, :]
    return jnp.transpose(z, (0, 3, 1, 2)).astype(jnp.float32)       # NCHW


# ---------------------------------------------------------------------------
# Pure-JAX f32 reference (for a sanity check in __main__)
# ---------------------------------------------------------------------------
def _conv_ref(x, w, b, stride, pad):
    out = jax.lax.conv_general_dilated(
        x, w, window_strides=(stride, stride),
        padding=((pad, pad), (pad, pad)),
        dimension_numbers=("NCHW", "OIHW", "NCHW"))
    if b is not None:
        out = out + b.reshape(1, -1, 1, 1)
    return out


def reference_forward(raw, x):
    h = x
    for w, b in raw["down"]:
        h = jax.nn.relu(_conv_ref(h, w, b, 2, 1))
    w, b = raw["conv_final"]
    h = _conv_ref(h, w, b, 1, 1)
    for w3, w1 in raw["res"]:
        t = jax.nn.relu(h)
        t = _conv_ref(t, w3, None, 1, 1)
        t = jax.nn.relu(t)
        t = _conv_ref(t, w1, None, 1, 0)
        h = h + t
    h = jax.nn.relu(h)
    wq, bq = raw["pre_quant"]
    return _conv_ref(h, wq, bq, 1, 0)


if __name__ == "__main__":
    h_dim = 32
    res_h_dim = 16
    n_res_layers = 2
    embedding_dim = 8
    n_dimension_changes = 2

    key = jax.random.PRNGKey(0)
    kx, kp = jax.random.split(key)
    x = jax.random.normal(kx, (2, 3, 16, 16), jnp.float32)   # NCHW like PyTorch

    params, raw = init_params(kp, h_dim, res_h_dim, n_res_layers,
                              embedding_dim, n_dimension_changes)

    z_e = e2e_encoder_forward(params, x)
    z_e = jax.block_until_ready(z_e)

    expected_hw = 16 // (2 ** n_dimension_changes)
    assert z_e.shape == (2, embedding_dim, expected_hw, expected_hw), z_e.shape
    assert bool(jnp.all(jnp.isfinite(z_e)))

    # bf16 kernel vs f32 reference: generous tolerance (precision choice).
    ref = reference_forward(raw, x)
    err = float(jnp.max(jnp.abs(z_e - ref)) / (jnp.max(jnp.abs(ref)) + 1e-6))
    assert err < 0.08, f"max normalized error {err}"

    print("KERNEL_OK")
</pallas_src>

<mosaic_0001>
module attributes {stable_mosaic.version = 11 : i64} {
  func.func @_conv_kernel(%arg0: i32, %arg1: memref<1x96x12xbf16, #tpu.memory_space<vmem>>, %arg2: memref<4x12x16xbf16, #tpu.memory_space<vmem>>, %arg3: memref<1x16xf32, #tpu.memory_space<vmem>>, %arg4: memref<1x72x16xbf16, #tpu.memory_space<vmem>>) attributes {dimension_semantics = [#tpu.dimension_semantics<parallel>], iteration_bounds = array<i64: 2>, scalar_prefetch = 0 : i64, scratch_operands = 0 : i64, tpu.core_type = #tpu.core_type<tc>, window_params = [{transform_indices = @transform_0, window_bounds = array<i64: 1, 96, 12>}, {pipeline_mode = #tpu.pipeline_mode<synchronous>, transform_indices = @transform_1, window_bounds = array<i64: 4, 12, 16>}, {pipeline_mode = #tpu.pipeline_mode<synchronous>, transform_indices = @transform_2, window_bounds = array<i64: 1, 16>}, {transform_indices = @transform_3, window_bounds = array<i64: 1, 72, 16>}]} {
    %c0 = arith.constant 0 : index
    %c0_0 = arith.constant 0 : index
    %c0_1 = arith.constant 0 : index
    %0 = vector.load %arg1[%c0, %c0_0, %c0_1] : memref<1x96x12xbf16, #tpu.memory_space<vmem>>, vector<1x72x12xbf16>
    %1 = vector.shape_cast %0 : vector<1x72x12xbf16> to vector<72x12xbf16>
    %c0_2 = arith.constant 0 : index
    %c0_3 = arith.constant 0 : index
    %c0_4 = arith.constant 0 : index
    %2 = vector.load %arg2[%c0_2, %c0_3, %c0_4] : memref<4x12x16xbf16, #tpu.memory_space<vmem>>, vector<1x12x16xbf16>
    %3 = vector.shape_cast %2 : vector<1x12x16xbf16> to vector<12x16xbf16>
    %cst = arith.constant dense<0.000000e+00> : vector<72x16xf32>
    %4 = tpu.matmul %1, %3, %cst {dimension_numbers = #tpu.dot_dimension_numbers<[1], [0], [0], [1], [0, 0, 1, 1], [], []>} : vector<72x12xbf16>, vector<12x16xbf16>, vector<72x16xf32> -> vector<72x16xf32>
    %c0_5 = arith.constant 0 : index
    %c1 = arith.constant 1 : index
    %c0_6 = arith.constant 0 : index
    %5 = vector.load %arg1[%c0_5, %c1, %c0_6] : memref<1x96x12xbf16, #tpu.memory_space<vmem>>, vector<1x72x12xbf16>
    %6 = vector.shape_cast %5 : vector<1x72x12xbf16> to vector<72x12xbf16>
    %c1_7 = arith.constant 1 : index
    %c0_8 = arith.constant 0 : index
    %c0_9 = arith.constant 0 : index
    %7 = vector.load %arg2[%c1_7, %c0_8, %c0_9] : memref<4x12x16xbf16, #tpu.memory_space<vmem>>, vector<1x12x16xbf16>
    %8 = vector.shape_cast %7 : vector<1x12x16xbf16> to vector<12x16xbf16>
    %cst_10 = arith.constant dense<0.000000e+00> : vector<72x16xf32>
    %9 = tpu.matmul %6, %8, %cst_10 {dimension_numbers = #tpu.dot_dimension_numbers<[1], [0], [0], [1], [0, 0, 1, 1], [], []>} : vector<72x12xbf16>, vector<12x16xbf16>, vector<72x16xf32> -> vector<72x16xf32>
    %10 = arith.addf %4, %9 : vector<72x16xf32>
    %c0_11 = arith.constant 0 : index
    %c9 = arith.constant 9 : index
    %c0_12 = arith.constant 0 : index
    %11 = vector.load %arg1[%c0_11, %c9, %c0_12] : memref<1x96x12xbf16, #tpu.memory_space<vmem>>, vector<1x72x12xbf16>
    %12 = vector.shape_cast %11 : vector<1x72x12xbf16> to vector<72x12xbf16>
    %c2 = arith.constant 2 : index
    %c0_13 = arith.constant 0 : index
    %c0_14 = arith.constant 0 : index
    %13 = vector.load %arg2[%c2, %c0_13, %c0_14] : memref<4x12x16xbf16, #tpu.memory_space<vmem>>, vector<1x12x16xbf16>
    %14 = vector.shape_cast %13 : vector<1x12x16xbf16> to vector<12x16xbf16>
    %cst_15 = arith.constant dense<0.000000e+00> : vector<72x16xf32>
    %15 = tpu.matmul %12, %14, %cst_15 {dimension_numbers = #tpu.dot_dimension_numbers<[1], [0], [0], [1], [0, 0, 1, 1], [], []>} : vector<72x12xbf16>, vector<12x16xbf16>, vector<72x16xf32> -> vector<72x16xf32>
    %16 = arith.addf %10, %15 : vector<72x16xf32>
    %c0_16 = arith.constant 0 : index
    %c10 = arith.constant 10 : index
    %c0_17 = arith.constant 0 : index
    %17 = vector.load %arg1[%c0_16, %c10, %c0_17] : memref<1x96x12xbf16, #tpu.memory_space<vmem>>, vector<1x72x12xbf16>
    %18 = vector.shape_cast %17 : vector<1x72x12xbf16> to vector<72x12xbf16>
    %c3 = arith.constant 3 : index
    %c0_18 = arith.constant 0 : index
    %c0_19 = arith.constant 0 : index
    %19 = vector.load %arg2[%c3, %c0_18, %c0_19] : memref<4x12x16xbf16, #tpu.memory_space<vmem>>, vector<1x12x16xbf16>
    %20 = vector.shape_cast %19 : vector<1x12x16xbf16> to vector<12x16xbf16>
    %cst_20 = arith.constant dense<0.000000e+00> : vector<72x16xf32>
    %21 = tpu.matmul %18, %20, %cst_20 {dimension_numbers = #tpu.dot_dimension_numbers<[1], [0], [0], [1], [0, 0, 1, 1], [], []>} : vector<72x12xbf16>, vector<12x16xbf16>, vector<72x16xf32> -> vector<72x16xf32>
    %22 = arith.addf %16, %21 : vector<72x16xf32>
    %c0_21 = arith.constant 0 : index
    %c0_22 = arith.constant 0 : index
    %23 = vector.load %arg3[%c0_21, %c0_22] : memref<1x16xf32, #tpu.memory_space<vmem>>, vector<1x16xf32>
    %24 = vector.broadcast %23 : vector<1x16xf32> to vector<72x16xf32>
    %25 = arith.addf %22, %24 : vector<72x16xf32>
    %cst_23 = arith.constant 0.000000e+00 : f32
    %26 = vector.broadcast %cst_23 : f32 to vector<72x16xf32>
    %27 = arith.maximumf %25, %26 : vector<72x16xf32>
    %28 = arith.truncf %27 : vector<72x16xf32> to vector<72x16xbf16>
    %c0_24 = arith.constant 0 : index
    %c0_25 = arith.constant 0 : index
    %c0_26 = arith.constant 0 : index
    %29 = vector.load %arg4[%c0_24, %c0_25, %c0_26] : memref<1x72x16xbf16, #tpu.memory_space<vmem>>, vector<1x72x16xbf16>
    %30 = vector.shape_cast %29 : vector<1x72x16xbf16> to vector<72x16xbf16>
    %31 = vector.shape_cast %28 : vector<72x16xbf16> to vector<1x72x16xbf16>
    tpu.vector_store %arg4[%c0_24, %c0_25, %c0_26], %31 {strides = array<i32>} : memref<1x72x16xbf16, #tpu.memory_space<vmem>>, vector<1x72x16xbf16>,
    return
  }
  func.func @transform_0(%arg0: i32) -> (i32, i32, i32) {
    %c0_i32 = arith.constant 0 : i32
    %c0_i32_0 = arith.constant 0 : i32
    %c0_i32_1 = arith.constant 0 : i32
    return %arg0, %c0_i32, %c0_i32_0 : i32, i32, i32
  }
  func.func @transform_1(%arg0: i32) -> (i32, i32, i32) {
    %c0_i32 = arith.constant 0 : i32
    %c0_i32_0 = arith.constant 0 : i32
    %c0_i32_1 = arith.constant 0 : i32
    %c0_i32_2 = arith.constant 0 : i32
    return %c0_i32, %c0_i32_0, %c0_i32_1 : i32, i32, i32
  }
  func.func @transform_2(%arg0: i32) -> (i32, i32) {
    %c0_i32 = arith.constant 0 : i32
    %c0_i32_0 = arith.constant 0 : i32
    %c0_i32_1 = arith.constant 0 : i32
    return %c0_i32, %c0_i32_0 : i32, i32
  }
  func.func @transform_3(%arg0: i32) -> (i32, i32, i32) {
    %c0_i32 = arith.constant 0 : i32
    %c0_i32_0 = arith.constant 0 : i32
    %c0_i32_1 = arith.constant 0 : i32
    return %arg0, %c0_i32, %c0_i32_0 : i32, i32, i32
  }
}

module attributes {stable_mosaic.version = 11 : i64} {
  func.func @_conv_kernel(%arg0: i32, %arg1: memref<1x32x64xbf16, #tpu.memory_space<vmem>>, %arg2: memref<4x64x32xbf16, #tpu.memory_space<vmem>>, %arg3: memref<1x32xf32, #tpu.memory_space<vmem>>, %arg4: memref<1x20x32xbf16, #tpu.memory_space<vmem>>) attributes {dimension_semantics = [#tpu.dimension_semantics<parallel>], iteration_bounds = array<i64: 2>, scalar_prefetch = 0 : i64, scratch_operands = 0 : i64, tpu.core_type = #tpu.core_type<tc>, window_params = [{transform_indices = @transform_0, window_bounds = array<i64: 1, 32, 64>}, {pipeline_mode = #tpu.pipeline_mode<synchronous>, transform_indices = @transform_1, window_bounds = array<i64: 4, 64, 32>}, {pipeline_mode = #tpu.pipeline_mode<synchronous>, transform_indices = @transform_2, window_bounds = array<i64: 1, 32>}, {transform_indices = @transform_3, window_bounds = array<i64: 1, 20, 32>}]} {
    %c0 = arith.constant 0 : index
    %c0_0 = arith.constant 0 : index
    %c0_1 = arith.constant 0 : index
    %0 = vector.load %arg1[%c0, %c0_0, %c0_1] : memref<1x32x64xbf16, #tpu.memory_space<vmem>>, vector<1x20x64xbf16>
    %1 = vector.shape_cast %0 : vector<1x20x64xbf16> to vector<20x64xbf16>
    %c0_2 = arith.constant 0 : index
    %c0_3 = arith.constant 0 : index
    %c0_4 = arith.constant 0 : index
    %2 = vector.load %arg2[%c0_2, %c0_3, %c0_4] : memref<4x64x32xbf16, #tpu.memory_space<vmem>>, vector<1x64x32xbf16>
    %3 = vector.shape_cast %2 : vector<1x64x32xbf16> to vector<64x32xbf16>
    %cst = arith.constant dense<0.000000e+00> : vector<20x32xf32>
    %4 = tpu.matmul %1, %3, %cst {dimension_numbers = #tpu.dot_dimension_numbers<[1], [0], [0], [1], [0, 0, 1, 1], [], []>} : vector<20x64xbf16>, vector<64x32xbf16>, vector<20x32xf32> -> vector<20x32xf32>
    %c0_5 = arith.constant 0 : index
    %c1 = arith.constant 1 : index
    %c0_6 = arith.constant 0 : index
    %5 = vector.load %arg1[%c0_5, %c1, %c0_6] : memref<1x32x64xbf16, #tpu.memory_space<vmem>>, vector<1x20x64xbf16>
    %6 = vector.shape_cast %5 : vector<1x20x64xbf16> to vector<20x64xbf16>
    %c1_7 = arith.constant 1 : index
    %c0_8 = arith.constant 0 : index
    %c0_9 = arith.constant 0 : index
    %7 = vector.load %arg2[%c1_7, %c0_8, %c0_9] : memref<4x64x32xbf16, #tpu.memory_space<vmem>>, vector<1x64x32xbf16>
    %8 = vector.shape_cast %7 : vector<1x64x32xbf16> to vector<64x32xbf16>
    %cst_10 = arith.constant dense<0.000000e+00> : vector<20x32xf32>
    %9 = tpu.matmul %6, %8, %cst_10 {dimension_numbers = #tpu.dot_dimension_numbers<[1], [0], [0], [1], [0, 0, 1, 1], [], []>} : vector<20x64xbf16>, vector<64x32xbf16>, vector<20x32xf32> -> vector<20x32xf32>
    %10 = arith.addf %4, %9 : vector<20x32xf32>
    %c0_11 = arith.constant 0 : index
    %c5 = arith.constant 5 : index
    %c0_12 = arith.constant 0 : index
    %11 = vector.load %arg1[%c0_11, %c5, %c0_12] : memref<1x32x64xbf16, #tpu.memory_space<vmem>>, vector<1x20x64xbf16>
    %12 = vector.shape_cast %11 : vector<1x20x64xbf16> to vector<20x64xbf16>
    %c2 = arith.constant 2 : index
    %c0_13 = arith.constant 0 : index
    %c0_14 = arith.constant 0 : index
    %13 = vector.load %arg2[%c2, %c0_13, %c0_14] : memref<4x64x32xbf16, #tpu.memory_space<vmem>>, vector<1x64x32xbf16>
    %14 = vector.shape_cast %13 : vector<1x64x32xbf16> to vector<64x32xbf16>
    %cst_15 = arith.constant dense<0.000000e+00> : vector<20x32xf32>
    %15 = tpu.matmul %12, %14, %cst_15 {dimension_numbers = #tpu.dot_dimension_numbers<[1], [0], [0], [1], [0, 0, 1, 1], [], []>} : vector<20x64xbf16>, vector<64x32xbf16>, vector<20x32xf32> -> vector<20x32xf32>
    %16 = arith.addf %10, %15 : vector<20x32xf32>
    %c0_16 = arith.constant 0 : index
    %c6 = arith.constant 6 : index
    %c0_17 = arith.constant 0 : index
    %17 = vector.load %arg1[%c0_16, %c6, %c0_17] : memref<1x32x64xbf16, #tpu.memory_space<vmem>>, vector<1x20x64xbf16>
    %18 = vector.shape_cast %17 : vector<1x20x64xbf16> to vector<20x64xbf16>
    %c3 = arith.constant 3 : index
    %c0_18 = arith.constant 0 : index
    %c0_19 = arith.constant 0 : index
    %19 = vector.load %arg2[%c3, %c0_18, %c0_19] : memref<4x64x32xbf16, #tpu.memory_space<vmem>>, vector<1x64x32xbf16>
    %20 = vector.shape_cast %19 : vector<1x64x32xbf16> to vector<64x32xbf16>
    %cst_20 = arith.constant dense<0.000000e+00> : vector<20x32xf32>
    %21 = tpu.matmul %18, %20, %cst_20 {dimension_numbers = #tpu.dot_dimension_numbers<[1], [0], [0], [1], [0, 0, 1, 1], [], []>} : vector<20x64xbf16>, vector<64x32xbf16>, vector<20x32xf32> -> vector<20x32xf32>
    %22 = arith.addf %16, %21 : vector<20x32xf32>
    %c0_21 = arith.constant 0 : index
    %c0_22 = arith.constant 0 : index
    %23 = vector.load %arg3[%c0_21, %c0_22] : memref<1x32xf32, #tpu.memory_space<vmem>>, vector<1x32xf32>
    %24 = vector.broadcast %23 : vector<1x32xf32> to vector<20x32xf32>
    %25 = arith.addf %22, %24 : vector<20x32xf32>
    %cst_23 = arith.constant 0.000000e+00 : f32
    %26 = vector.broadcast %cst_23 : f32 to vector<20x32xf32>
    %27 = arith.maximumf %25, %26 : vector<20x32xf32>
    %28 = arith.truncf %27 : vector<20x32xf32> to vector<20x32xbf16>
    %c0_24 = arith.constant 0 : index
    %c0_25 = arith.constant 0 : index
    %c0_26 = arith.constant 0 : index
    %29 = vector.load %arg4[%c0_24, %c0_25, %c0_26] : memref<1x20x32xbf16, #tpu.memory_space<vmem>>, vector<1x20x32xbf16>
    %30 = vector.shape_cast %29 : vector<1x20x32xbf16> to vector<20x32xbf16>
    %31 = vector.shape_cast %28 : vector<20x32xbf16> to vector<1x20x32xbf16>
    tpu.vector_store %arg4[%c0_24, %c0_25, %c0_26], %31 {strides = array<i32>} : memref<1x20x32xbf16, #tpu.memory_space<vmem>>, vector<1x20x32xbf16>,
    return
  }
  func.func @transform_0(%arg0: i32) -> (i32, i32, i32) {
    %c0_i32 = arith.constant 0 : i32
    %c0_i32_0 = arith.constant 0 : i32
    %c0_i32_1 = arith.constant 0 : i32
    return %arg0, %c0_i32, %c0_i32_0 : i32, i32, i32
  }
  func.func @transform_1(%arg0: i32) -> (i32, i32, i32) {
    %c0_i32 = arith.constant 0 : i32
    %c0_i32_0 = arith.constant 0 : i32
    %c0_i32_1 = arith.constant 0 : i32
    %c0_i32_2 = arith.constant 0 : i32
    return %c0_i32, %c0_i32_0, %c0_i32_1 : i32, i32, i32
  }
  func.func @transform_2(%arg0: i32) -> (i32, i32) {
    %c0_i32 = arith.constant 0 : i32
    %c0_i32_0 = arith.constant 0 : i32
    %c0_i32_1 = arith.constant 0 : i32
    return %c0_i32, %c0_i32_0 : i32, i32
  }
  func.func @transform_3(%arg0: i32) -> (i32, i32, i32) {
    %c0_i32 = arith.constant 0 : i32
    %c0_i32_0 = arith.constant 0 : i32
    %c0_i32_1 = arith.constant 0 : i32
    return %arg0, %c0_i32, %c0_i32_0 : i32, i32, i32
  }
}

module attributes {stable_mosaic.version = 11 : i64} {
  func.func @_conv_kernel(%arg0: i32, %arg1: memref<1x48x32xbf16, #tpu.memory_space<vmem>>, %arg2: memref<9x32x32xbf16, #tpu.memory_space<vmem>>, %arg3: memref<1x32xf32, #tpu.memory_space<vmem>>, %arg4: memref<24x1xf32, #tpu.memory_space<vmem>>, %arg5: memref<1x48x32xbf16, #tpu.memory_space<vmem>>) attributes {dimension_semantics = [#tpu.dimension_semantics<parallel>], iteration_bounds = array<i64: 2>, scalar_prefetch = 0 : i64, scratch_operands = 0 : i64, tpu.core_type = #tpu.core_type<tc>, window_params = [{transform_indices = @transform_0, window_bounds = array<i64: 1, 48, 32>}, {pipeline_mode = #tpu.pipeline_mode<synchronous>, transform_indices = @transform_1, window_bounds = array<i64: 9, 32, 32>}, {pipeline_mode = #tpu.pipeline_mode<synchronous>, transform_indices = @transform_2, window_bounds = array<i64: 1, 32>}, {pipeline_mode = #tpu.pipeline_mode<synchronous>, transform_indices = @transform_3, window_bounds = array<i64: 24, 1>}, {transform_indices = @transform_4, window_bounds = array<i64: 1, 48, 32>}]} {
    %c0 = arith.constant 0 : index
    %c0_0 = arith.constant 0 : index
    %c0_1 = arith.constant 0 : index
    %0 = vector.load %arg1[%c0, %c0_0, %c0_1] : memref<1x48x32xbf16, #tpu.memory_space<vmem>>, vector<1x24x32xbf16>
    %1 = vector.shape_cast %0 : vector<1x24x32xbf16> to vector<24x32xbf16>
    %c0_2 = arith.constant 0 : index
    %c0_3 = arith.constant 0 : index
    %c0_4 = arith.constant 0 : index
    %2 = vector.load %arg2[%c0_2, %c0_3, %c0_4] : memref<9x32x32xbf16, #tpu.memory_space<vmem>>, vector<1x32x32xbf16>
    %3 = vector.shape_cast %2 : vector<1x32x32xbf16> to vector<32x32xbf16>
    %cst = arith.constant dense<0.000000e+00> : vector<24x32xf32>
    %4 = tpu.matmul %1, %3, %cst {dimension_numbers = #tpu.dot_dimension_numbers<[1], [0], [0], [1], [0, 0, 1, 1], [], []>} : vector<24x32xbf16>, vector<32x32xbf16>, vector<24x32xf32> -> vector<24x32xf32>
    %c0_5 = arith.constant 0 : index
    %c1 = arith.constant 1 : index
    %c0_6 = arith.constant 0 : index
    %5 = vector.load %arg1[%c0_5, %c1, %c0_6] : memref<1x48x32xbf16, #tpu.memory_space<vmem>>, vector<1x24x32xbf16>
    %6 = vector.shape_cast %5 : vector<1x24x32xbf16> to vector<24x32xbf16>
    %c1_7 = arith.constant 1 : index
    %c0_8 = arith.constant 0 : index
    %c0_9 = arith.constant 0 : index
    %7 = vector.load %arg2[%c1_7, %c0_8, %c0_9] : memref<9x32x32xbf16, #tpu.memory_space<vmem>>, vector<1x32x32xbf16>
    %8 = vector.shape_cast %7 : vector<1x32x32xbf16> to vector<32x32xbf16>
    %cst_10 = arith.constant dense<0.000000e+00> : vector<24x32xf32>
    %9 = tpu.matmul %6, %8, %cst_10 {dimension_numbers = #tpu.dot_dimension_numbers<[1], [0], [0], [1], [0, 0, 1, 1], [], []>} : vector<24x32xbf16>, vector<32x32xbf16>, vector<24x32xf32> -> vector<24x32xf32>
    %10 = arith.addf %4, %9 : vector<24x32xf32>
    %c0_11 = arith.constant 0 : index
    %c2 = arith.constant 2 : index
    %c0_12 = arith.constant 0 : index
    %11 = vector.load %arg1[%c0_11, %c2, %c0_12] : memref<1x48x32xbf16, #tpu.memory_space<vmem>>, vector<1x24x32xbf16>
    %12 = vector.shape_cast %11 : vector<1x24x32xbf16> to vector<24x32xbf16>
    %c2_13 = arith.constant 2 : index
    %c0_14 = arith.constant 0 : index
    %c0_15 = arith.constant 0 : index
    %13 = vector.load %arg2[%c2_13, %c0_14, %c0_15] : memref<9x32x32xbf16, #tpu.memory_space<vmem>>, vector<1x32x32xbf16>
    %14 = vector.shape_cast %13 : vector<1x32x32xbf16> to vector<32x32xbf16>
    %cst_16 = arith.constant dense<0.000000e+00> : vector<24x32xf32>
    %15 = tpu.matmul %12, %14, %cst_16 {dimension_numbers = #tpu.dot_dimension_numbers<[1], [0], [0], [1], [0, 0, 1, 1], [], []>} : vector<24x32xbf16>, vector<32x32xbf16>, vector<24x32xf32> -> vector<24x32xf32>
    %16 = arith.addf %10, %15 : vector<24x32xf32>
    %c0_17 = arith.constant 0 : index
    %c6 = arith.constant 6 : index
    %c0_18 = arith.constant 0 : index
    %17 = vector.load %arg1[%c0_17, %c6, %c0_18] : memref<1x48x32xbf16, #tpu.memory_space<vmem>>, vector<1x24x32xbf16>
    %18 = vector.shape_cast %17 : vector<1x24x32xbf16> to vector<24x32xbf16>
    %c3 = arith.constant 3 : index
    %c0_19 = arith.constant 0 : index
    %c0_20 = arith.constant 0 : index
    %19 = vector.load %arg2[%c3, %c0_19, %c0_20] : memref<9x32x32xbf16, #tpu.memory_space<vmem>>, vector<1x32x32xbf16>
    %20 = vector.shape_cast %19 : vector<1x32x32xbf16> to vector<32x32xbf16>
    %cst_21 = arith.constant dense<0.000000e+00> : vector<24x32xf32>
    %21 = tpu.matmul %18, %20, %cst_21 {dimension_numbers = #tpu.dot_dimension_numbers<[1], [0], [0], [1], [0, 0, 1, 1], [], []>} : vector<24x32xbf16>, vector<32x32xbf16>, vector<24x32xf32> -> vector<24x32xf32>
    %22 = arith.addf %16, %21 : vector<24x32xf32>
    %c0_22 = arith.constant 0 : index
    %c7 = arith.constant 7 : index
    %c0_23 = arith.constant 0 : index
    %23 = vector.load %arg1[%c0_22, %c7, %c0_23] : memref<1x48x32xbf16, #tpu.memory_space<vmem>>, vector<1x24x32xbf16>
    %24 = vector.shape_cast %23 : vector<1x24x32xbf16> to vector<24x32xbf16>
    %c4 = arith.constant 4 : index
    %c0_24 = arith.constant 0 : index
    %c0_25 = arith.constant 0 : index
    %25 = vector.load %arg2[%c4, %c0_24, %c0_25] : memref<9x32x32xbf16, #tpu.memory_space<vmem>>, vector<1x32x32xbf16>
    %26 = vector.shape_cast %25 : vector<1x32x32xbf16> to vector<32x32xbf16>
    %cst_26 = arith.constant dense<0.000000e+00> : vector<24x32xf32>
    %27 = tpu.matmul %24, %26, %cst_26 {dimension_numbers = #tpu.dot_dimension_numbers<[1], [0], [0], [1], [0, 0, 1, 1], [], []>} : vector<24x32xbf16>, vector<32x32xbf16>, vector<24x32xf32> -> vector<24x32xf32>
    %28 = arith.addf %22, %27 : vector<24x32xf32>
    %c0_27 = arith.constant 0 : index
    %c8 = arith.constant 8 : index
    %c0_28 = arith.constant 0 : index
    %29 = vector.load %arg1[%c0_27, %c8, %c0_28] : memref<1x48x32xbf16, #tpu.memory_space<vmem>>, vector<1x24x32xbf16>
    %30 = vector.shape_cast %29 : vector<1x24x32xbf16> to vector<24x32xbf16>
    %c5 = arith.constant 5 : index
    %c0_29 = arith.constant 0 : index
    %c0_30 = arith.constant 0 : index
    %31 = vector.load %arg2[%c5, %c0_29, %c0_30] : memref<9x32x32xbf16, #tpu.memory_space<vmem>>, vector<1x32x32xbf16>
    %32 = vector.shape_cast %31 : vector<1x32x32xbf16> to vector<32x32xbf16>
    %cst_31 = arith.constant dense<0.000000e+00> : vector<24x32xf32>
    %33 = tpu.matmul %30, %32, %cst_31 {dimension_numbers = #tpu.dot_dimension_numbers<[1], [0], [0], [1], [0, 0, 1, 1], [], []>} : vector<24x32xbf16>, vector<32x32xbf16>, vector<24x32xf32> -> vector<24x32xf32>
    %34 = arith.addf %28, %33 : vector<24x32xf32>
    %c0_32 = arith.constant 0 : index
    %c12 = arith.constant 12 : index
    %c0_33 = arith.constant 0 : index
    %35 = vector.load %arg1[%c0_32, %c12, %c0_33] : memref<1x48x32xbf16, #tpu.memory_space<vmem>>, vector<1x24x32xbf16>
    %36 = vector.shape_cast %35 : vector<1x24x32xbf16> to vector<24x32xbf16>
    %c6_34 = arith.constant 6 : index
    %c0_35 = arith.constant 0 : index
    %c0_36 = arith.constant 0 : index
    %37 = vector.load %arg2[%c6_34, %c0_35, %c0_36] : memref<9x32x32xbf16, #tpu.memory_space<vmem>>, vector<1x32x32xbf16>
    %38 = vector.shape_cast %37 : vector<1x32x32xbf16> to vector<32x32xbf16>
    %cst_37 = arith.constant dense<0.000000e+00> : vector<24x32xf32>
    %39 = tpu.matmul %36, %38, %cst_37 {dimension_numbers = #tpu.dot_dimension_numbers<[1], [0], [0], [1], [0, 0, 1, 1], [], []>} : vector<24x32xbf16>, vector<32x32xbf16>, vector<24x32xf32> -> vector<24x32xf32>
    %40 = arith.addf %34, %39 : vector<24x32xf32>
    %c0_38 = arith.constant 0 : index
    %c13 = arith.constant 13 : index
    %c0_39 = arith.constant 0 : index
    %41 = vector.load %arg1[%c0_38, %c13, %c0_39] : memref<1x48x32xbf16, #tpu.memory_space<vmem>>, vector<1x24x32xbf16>
    %42 = vector.shape_cast %41 : vector<1x24x32xbf16> to vector<24x32xbf16>
    %c7_40 = arith.constant 7 : index
    %c0_41 = arith.constant 0 : index
    %c0_42 = arith.constant 0 : index
    %43 = vector.load %arg2[%c7_40, %c0_41, %c0_42] : memref<9x32x32xbf16, #tpu.memory_space<vmem>>, vector<1x32x32xbf16>
    %44 = vector.shape_cast %43 : vector<1x32x32xbf16> to vector<32x32xbf16>
    %cst_43 = arith.constant dense<0.000000e+00> : vector<24x32xf32>
    %45 = tpu.matmul %42, %44, %cst_43 {dimension_numbers = #tpu.dot_dimension_numbers<[1], [0], [0], [1], [0, 0, 1, 1], [], []>} : vector<24x32xbf16>, vector<32x32xbf16>, vector<24x32xf32> -> vector<24x32xf32>
    %46 = arith.addf %40, %45 : vector<24x32xf32>
    %c0_44 = arith.constant 0 : index
    %c14 = arith.constant 14 : index
    %c0_45 = arith.constant 0 : index
    %47 = vector.load %arg1[%c0_44, %c14, %c0_45] : memref<1x48x32xbf16, #tpu.memory_space<vmem>>, vector<1x24x32xbf16>
    %48 = vector.shape_cast %47 : vector<1x24x32xbf16> to vector<24x32xbf16>
    %c8_46 = arith.constant 8 : index
    %c0_47 = arith.constant 0 : index
    %c0_48 = arith.constant 0 : index
    %49 = vector.load %arg2[%c8_46, %c0_47, %c0_48] : memref<9x32x32xbf16, #tpu.memory_space<vmem>>, vector<1x32x32xbf16>
    %50 = vector.shape_cast %49 : vector<1x32x32xbf16> to vector<32x32xbf16>
    %cst_49 = arith.constant dense<0.000000e+00> : vector<24x32xf32>
    %51 = tpu.matmul %48, %50, %cst_49 {dimension_numbers = #tpu.dot_dimension_numbers<[1], [0], [0], [1], [0, 0, 1, 1], [], []>} : vector<24x32xbf16>, vector<32x32xbf16>, vector<24x32xf32> -> vector<24x32xf32>
    %52 = arith.addf %46, %51 : vector<24x32xf32>
    %c0_50 = arith.constant 0 : index
    %c0_51 = arith.constant 0 : index
    %53 = vector.load %arg3[%c0_50, %c0_51] : memref<1x32xf32, #tpu.memory_space<vmem>>, vector<1x32xf32>
    %54 = vector.broadcast %53 : vector<1x32xf32> to vector<24x32xf32>
    %55 = arith.addf %52, %54 : vector<24x32xf32>
    %c0_52 = arith.constant 0 : index
    %c0_53 = arith.constant 0 : index
    %56 = vector.load %arg4[%c0_52, %c0_53] : memref<24x1xf32, #tpu.memory_space<vmem>>, vector<24x1xf32>
    %57 = vector.broadcast %56 : vector<24x1xf32> to vector<24x32xf32>
    %58 = arith.mulf %55, %57 : vector<24x32xf32>
    %cst_54 = arith.constant 0.000000e+00 : bf16
    %59 = vector.broadcast %cst_54 : bf16 to vector<48x32xbf16>
    %c0_55 = arith.constant 0 : index
    %c0_56 = arith.constant 0 : index
    %c0_57 = arith.constant 0 : index
    %60 = vector.load %arg5[%c0_55, %c0_56, %c0_57] : memref<1x48x32xbf16, #tpu.memory_space<vmem>>, vector<1x48x32xbf16>
    %61 = vector.shape_cast %60 : vector<1x48x32xbf16> to vector<48x32xbf16>
    %62 = vector.shape_cast %59 : vector<48x32xbf16> to vector<1x48x32xbf16>
    tpu.vector_store %arg5[%c0_55, %c0_56, %c0_57], %62 {strides = array<i32>} : memref<1x48x32xbf16, #tpu.memory_space<vmem>>, vector<1x48x32xbf16>,
    %63 = arith.truncf %58 : vector<24x32xf32> to vector<24x32xbf16>
    %c0_58 = arith.constant 0 : index
    %c7_59 = arith.constant 7 : index
    %c0_60 = arith.constant 0 : index
    %64 = vector.load %arg5[%c0_58, %c7_59, %c0_60] : memref<1x48x32xbf16, #tpu.memory_space<vmem>>, vector<1x24x32xbf16>
    %65 = vector.shape_cast %64 : vector<1x24x32xbf16> to vector<24x32xbf16>
    %66 = vector.shape_cast %63 : vector<24x32xbf16> to vector<1x24x32xbf16>
    tpu.vector_store %arg5[%c0_58, %c7_59, %c0_60], %66 {strides = array<i32>} : memref<1x48x32xbf16, #tpu.memory_space<vmem>>, vector<1x24x32xbf16>,
    return
  }
  func.func @transform_0(%arg0: i32) -> (i32, i32, i32) {
    %c0_i32 = arith.constant 0 : i32
    %c0_i32_0 = arith.constant 0 : i32
    %c0_i32_1 = arith.constant 0 : i32
    return %arg0, %c0_i32, %c0_i32_0 : i32, i32, i32
  }
  func.func @transform_1(%arg0: i32) -> (i32, i32, i32) {
    %c0_i32 = arith.constant 0 : i32
    %c0_i32_0 = arith.constant 0 : i32
    %c0_i32_1 = arith.constant 0 : i32
    %c0_i32_2 = arith.constant 0 : i32
    return %c0_i32, %c0_i32_0, %c0_i32_1 : i32, i32, i32
  }
  func.func @transform_2(%arg0: i32) -> (i32, i32) {
    %c0_i32 = arith.constant 0 : i32
    %c0_i32_0 = arith.constant 0 : i32
    %c0_i32_1 = arith.constant 0 : i32
    return %c0_i32, %c0_i32_0 : i32, i32
  }
  func.func @transform_3(%arg0: i32) -> (i32, i32) {
    %c0_i32 = arith.constant 0 : i32
    %c0_i32_0 = arith.constant 0 : i32
    %c0_i32_1 = arith.constant 0 : i32
    return %c0_i32, %c0_i32_0 : i32, i32
  }
  func.func @transform_4(%arg0: i32) -> (i32, i32, i32) {
    %c0_i32 = arith.constant 0 : i32
    %c0_i32_0 = arith.constant 0 : i32
    %c0_i32_1 = arith.constant 0 : i32
    return %arg0, %c0_i32, %c0_i32_0 : i32, i32, i32
  }
}

module attributes {stable_mosaic.version = 11 : i64} {
  func.func @_resblock_kernel(%arg0: i32, %arg1: memref<1x48x32xbf16, #tpu.memory_space<vmem>>, %arg2: memref<9x32x16xbf16, #tpu.memory_space<vmem>>, %arg3: memref<1x16x32xbf16, #tpu.memory_space<vmem>>, %arg4: memref<24x1xf32, #tpu.memory_space<vmem>>, %arg5: memref<1x48x32xbf16, #tpu.memory_space<vmem>>) attributes {dimension_semantics = [#tpu.dimension_semantics<parallel>], iteration_bounds = array<i64: 2>, scalar_prefetch = 0 : i64, scratch_operands = 0 : i64, tpu.core_type = #tpu.core_type<tc>, window_params = [{transform_indices = @transform_0, window_bounds = array<i64: 1, 48, 32>}, {pipeline_mode = #tpu.pipeline_mode<synchronous>, transform_indices = @transform_1, window_bounds = array<i64: 9, 32, 16>}, {pipeline_mode = #tpu.pipeline_mode<synchronous>, transform_indices = @transform_2, window_bounds = array<i64: 1, 16, 32>}, {pipeline_mode = #tpu.pipeline_mode<synchronous>, transform_indices = @transform_3, window_bounds = array<i64: 24, 1>}, {transform_indices = @transform_4, window_bounds = array<i64: 1, 48, 32>}]} {
    %c0 = arith.constant 0 : index
    %c0_0 = arith.constant 0 : index
    %c0_1 = arith.constant 0 : index
    %0 = vector.load %arg1[%c0, %c0_0, %c0_1] : memref<1x48x32xbf16, #tpu.memory_space<vmem>>, vector<1x24x32xbf16>
    %1 = vector.shape_cast %0 : vector<1x24x32xbf16> to vector<24x32xbf16>
    %cst = arith.constant 0.000000e+00 : bf16
    %2 = vector.broadcast %cst : bf16 to vector<24x32xbf16>
    %3 = arith.maximumf %1, %2 : vector<24x32xbf16>
    %c0_2 = arith.constant 0 : index
    %c0_3 = arith.constant 0 : index
    %c0_4 = arith.constant 0 : index
    %4 = vector.load %arg2[%c0_2, %c0_3, %c0_4] : memref<9x32x16xbf16, #tpu.memory_space<vmem>>, vector<1x32x16xbf16>
    %5 = vector.shape_cast %4 : vector<1x32x16xbf16> to vector<32x16xbf16>
    %cst_5 = arith.constant dense<0.000000e+00> : vector<24x16xf32>
    %6 = tpu.matmul %3, %5, %cst_5 {dimension_numbers = #tpu.dot_dimension_numbers<[1], [0], [0], [1], [0, 0, 1, 1], [], []>} : vector<24x32xbf16>, vector<32x16xbf16>, vector<24x16xf32> -> vector<24x16xf32>
    %c0_6 = arith.constant 0 : index
    %c1 = arith.constant 1 : index
    %c0_7 = arith.constant 0 : index
    %7 = vector.load %arg1[%c0_6, %c1, %c0_7] : memref<1x48x32xbf16, #tpu.memory_space<vmem>>, vector<1x24x32xbf16>
    %8 = vector.shape_cast %7 : vector<1x24x32xbf16> to vector<24x32xbf16>
    %cst_8 = arith.constant 0.000000e+00 : bf16
    %9 = vector.broadcast %cst_8 : bf16 to vector<24x32xbf16>
    %10 = arith.maximumf %8, %9 : vector<24x32xbf16>
    %c1_9 = arith.constant 1 : index
    %c0_10 = arith.constant 0 : index
    %c0_11 = arith.constant 0 : index
    %11 = vector.load %arg2[%c1_9, %c0_10, %c0_11] : memref<9x32x16xbf16, #tpu.memory_space<vmem>>, vector<1x32x16xbf16>
    %12 = vector.shape_cast %11 : vector<1x32x16xbf16> to vector<32x16xbf16>
    %cst_12 = arith.constant dense<0.000000e+00> : vector<24x16xf32>
    %13 = tpu.matmul %10, %12, %cst_12 {dimension_numbers = #tpu.dot_dimension_numbers<[1], [0], [0], [1], [0, 0, 1, 1], [], []>} : vector<24x32xbf16>, vector<32x16xbf16>, vector<24x16xf32> -> vector<24x16xf32>
    %14 = arith.addf %6, %13 : vector<24x16xf32>
    %c0_13 = arith.constant 0 : index
    %c2 = arith.constant 2 : index
    %c0_14 = arith.constant 0 : index
    %15 = vector.load %arg1[%c0_13, %c2, %c0_14] : memref<1x48x32xbf16, #tpu.memory_space<vmem>>, vector<1x24x32xbf16>
    %16 = vector.shape_cast %15 : vector<1x24x32xbf16> to vector<24x32xbf16>
    %cst_15 = arith.constant 0.000000e+00 : bf16
    %17 = vector.broadcast %cst_15 : bf16 to vector<24x32xbf16>
    %18 = arith.maximumf %16, %17 : vector<24x32xbf16>
    %c2_16 = arith.constant 2 : index
    %c0_17 = arith.constant 0 : index
    %c0_18 = arith.constant 0 : index
    %19 = vector.load %arg2[%c2_16, %c0_17, %c0_18] : memref<9x32x16xbf16, #tpu.memory_space<vmem>>, vector<1x32x16xbf16>
    %20 = vector.shape_cast %19 : vector<1x32x16xbf16> to vector<32x16xbf16>
    %cst_19 = arith.constant dense<0.000000e+00> : vector<24x16xf32>
    %21 = tpu.matmul %18, %20, %cst_19 {dimension_numbers = #tpu.dot_dimension_numbers<[1], [0], [0], [1], [0, 0, 1, 1], [], []>} : vector<24x32xbf16>, vector<32x16xbf16>, vector<24x16xf32> -> vector<24x16xf32>
    %22 = arith.addf %14, %21 : vector<24x16xf32>
    %c0_20 = arith.constant 0 : index
    %c6 = arith.constant 6 : index
    %c0_21 = arith.constant 0 : index
    %23 = vector.load %arg1[%c0_20, %c6, %c0_21] : memref<1x48x32xbf16, #tpu.memory_space<vmem>>, vector<1x24x32xbf16>
    %24 = vector.shape_cast %23 : vector<1x24x32xbf16> to vector<24x32xbf16>
    %cst_22 = arith.constant 0.000000e+00 : bf16
    %25 = vector.broadcast %cst_22 : bf16 to vector<24x32xbf16>
    %26 = arith.maximumf %24, %25 : vector<24x32xbf16>
    %c3 = arith.constant 3 : index
    %c0_23 = arith.constant 0 : index
    %c0_24 = arith.constant 0 : index
    %27 = vector.load %arg2[%c3, %c0_23, %c0_24] : memref<9x32x16xbf16, #tpu.memory_space<vmem>>, vector<1x32x16xbf16>
    %28 = vector.shape_cast %27 : vector<1x32x16xbf16> to vector<32x16xbf16>
    %cst_25 = arith.constant dense<0.000000e+00> : vector<24x16xf32>
    %29 = tpu.matmul %26, %28, %cst_25 {dimension_numbers = #tpu.dot_dimension_numbers<[1], [0], [0], [1], [0, 0, 1, 1], [], []>} : vector<24x32xbf16>, vector<32x16xbf16>, vector<24x16xf32> -> vector<24x16xf32>
    %30 = arith.addf %22, %29 : vector<24x16xf32>
    %c0_26 = arith.constant 0 : index
    %c7 = arith.constant 7 : index
    %c0_27 = arith.constant 0 : index
    %31 = vector.load %arg1[%c0_26, %c7, %c0_27] : memref<1x48x32xbf16, #tpu.memory_space<vmem>>, vector<1x24x32xbf16>
    %32 = vector.shape_cast %31 : vector<1x24x32xbf16> to vector<24x32xbf16>
    %cst_28 = arith.constant 0.000000e+00 : bf16
    %33 = vector.broadcast %cst_28 : bf16 to vector<24x32xbf16>
    %34 = arith.maximumf %32, %33 : vector<24x32xbf16>
    %c4 = arith.constant 4 : index
    %c0_29 = arith.constant 0 : index
    %c0_30 = arith.constant 0 : index
    %35 = vector.load %arg2[%c4, %c0_29, %c0_30] : memref<9x32x16xbf16, #tpu.memory_space<vmem>>, vector<1x32x16xbf16>
    %36 = vector.shape_cast %35 : vector<1x32x16xbf16> to vector<32x16xbf16>
    %cst_31 = arith.constant dense<0.000000e+00> : vector<24x16xf32>
    %37 = tpu.matmul %34, %36, %cst_31 {dimension_numbers = #tpu.dot_dimension_numbers<[1], [0], [0], [1], [0, 0, 1, 1], [], []>} : vector<24x32xbf16>, vector<32x16xbf16>, vector<24x16xf32> -> vector<24x16xf32>
    %38 = arith.addf %30, %37 : vector<24x16xf32>
    %c0_32 = arith.constant 0 : index
    %c8 = arith.constant 8 : index
    %c0_33 = arith.constant 0 : index
    %39 = vector.load %arg1[%c0_32, %c8, %c0_33] : memref<1x48x32xbf16, #tpu.memory_space<vmem>>, vector<1x24x32xbf16>
    %40 = vector.shape_cast %39 : vector<1x24x32xbf16> to vector<24x32xbf16>
    %cst_34 = arith.constant 0.000000e+00 : bf16
    %41 = vector.broadcast %cst_34 : bf16 to vector<24x32xbf16>
    %42 = arith.maximumf %40, %41 : vector<24x32xbf16>
    %c5 = arith.constant 5 : index
    %c0_35 = arith.constant 0 : index
    %c0_36 = arith.constant 0 : index
    %43 = vector.load %arg2[%c5, %c0_35, %c0_36] : memref<9x32x16xbf16, #tpu.memory_space<vmem>>, vector<1x32x16xbf16>
    %44 = vector.shape_cast %43 : vector<1x32x16xbf16> to vector<32x16xbf16>
    %cst_37 = arith.constant dense<0.000000e+00> : vector<24x16xf32>
    %45 = tpu.matmul %42, %44, %cst_37 {dimension_numbers = #tpu.dot_dimension_numbers<[1], [0], [0], [1], [0, 0, 1, 1], [], []>} : vector<24x32xbf16>, vector<32x16xbf16>, vector<24x16xf32> -> vector<24x16xf32>
    %46 = arith.addf %38, %45 : vector<24x16xf32>
    %c0_38 = arith.constant 0 : index
    %c12 = arith.constant 12 : index
    %c0_39 = arith.constant 0 : index
    %47 = vector.load %arg1[%c0_38, %c12, %c0_39] : memref<1x48x32xbf16, #tpu.memory_space<vmem>>, vector<1x24x32xbf16>
    %48 = vector.shape_cast %47 : vector<1x24x32xbf16> to vector<24x32xbf16>
    %cst_40 = arith.constant 0.000000e+00 : bf16
    %49 = vector.broadcast %cst_40 : bf16 to vector<24x32xbf16>
    %50 = arith.maximumf %48, %49 : vector<24x32xbf16>
    %c6_41 = arith.constant 6 : index
    %c0_42 = arith.constant 0 : index
    %c0_43 = arith.constant 0 : index
    %51 = vector.load %arg2[%c6_41, %c0_42, %c0_43] : memref<9x32x16xbf16, #tpu.memory_space<vmem>>, vector<1x32x16xbf16>
    %52 = vector.shape_cast %51 : vector<1x32x16xbf16> to vector<32x16xbf16>
    %cst_44 = arith.constant dense<0.000000e+00> : vector<24x16xf32>
    %53 = tpu.matmul %50, %52, %cst_44 {dimension_numbers = #tpu.dot_dimension_numbers<[1], [0], [0], [1], [0, 0, 1, 1], [], []>} : vector<24x32xbf16>, vector<32x16xbf16>, vector<24x16xf32> -> vector<24x16xf32>
    %54 = arith.addf %46, %53 : vector<24x16xf32>
    %c0_45 = arith.constant 0 : index
    %c13 = arith.constant 13 : index
    %c0_46 = arith.constant 0 : index
    %55 = vector.load %arg1[%c0_45, %c13, %c0_46] : memref<1x48x32xbf16, #tpu.memory_space<vmem>>, vector<1x24x32xbf16>
    %56 = vector.shape_cast %55 : vector<1x24x32xbf16> to vector<24x32xbf16>
    %cst_47 = arith.constant 0.000000e+00 : bf16
    %57 = vector.broadcast %cst_47 : bf16 to vector<24x32xbf16>
    %58 = arith.maximumf %56, %57 : vector<24x32xbf16>
    %c7_48 = arith.constant 7 : index
    %c0_49 = arith.constant 0 : index
    %c0_50 = arith.constant 0 : index
    %59 = vector.load %arg2[%c7_48, %c0_49, %c0_50] : memref<9x32x16xbf16, #tpu.memory_space<vmem>>, vector<1x32x16xbf16>
    %60 = vector.shape_cast %59 : vector<1x32x16xbf16> to vector<32x16xbf16>
    %cst_51 = arith.constant dense<0.000000e+00> : vector<24x16xf32>
    %61 = tpu.matmul %58, %60, %cst_51 {dimension_numbers = #tpu.dot_dimension_numbers<[1], [0], [0], [1], [0, 0, 1, 1], [], []>} : vector<24x32xbf16>, vector<32x16xbf16>, vector<24x16xf32> -> vector<24x16xf32>
    %62 = arith.addf %54, %61 : vector<24x16xf32>
    %c0_52 = arith.constant 0 : index
    %c14 = arith.constant 14 : index
    %c0_53 = arith.constant 0 : index
    %63 = vector.load %arg1[%c0_52, %c14, %c0_53] : memref<1x48x32xbf16, #tpu.memory_space<vmem>>, vector<1x24x32xbf16>
    %64 = vector.shape_cast %63 : vector<1x24x32xbf16> to vector<24x32xbf16>
    %cst_54 = arith.constant 0.000000e+00 : bf16
    %65 = vector.broadcast %cst_54 : bf16 to vector<24x32xbf16>
    %66 = arith.maximumf %64, %65 : vector<24x32xbf16>
    %c8_55 = arith.constant 8 : index
    %c0_56 = arith.constant 0 : index
    %c0_57 = arith.constant 0 : index
    %67 = vector.load %arg2[%c8_55, %c0_56, %c0_57] : memref<9x32x16xbf16, #tpu.memory_space<vmem>>, vector<1x32x16xbf16>
    %68 = vector.shape_cast %67 : vector<1x32x16xbf16> to vector<32x16xbf16>
    %cst_58 = arith.constant dense<0.000000e+00> : vector<24x16xf32>
    %69 = tpu.matmul %66, %68, %cst_58 {dimension_numbers = #tpu.dot_dimension_numbers<[1], [0], [0], [1], [0, 0, 1, 1], [], []>} : vector<24x32xbf16>, vector<32x16xbf16>, vector<24x16xf32> -> vector<24x16xf32>
    %70 = arith.addf %62, %69 : vector<24x16xf32>
    %cst_59 = arith.constant 0.000000e+00 : f32
    %71 = vector.broadcast %cst_59 : f32 to vector<24x16xf32>
    %72 = arith.maximumf %70, %71 : vector<24x16xf32>
    %73 = arith.truncf %72 : vector<24x16xf32> to vector<24x16xbf16>
    %c0_60 = arith.constant 0 : index
    %c0_61 = arith.constant 0 : index
    %c0_62 = arith.constant 0 : index
    %74 = vector.load %arg3[%c0_60, %c0_61, %c0_62] : memref<1x16x32xbf16, #tpu.memory_space<vmem>>, vector<1x16x32xbf16>
    %75 = vector.shape_cast %74 : vector<1x16x32xbf16> to vector<16x32xbf16>
    %cst_63 = arith.constant dense<0.000000e+00> : vector<24x32xf32>
    %76 = tpu.matmul %73, %75, %cst_63 {dimension_numbers = #tpu.dot_dimension_numbers<[1], [0], [0], [1], [0, 0, 1, 1], [], []>} : vector<24x16xbf16>, vector<16x32xbf16>, vector<24x32xf32> -> vector<24x32xf32>
    %c0_64 = arith.constant 0 : index
    %c7_65 = arith.constant 7 : index
    %c0_66 = arith.constant 0 : index
    %77 = vector.load %arg1[%c0_64, %c7_65, %c0_66] : memref<1x48x32xbf16, #tpu.memory_space<vmem>>, vector<1x24x32xbf16>
    %78 = vector.shape_cast %77 : vector<1x24x32xbf16> to vector<24x32xbf16>
    %79 = arith.extf %78 : vector<24x32xbf16> to vector<24x32xf32>
    %80 = arith.addf %79, %76 : vector<24x32xf32>
    %c0_67 = arith.constant 0 : index
    %c0_68 = arith.constant 0 : index
    %81 = vector.load %arg4[%c0_67, %c0_68] : memref<24x1xf32, #tpu.memory_space<vmem>>, vector<24x1xf32>
    %82 = vector.broadcast %81 : vector<24x1xf32> to vector<24x32xf32>
    %83 = arith.mulf %80, %82 : vector<24x32xf32>
    %cst_69 = arith.constant 0.000000e+00 : bf16
    %84 = vector.broadcast %cst_69 : bf16 to vector<48x32xbf16>
    %c0_70 = arith.constant 0 : index
    %c0_71 = arith.constant 0 : index
    %c0_72 = arith.constant 0 : index
    %85 = vector.load %arg5[%c0_70, %c0_71, %c0_72] : memref<1x48x32xbf16, #tpu.memory_space<vmem>>, vector<1x48x32xbf16>
    %86 = vector.shape_cast %85 : vector<1x48x32xbf16> to vector<48x32xbf16>
    %87 = vector.shape_cast %84 : vector<48x32xbf16> to vector<1x48x32xbf16>
    tpu.vector_store %arg5[%c0_70, %c0_71, %c0_72], %87 {strides = array<i32>} : memref<1x48x32xbf16, #tpu.memory_space<vmem>>, vector<1x48x32xbf16>,
    %88 = arith.truncf %83 : vector<24x32xf32> to vector<24x32xbf16>
    %c0_73 = arith.constant 0 : index
    %c7_74 = arith.constant 7 : index
    %c0_75 = arith.constant 0 : index
    %89 = vector.load %arg5[%c0_73, %c7_74, %c0_75] : memref<1x48x32xbf16, #tpu.memory_space<vmem>>, vector<1x24x32xbf16>
    %90 = vector.shape_cast %89 : vector<1x24x32xbf16> to vector<24x32xbf16>
    %91 = vector.shape_cast %88 : vector<24x32xbf16> to vector<1x24x32xbf16>
    tpu.vector_store %arg5[%c0_73, %c7_74, %c0_75], %91 {strides = array<i32>} : memref<1x48x32xbf16, #tpu.memory_space<vmem>>, vector<1x24x32xbf16>,
    return
  }
  func.func @transform_0(%arg0: i32) -> (i32, i32, i32) {
    %c0_i32 = arith.constant 0 : i32
    %c0_i32_0 = arith.constant 0 : i32
    %c0_i32_1 = arith.constant 0 : i32
    return %arg0, %c0_i32, %c0_i32_0 : i32, i32, i32
  }
  func.func @transform_1(%arg0: i32) -> (i32, i32, i32) {
    %c0_i32 = arith.constant 0 : i32
    %c0_i32_0 = arith.constant 0 : i32
    %c0_i32_1 = arith.constant 0 : i32
    %c0_i32_2 = arith.constant 0 : i32
    return %c0_i32, %c0_i32_0, %c0_i32_1 : i32, i32, i32
  }
  func.func @transform_2(%arg0: i32) -> (i32, i32, i32) {
    %c0_i32 = arith.constant 0 : i32
    %c0_i32_0 = arith.constant 0 : i32
    %c0_i32_1 = arith.constant 0 : i32
    %c0_i32_2 = arith.constant 0 : i32
    return %c0_i32, %c0_i32_0, %c0_i32_1 : i32, i32, i32
  }
  func.func @transform_3(%arg0: i32) -> (i32, i32) {
    %c0_i32 = arith.constant 0 : i32
    %c0_i32_0 = arith.constant 0 : i32
    %c0_i32_1 = arith.constant 0 : i32
    return %c0_i32, %c0_i32_0 : i32, i32
  }
  func.func @transform_4(%arg0: i32) -> (i32, i32, i32) {
    %c0_i32 = arith.constant 0 : i32
    %c0_i32_0 = arith.constant 0 : i32
    %c0_i32_1 = arith.constant 0 : i32
    return %arg0, %c0_i32, %c0_i32_0 : i32, i32, i32
  }
}

module attributes {stable_mosaic.version = 11 : i64} {
  func.func @_resblock_prequant_kernel(%arg0: i32, %arg1: memref<1x48x32xbf16, #tpu.memory_space<vmem>>, %arg2: memref<9x32x16xbf16, #tpu.memory_space<vmem>>, %arg3: memref<1x16x32xbf16, #tpu.memory_space<vmem>>, %arg4: memref<1x32x8xbf16, #tpu.memory_space<vmem>>, %arg5: memref<1x8xf32, #tpu.memory_space<vmem>>, %arg6: memref<1x24x8xf32, #tpu.memory_space<vmem>>) attributes {dimension_semantics = [#tpu.dimension_semantics<parallel>], iteration_bounds = array<i64: 2>, scalar_prefetch = 0 : i64, scratch_operands = 0 : i64, tpu.core_type = #tpu.core_type<tc>, window_params = [{transform_indices = @transform_0, window_bounds = array<i64: 1, 48, 32>}, {pipeline_mode = #tpu.pipeline_mode<synchronous>, transform_indices = @transform_1, window_bounds = array<i64: 9, 32, 16>}, {pipeline_mode = #tpu.pipeline_mode<synchronous>, transform_indices = @transform_2, window_bounds = array<i64: 1, 16, 32>}, {pipeline_mode = #tpu.pipeline_mode<synchronous>, transform_indices = @transform_3, window_bounds = array<i64: 1, 32, 8>}, {pipeline_mode = #tpu.pipeline_mode<synchronous>, transform_indices = @transform_4, window_bounds = array<i64: 1, 8>}, {transform_indices = @transform_5, window_bounds = array<i64: 1, 24, 8>}]} {
    %c0 = arith.constant 0 : index
    %c0_0 = arith.constant 0 : index
    %c0_1 = arith.constant 0 : index
    %0 = vector.load %arg1[%c0, %c0_0, %c0_1] : memref<1x48x32xbf16, #tpu.memory_space<vmem>>, vector<1x24x32xbf16>
    %1 = vector.shape_cast %0 : vector<1x24x32xbf16> to vector<24x32xbf16>
    %cst = arith.constant 0.000000e+00 : bf16
    %2 = vector.broadcast %cst : bf16 to vector<24x32xbf16>
    %3 = arith.maximumf %1, %2 : vector<24x32xbf16>
    %c0_2 = arith.constant 0 : index
    %c0_3 = arith.constant 0 : index
    %c0_4 = arith.constant 0 : index
    %4 = vector.load %arg2[%c0_2, %c0_3, %c0_4] : memref<9x32x16xbf16, #tpu.memory_space<vmem>>, vector<1x32x16xbf16>
    %5 = vector.shape_cast %4 : vector<1x32x16xbf16> to vector<32x16xbf16>
    %cst_5 = arith.constant dense<0.000000e+00> : vector<24x16xf32>
    %6 = tpu.matmul %3, %5, %cst_5 {dimension_numbers = #tpu.dot_dimension_numbers<[1], [0], [0], [1], [0, 0, 1, 1], [], []>} : vector<24x32xbf16>, vector<32x16xbf16>, vector<24x16xf32> -> vector<24x16xf32>
    %c0_6 = arith.constant 0 : index
    %c1 = arith.constant 1 : index
    %c0_7 = arith.constant 0 : index
    %7 = vector.load %arg1[%c0_6, %c1, %c0_7] : memref<1x48x32xbf16, #tpu.memory_space<vmem>>, vector<1x24x32xbf16>
    %8 = vector.shape_cast %7 : vector<1x24x32xbf16> to vector<24x32xbf16>
    %cst_8 = arith.constant 0.000000e+00 : bf16
    %9 = vector.broadcast %cst_8 : bf16 to vector<24x32xbf16>
    %10 = arith.maximumf %8, %9 : vector<24x32xbf16>
    %c1_9 = arith.constant 1 : index
    %c0_10 = arith.constant 0 : index
    %c0_11 = arith.constant 0 : index
    %11 = vector.load %arg2[%c1_9, %c0_10, %c0_11] : memref<9x32x16xbf16, #tpu.memory_space<vmem>>, vector<1x32x16xbf16>
    %12 = vector.shape_cast %11 : vector<1x32x16xbf16> to vector<32x16xbf16>
    %cst_12 = arith.constant dense<0.000000e+00> : vector<24x16xf32>
    %13 = tpu.matmul %10, %12, %cst_12 {dimension_numbers = #tpu.dot_dimension_numbers<[1], [0], [0], [1], [0, 0, 1, 1], [], []>} : vector<24x32xbf16>, vector<32x16xbf16>, vector<24x16xf32> -> vector<24x16xf32>
    %14 = arith.addf %6, %13 : vector<24x16xf32>
    %c0_13 = arith.constant 0 : index
    %c2 = arith.constant 2 : index
    %c0_14 = arith.constant 0 : index
    %15 = vector.load %arg1[%c0_13, %c2, %c0_14] : memref<1x48x32xbf16, #tpu.memory_space<vmem>>, vector<1x24x32xbf16>
    %16 = vector.shape_cast %15 : vector<1x24x32xbf16> to vector<24x32xbf16>
    %cst_15 = arith.constant 0.000000e+00 : bf16
    %17 = vector.broadcast %cst_15 : bf16 to vector<24x32xbf16>
    %18 = arith.maximumf %16, %17 : vector<24x32xbf16>
    %c2_16 = arith.constant 2 : index
    %c0_17 = arith.constant 0 : index
    %c0_18 = arith.constant 0 : index
    %19 = vector.load %arg2[%c2_16, %c0_17, %c0_18] : memref<9x32x16xbf16, #tpu.memory_space<vmem>>, vector<1x32x16xbf16>
    %20 = vector.shape_cast %19 : vector<1x32x16xbf16> to vector<32x16xbf16>
    %cst_19 = arith.constant dense<0.000000e+00> : vector<24x16xf32>
    %21 = tpu.matmul %18, %20, %cst_19 {dimension_numbers = #tpu.dot_dimension_numbers<[1], [0], [0], [1], [0, 0, 1, 1], [], []>} : vector<24x32xbf16>, vector<32x16xbf16>, vector<24x16xf32> -> vector<24x16xf32>
    %22 = arith.addf %14, %21 : vector<24x16xf32>
    %c0_20 = arith.constant 0 : index
    %c6 = arith.constant 6 : index
    %c0_21 = arith.constant 0 : index
    %23 = vector.load %arg1[%c0_20, %c6, %c0_21] : memref<1x48x32xbf16, #tpu.memory_space<vmem>>, vector<1x24x32xbf16>
    %24 = vector.shape_cast %23 : vector<1x24x32xbf16> to vector<24x32xbf16>
    %cst_22 = arith.constant 0.000000e+00 : bf16
    %25 = vector.broadcast %cst_22 : bf16 to vector<24x32xbf16>
    %26 = arith.maximumf %24, %25 : vector<24x32xbf16>
    %c3 = arith.constant 3 : index
    %c0_23 = arith.constant 0 : index
    %c0_24 = arith.constant 0 : index
    %27 = vector.load %arg2[%c3, %c0_23, %c0_24] : memref<9x32x16xbf16, #tpu.memory_space<vmem>>, vector<1x32x16xbf16>
    %28 = vector.shape_cast %27 : vector<1x32x16xbf16> to vector<32x16xbf16>
    %cst_25 = arith.constant dense<0.000000e+00> : vector<24x16xf32>
    %29 = tpu.matmul %26, %28, %cst_25 {dimension_numbers = #tpu.dot_dimension_numbers<[1], [0], [0], [1], [0, 0, 1, 1], [], []>} : vector<24x32xbf16>, vector<32x16xbf16>, vector<24x16xf32> -> vector<24x16xf32>
    %30 = arith.addf %22, %29 : vector<24x16xf32>
    %c0_26 = arith.constant 0 : index
    %c7 = arith.constant 7 : index
    %c0_27 = arith.constant 0 : index
    %31 = vector.load %arg1[%c0_26, %c7, %c0_27] : memref<1x48x32xbf16, #tpu.memory_space<vmem>>, vector<1x24x32xbf16>
    %32 = vector.shape_cast %31 : vector<1x24x32xbf16> to vector<24x32xbf16>
    %cst_28 = arith.constant 0.000000e+00 : bf16
    %33 = vector.broadcast %cst_28 : bf16 to vector<24x32xbf16>
    %34 = arith.maximumf %32, %33 : vector<24x32xbf16>
    %c4 = arith.constant 4 : index
    %c0_29 = arith.constant 0 : index
    %c0_30 = arith.constant 0 : index
    %35 = vector.load %arg2[%c4, %c0_29, %c0_30] : memref<9x32x16xbf16, #tpu.memory_space<vmem>>, vector<1x32x16xbf16>
    %36 = vector.shape_cast %35 : vector<1x32x16xbf16> to vector<32x16xbf16>
    %cst_31 = arith.constant dense<0.000000e+00> : vector<24x16xf32>
    %37 = tpu.matmul %34, %36, %cst_31 {dimension_numbers = #tpu.dot_dimension_numbers<[1], [0], [0], [1], [0, 0, 1, 1], [], []>} : vector<24x32xbf16>, vector<32x16xbf16>, vector<24x16xf32> -> vector<24x16xf32>
    %38 = arith.addf %30, %37 : vector<24x16xf32>
    %c0_32 = arith.constant 0 : index
    %c8 = arith.constant 8 : index
    %c0_33 = arith.constant 0 : index
    %39 = vector.load %arg1[%c0_32, %c8, %c0_33] : memref<1x48x32xbf16, #tpu.memory_space<vmem>>, vector<1x24x32xbf16>
    %40 = vector.shape_cast %39 : vector<1x24x32xbf16> to vector<24x32xbf16>
    %cst_34 = arith.constant 0.000000e+00 : bf16
    %41 = vector.broadcast %cst_34 : bf16 to vector<24x32xbf16>
    %42 = arith.maximumf %40, %41 : vector<24x32xbf16>
    %c5 = arith.constant 5 : index
    %c0_35 = arith.constant 0 : index
    %c0_36 = arith.constant 0 : index
    %43 = vector.load %arg2[%c5, %c0_35, %c0_36] : memref<9x32x16xbf16, #tpu.memory_space<vmem>>, vector<1x32x16xbf16>
    %44 = vector.shape_cast %43 : vector<1x32x16xbf16> to vector<32x16xbf16>
    %cst_37 = arith.constant dense<0.000000e+00> : vector<24x16xf32>
    %45 = tpu.matmul %42, %44, %cst_37 {dimension_numbers = #tpu.dot_dimension_numbers<[1], [0], [0], [1], [0, 0, 1, 1], [], []>} : vector<24x32xbf16>, vector<32x16xbf16>, vector<24x16xf32> -> vector<24x16xf32>
    %46 = arith.addf %38, %45 : vector<24x16xf32>
    %c0_38 = arith.constant 0 : index
    %c12 = arith.constant 12 : index
    %c0_39 = arith.constant 0 : index
    %47 = vector.load %arg1[%c0_38, %c12, %c0_39] : memref<1x48x32xbf16, #tpu.memory_space<vmem>>, vector<1x24x32xbf16>
    %48 = vector.shape_cast %47 : vector<1x24x32xbf16> to vector<24x32xbf16>
    %cst_40 = arith.constant 0.000000e+00 : bf16
    %49 = vector.broadcast %cst_40 : bf16 to vector<24x32xbf16>
    %50 = arith.maximumf %48, %49 : vector<24x32xbf16>
    %c6_41 = arith.constant 6 : index
    %c0_42 = arith.constant 0 : index
    %c0_43 = arith.constant 0 : index
    %51 = vector.load %arg2[%c6_41, %c0_42, %c0_43] : memref<9x32x16xbf16, #tpu.memory_space<vmem>>, vector<1x32x16xbf16>
    %52 = vector.shape_cast %51 : vector<1x32x16xbf16> to vector<32x16xbf16>
    %cst_44 = arith.constant dense<0.000000e+00> : vector<24x16xf32>
    %53 = tpu.matmul %50, %52, %cst_44 {dimension_numbers = #tpu.dot_dimension_numbers<[1], [0], [0], [1], [0, 0, 1, 1], [], []>} : vector<24x32xbf16>, vector<32x16xbf16>, vector<24x16xf32> -> vector<24x16xf32>
    %54 = arith.addf %46, %53 : vector<24x16xf32>
    %c0_45 = arith.constant 0 : index
    %c13 = arith.constant 13 : index
    %c0_46 = arith.constant 0 : index
    %55 = vector.load %arg1[%c0_45, %c13, %c0_46] : memref<1x48x32xbf16, #tpu.memory_space<vmem>>, vector<1x24x32xbf16>
    %56 = vector.shape_cast %55 : vector<1x24x32xbf16> to vector<24x32xbf16>
    %cst_47 = arith.constant 0.000000e+00 : bf16
    %57 = vector.broadcast %cst_47 : bf16 to vector<24x32xbf16>
    %58 = arith.maximumf %56, %57 : vector<24x32xbf16>
    %c7_48 = arith.constant 7 : index
    %c0_49 = arith.constant 0 : index
    %c0_50 = arith.constant 0 : index
    %59 = vector.load %arg2[%c7_48, %c0_49, %c0_50] : memref<9x32x16xbf16, #tpu.memory_space<vmem>>, vector<1x32x16xbf16>
    %60 = vector.shape_cast %59 : vector<1x32x16xbf16> to vector<32x16xbf16>
    %cst_51 = arith.constant dense<0.000000e+00> : vector<24x16xf32>
    %61 = tpu.matmul %58, %60, %cst_51 {dimension_numbers = #tpu.dot_dimension_numbers<[1], [0], [0], [1], [0, 0, 1, 1], [], []>} : vector<24x32xbf16>, vector<32x16xbf16>, vector<24x16xf32> -> vector<24x16xf32>
    %62 = arith.addf %54, %61 : vector<24x16xf32>
    %c0_52 = arith.constant 0 : index
    %c14 = arith.constant 14 : index
    %c0_53 = arith.constant 0 : index
    %63 = vector.load %arg1[%c0_52, %c14, %c0_53] : memref<1x48x32xbf16, #tpu.memory_space<vmem>>, vector<1x24x32xbf16>
    %64 = vector.shape_cast %63 : vector<1x24x32xbf16> to vector<24x32xbf16>
    %cst_54 = arith.constant 0.000000e+00 : bf16
    %65 = vector.broadcast %cst_54 : bf16 to vector<24x32xbf16>
    %66 = arith.maximumf %64, %65 : vector<24x32xbf16>
    %c8_55 = arith.constant 8 : index
    %c0_56 = arith.constant 0 : index
    %c0_57 = arith.constant 0 : index
    %67 = vector.load %arg2[%c8_55, %c0_56, %c0_57] : memref<9x32x16xbf16, #tpu.memory_space<vmem>>, vector<1x32x16xbf16>
    %68 = vector.shape_cast %67 : vector<1x32x16xbf16> to vector<32x16xbf16>
    %cst_58 = arith.constant dense<0.000000e+00> : vector<24x16xf32>
    %69 = tpu.matmul %66, %68, %cst_58 {dimension_numbers = #tpu.dot_dimension_numbers<[1], [0], [0], [1], [0, 0, 1, 1], [], []>} : vector<24x32xbf16>, vector<32x16xbf16>, vector<24x16xf32> -> vector<24x16xf32>
    %70 = arith.addf %62, %69 : vector<24x16xf32>
    %cst_59 = arith.constant 0.000000e+00 : f32
    %71 = vector.broadcast %cst_59 : f32 to vector<24x16xf32>
    %72 = arith.maximumf %70, %71 : vector<24x16xf32>
    %73 = arith.truncf %72 : vector<24x16xf32> to vector<24x16xbf16>
    %c0_60 = arith.constant 0 : index
    %c0_61 = arith.constant 0 : index
    %c0_62 = arith.constant 0 : index
    %74 = vector.load %arg3[%c0_60, %c0_61, %c0_62] : memref<1x16x32xbf16, #tpu.memory_space<vmem>>, vector<1x16x32xbf16>
    %75 = vector.shape_cast %74 : vector<1x16x32xbf16> to vector<16x32xbf16>
    %cst_63 = arith.constant dense<0.000000e+00> : vector<24x32xf32>
    %76 = tpu.matmul %73, %75, %cst_63 {dimension_numbers = #tpu.dot_dimension_numbers<[1], [0], [0], [1], [0, 0, 1, 1], [], []>} : vector<24x16xbf16>, vector<16x32xbf16>, vector<24x32xf32> -> vector<24x32xf32>
    %c0_64 = arith.constant 0 : index
    %c7_65 = arith.constant 7 : index
    %c0_66 = arith.constant 0 : index
    %77 = vector.load %arg1[%c0_64, %c7_65, %c0_66] : memref<1x48x32xbf16, #tpu.memory_space<vmem>>, vector<1x24x32xbf16>
    %78 = vector.shape_cast %77 : vector<1x24x32xbf16> to vector<24x32xbf16>
    %79 = arith.extf %78 : vector<24x32xbf16> to vector<24x32xf32>
    %80 = arith.addf %79, %76 : vector<24x32xf32>
    %cst_67 = arith.constant 0.000000e+00 : f32
    %81 = vector.broadcast %cst_67 : f32 to vector<24x32xf32>
    %82 = arith.maximumf %80, %81 : vector<24x32xf32>
    %83 = arith.truncf %82 : vector<24x32xf32> to vector<24x32xbf16>
    %c0_68 = arith.constant 0 : index
    %c0_69 = arith.constant 0 : index
    %c0_70 = arith.constant 0 : index
    %84 = vector.load %arg4[%c0_68, %c0_69, %c0_70] : memref<1x32x8xbf16, #tpu.memory_space<vmem>>, vector<1x32x8xbf16>
    %85 = vector.shape_cast %84 : vector<1x32x8xbf16> to vector<32x8xbf16>
    %cst_71 = arith.constant dense<0.000000e+00> : vector<24x8xf32>
    %86 = tpu.matmul %83, %85, %cst_71 {dimension_numbers = #tpu.dot_dimension_numbers<[1], [0], [0], [1], [0, 0, 1, 1], [], []>} : vector<24x32xbf16>, vector<32x8xbf16>, vector<24x8xf32> -> vector<24x8xf32>
    %c0_72 = arith.constant 0 : index
    %c0_73 = arith.constant 0 : index
    %87 = vector.load %arg5[%c0_72, %c0_73] : memref<1x8xf32, #tpu.memory_space<vmem>>, vector<1x8xf32>
    %88 = vector.broadcast %87 : vector<1x8xf32> to vector<24x8xf32>
    %89 = arith.addf %86, %88 : vector<24x8xf32>
    %c0_74 = arith.constant 0 : index
    %c0_75 = arith.constant 0 : index
    %c0_76 = arith.constant 0 : index
    %90 = vector.load %arg6[%c0_74, %c0_75, %c0_76] : memref<1x24x8xf32, #tpu.memory_space<vmem>>, vector<1x24x8xf32>
    %91 = vector.shape_cast %90 : vector<1x24x8xf32> to vector<24x8xf32>
    %92 = vector.shape_cast %89 : vector<24x8xf32> to vector<1x24x8xf32>
    tpu.vector_store %arg6[%c0_74, %c0_75, %c0_76], %92 {strides = array<i32>} : memref<1x24x8xf32, #tpu.memory_space<vmem>>, vector<1x24x8xf32>,
    return
  }
  func.func @transform_0(%arg0: i32) -> (i32, i32, i32) {
    %c0_i32 = arith.constant 0 : i32
    %c0_i32_0 = arith.constant 0 : i32
    %c0_i32_1 = arith.constant 0 : i32
    return %arg0, %c0_i32, %c0_i32_0 : i32, i32, i32
  }
  func.func @transform_1(%arg0: i32) -> (i32, i32, i32) {
    %c0_i32 = arith.constant 0 : i32
    %c0_i32_0 = arith.constant 0 : i32
    %c0_i32_1 = arith.constant 0 : i32
    %c0_i32_2 = arith.constant 0 : i32
    return %c0_i32, %c0_i32_0, %c0_i32_1 : i32, i32, i32
  }
  func.func @transform_2(%arg0: i32) -> (i32, i32, i32) {
    %c0_i32 = arith.constant 0 : i32
    %c0_i32_0 = arith.constant 0 : i32
    %c0_i32_1 = arith.constant 0 : i32
    %c0_i32_2 = arith.constant 0 : i32
    return %c0_i32, %c0_i32_0, %c0_i32_1 : i32, i32, i32
  }
  func.func @transform_3(%arg0: i32) -> (i32, i32, i32) {
    %c0_i32 = arith.constant 0 : i32
    %c0_i32_0 = arith.constant 0 : i32
    %c0_i32_1 = arith.constant 0 : i32
    %c0_i32_2 = arith.constant 0 : i32
    return %c0_i32, %c0_i32_0, %c0_i32_1 : i32, i32, i32
  }
  func.func @transform_4(%arg0: i32) -> (i32, i32) {
    %c0_i32 = arith.constant 0 : i32
    %c0_i32_0 = arith.constant 0 : i32
    %c0_i32_1 = arith.constant 0 : i32
    return %c0_i32, %c0_i32_0 : i32, i32
  }
  func.func @transform_5(%arg0: i32) -> (i32, i32, i32) {
    %c0_i32 = arith.constant 0 : i32
    %c0_i32_0 = arith.constant 0 : i32
    %c0_i32_1 = arith.constant 0 : i32
    return %arg0, %c0_i32, %c0_i32_0 : i32, i32, i32
  }
}

</mosaic_0001>

<bundles_post_ra>
// kernel: tile.8
= control target key start
LH: loop header
LB: loop body
LE: loop exit
PB: predicated region body
PF: predicated region fallthrough
CT: control target
= control target key end

     0   :  { %s22_s0 = inlined_call_operand.vmem [shape: f32[6], index: 0, kind: input, shape index: {}]   ;;  %s23_s1 = inlined_call_operand.vmem [shape: f32[4,6], index: 1, kind: output, shape index: {}]  }
   0x1   :  { %v4_v0 = vld [vmem:[%s22_s0] ss:$0 sm:$0xff] }
   0x2   :  { %5 = vst [vmem:[%s23_s1] sm:$0xf] %v4_v0 }

// kernel: tile.0
= control target key start
LH: loop header
LB: loop body
LE: loop exit
PB: predicated region body
PF: predicated region fallthrough
CT: control target
= control target key end

     0   :  { %s51_s8 = smov 125   ;;  %vm8_vm0 = vcmask 7168   ;;  %s52_s11 = smov 126   ;;  %s92_s0 = inlined_call_operand.vmem [shape: f32[4,6], index: 0, kind: input, shape index: {}]   ;;  %s93_s1 = inlined_call_operand.vmem [shape: f32[24,1], index: 1, kind: output, shape index: {}]  }
   0x1   :  { %v5_v0 = vld [vmem:[%s92_s0] sm:$0xf]  ;;  %s50_s0 = smov 127   ;;  %s53_s12 = smov 124  }
   0x2   :  { %6 = vst [vmem:[#allocation0] sm:$0xf] %v5_v0  ;;  %s54_s13 = smov 123  }
   0x9   :  { %v10_v1 = vld [vmem:[#allocation0] sm:$0xf]  }
   0xa   :  { %v22_v2 = vld [vmem:[#allocation0] sm:$0xf]   ;;  %11 = vrot.lane.b32.xlu0 %v10_v1, %s50_s0 }
   0xb   :  { %23 = vrot.lane.b32.xlu1 %v22_v2, %s51_s8  ;;  %v7_v3 = vld [vmem:[#allocation0] sm:$0xf]  }
   0xc   :  { %v16_v4 = vld [vmem:[#allocation0] sm:$0xf]   ;;  %9 = vst.msk [vmem:[%s93_s1] ss:$6 sm:$0xf] %vm8_vm0, %v7_v3  }
   0xd   :  { %v28_v5 = vld [vmem:[#allocation0] sm:$0xf]  }
   0xe   :  { %17 = vrot.lane.b32.xlu0 %v16_v4, %s52_s11  ;;  %v34_v6 = vld [vmem:[#allocation0] sm:$0xf]  }
   0xf   :  { %29 = vrot.lane.b32.xlu1 %v28_v5, %s53_s12 }
  0x12   :  { %35 = vrot.lane.b32.xlu0 %v34_v6, %s54_s13 }
  0x7c   :  { %v12_v7 = vpop.permute.xlu0 %11  }
  0x7d   :  { %v24_v8 = vpop.permute.xlu1 %23   ;;  %40 = vst.msk [vmem:[%s93_s1 + $0x1] ss:$6 sm:$0xf] %vm8_vm0, %v12_v7  }
  0x7e   :  { %42 = vst.msk [vmem:[%s93_s1 + $0x3] ss:$6 sm:$0xf] %vm8_vm0, %v24_v8  }
  0x80   :  { %v18_v9 = vpop.permute.xlu0 %17  }
  0x81   :  { %v30_v10 = vpop.permute.xlu1 %29   ;;  %41 = vst.msk [vmem:[%s93_s1 + $0x2] ss:$6 sm:$0xf] %vm8_vm0, %v18_v9  }
  0x82   :  { %43 = vst.msk [vmem:[%s93_s1 + $0x4] ss:$6 sm:$0xf] %vm8_vm0, %v30_v10  }
  0x84   :  { %v36_v11 = vpop.permute.xlu0 %35  }
  0x85   :  { %44 = vst.msk [vmem:[%s93_s1 + $0x5] ss:$6 sm:$0xf] %vm8_vm0, %v36_v11  }

// kernel: e2e_encoder_forward.5
= control target key start
LH: loop header
LB: loop body
LE: loop exit
PB: predicated region body
PF: predicated region fallthrough
CT: control target
= control target key end

     0   :  { %s1110_s12 = smov 0   ;;  %s1299_s0 = inlined_call_operand.vmem [shape: bf16[2,96,12], index: 0, kind: input, shape index: {}]   ;;  %s1300_s1 = inlined_call_operand.vmem [shape: bf16[4,12,16], index: 1, kind: input, shape index: {}]   ;;  %s1301_s2 = inlined_call_operand.vmem [shape: f32[1,16], index: 2, kind: input, shape index: {}]   ;;  %s1302_s3 = inlined_call_operand.vmem [shape: bf16[2,72,16], index: 3, kind: output, shape index: {}]  }
   0x1 LB: > { %s870_s13 = sadd.s32 4294967295, %s1086_s12   ;;  %p874_p0 = scmp.ge.s32.totalorder %s1086_s12, 1  ;;  %s1086_s12 = sphi %s1110_s12, %s13_s12  }
   0x2   : > { %p137_p1 = scmp.lt.s32.totalorder %s1086_s12, 3 }
   0x4   : > { %p138_p2 = pnand %p874_p0, %p137_p1 }
   0x5   : > { %p161_p3 = scmp.lt.s32.totalorder (!%p138_p2), %s870_s13, 1 }
   0x6   : > { %141 = sbr.rel (%p138_p2) target bundleno = 299 (0x12b), region = 32 }
   0xb   : > { %vm273_vm0 = vcmask 1045504   ;;  %v1088_v0 = vmov 0.0   ;;  %v1064_v1 = vld [vmem:[%s1300_s1] sm:$0x3f]   ;;  %vm1089_vm1 = vmmov 0   ;;  %s1304_s13 = smov (!%p161_p3, %s870_s13), 1 }
   0xc   : > { %986 = vmatprep.subr.bf16.mxu1 %v1088_v0  ;;  %964 = vmatprep.subr.bf16.mxu0 %v1088_v0  ;;  %v1065_v2 = vld [vmem:[%s1300_s1 + $0x8] sm:$0x3f]   ;;  %v367_v3 = vsel %vm273_vm0, %v1064_v1, 0  ;;  %s1052_s18 = smul.u32 48, %s1304_s13  ;;  %v1069_v5 = vld [vmem:[%s1300_s1 + $0x18] sm:$0x3f]  }
   0xd   : > { %988 = vmatprep.mubr.msk.bf16.mxu1 %vm1089_vm1, %v1088_v0  ;;  %966 = vmatprep.mubr.msk.bf16.mxu0 %vm1089_vm1, %v1088_v0  ;;  %v275_v4 = vsel %vm273_vm0, %v1065_v2, 0  ;;  %vm257_vm2 = vcmask 97280   ;;  %v660_v7 = vsel %vm273_vm0, %v1069_v5, 0  ;;  %v1068_v12 = vld [vmem:[%s1300_s1 + $0x10] sm:$0x3f]   ;;  %vm629_vm4 = vcmask 1046528  }
   0xe   : > { %987 = vmatpush3.bf16.msra.mxu1 %v367_v3  ;;  %965 = vmatpush3.bf16.msra.mxu0 %v275_v4  ;;  %s1143_s23 = scalar_lea.vmem %s1299_s0, %s1052_s18  ;;  %vm212_vm3 = vsmask.f32 7424  ;;  %v539_v19 = vsel %vm273_vm0, %v1068_v12, 0  ;;  %s1053_s28 = smul.u32 36, %s1304_s13  ;;  %vm805_vm5 = vcmask 125952  }
   0xf   : > { %1030 = vmatprep.subr.bf16.mxu1 %v1088_v0  ;;  %1008 = vmatprep.subr.bf16.mxu0 %v1088_v0  ;;  %v1066_v6 = vld [vmem:[%s1143_s23] sm:$0xff]   ;;  %v1067_v8 = vld [vmem:[%s1143_s23 + $0x8] sm:$0xff]   ;;  %v1070_v13 = vld [vmem:[%s1143_s23 + $0x10] sm:$0xff]  }
  0x10   : > { %v214_v9 = vshrl.u32 %v1066_v6, 16  ;;  %v216_v10 = vshll.u32 %v1066_v6, 16  ;;  %v221_v11 = vshll.u32 %v1067_v8, 16  ;;  %v225_v17 = vshrl.u32 %v1067_v8, 16  ;;  %v1071_v23 = vld [vmem:[%s1143_s23 + $0x18] sm:$0xff]   ;;  %v1075_v43 = vld [vmem:[%s1143_s23 + $0xc] sm:$0xff]   ;;  %s1259_s4 = scalar_lea.vmem %s1302_s3, %s1053_s28 }
  0x11   : > { %989 = vmatmul.mubr.msk.bf16.vlgmr.msra.gmra.mxu1 %vm257_vm2, %v1066_v6  ;;  %v229_v18 = vshll.u32 %v1070_v13, 16  ;;  %v233_v25 = vshrl.u32 %v1070_v13, 16  ;;  %v237_v26 = vshll.u32 %v1071_v23, 16  ;;  %v180_v27 = vld [vmem:[%s1143_s23 + $0x20] sm:$0xf]  ;;  %v241_v33 = vshrl.u32 %v1071_v23, 16 }
  0x12   : > { %1031 = vmatpush3.bf16.msra.mxu1 %v660_v7  ;;  %992 = vmatprep.mubr.msk.bf16.mxu1 %vm1089_vm1, %v1088_v0  ;;  %v218_v14 = vrot.slane %v216_v10, 1  ;;  %v223_v15 = vrot.slane %v221_v11, 1  ;;  %v183_v28 = vld [vmem:[%s1143_s23 + $0x24] sm:$0x1]  ;;  %v442_v38 = vld [vmem:[%s1143_s23 + $0x8] sm:$0xf]  ;;  %v890_v41 = vcombine.low %v180_v27, %v180_v27 }
  0x13   : > { %v231_v22 = vrot.slane %v229_v18, 1  ;;  %v239_v30 = vrot.slane %v237_v26, 1  ;;  %v883_v31 = vcombine.low %v180_v27, %v183_v28  ;;  %v441_v37 = vld [vmem:[%s1143_s23 + $0x4] sm:$0xf]  ;;  %v631_v48 = vrot.slane %v1075_v43, 1  ;;  %v1077_v54 = vld [vmem:[%s1143_s23 + $0x14] sm:$0xff]  }
  0x14   : > { %v219_v16 = vor.u32 %v218_v14, %v214_v9  ;;  %v227_v21 = vor.u32 %v225_v17, %v223_v15  ;;  %v622_v39 = vld [vmem:[%s1143_s23 + $0x4] sm:$0xe]  ;;  %v899_v42 = vcombine.low %v441_v37, %v442_v38  ;;  %v487_v52 = vshll.u32 %v1075_v43, 16  ;;  %v1078_v62 = vld [vmem:[%s1143_s23 + $0x1c] sm:$0xff]  }
  0x15   : > { %v235_v29 = vor.u32 %v233_v25, %v231_v22  ;;  %v245_v34 = vshll.u32 %v883_v31, 16  ;;  %v243_v35 = vor.u32 %v241_v33, %v239_v30  ;;  %v912_v44 = vcombine.low %v622_v39, %v442_v38  ;;  %v1079_v7 = vld [vmem:[%s1143_s23 + $0x24] sm:$0x1f]  }
  0x16   : > { %v224_v20 = vsel %vm212_vm3, %v219_v16, %v223_v15  ;;  %v232_v24 = vsel %vm212_vm3, %v227_v21, %v231_v22  ;;  %v249_v45 = vshrl.u32 %v883_v31, 16  ;;  %v482_v46 = vshll.u32 %v899_v42, 16 }
  0x17   : > { %967 = vmatmul.mubr.msk.bf16.vlgmr.msra.gmra.mxu0 %vm257_vm2, %v224_v20  ;;  %v240_v32 = vsel %vm212_vm3, %v235_v29, %v239_v30  ;;  %v247_v36 = vrot.slane %v245_v34, 1  ;;  %v630_v47 = vrot.slane %v912_v44, 1  ;;  %v480_v50 = vshrl.u32 %v899_v42, 16 }
  0x18   : > { %1009 = vmatpush3.bf16.msra.mxu0 %v539_v19  ;;  %970 = vmatprep.mubr.msk.bf16.mxu0 %vm1089_vm1, %v1088_v0  ;;  %v484_v51 = vrot.slane %v482_v46, 1  ;;  %v489_v56 = vrot.slane %v487_v52, 1  ;;  %v633_v57 = vrot.slane %v1077_v54, 1  ;;  %v491_v59 = vshrl.u32 %v1075_v43, 16 }
  0x19   : > { %993 = vmatmul.mubr.msk.bf16.gmra.mxu1 %vm257_vm2, %v1067_v8  ;;  %v248_v40 = vsel %vm212_vm3, %v243_v35, %v247_v36  ;;  %v251_v49 = vor.u32 %v249_v45, %v247_v36  ;;  %v632_v53 = vsel %vm629_vm4, %v630_v47, %v631_v48  ;;  %v495_v60 = vshll.u32 %v1077_v54, 16 }
  0x1a   : > { %996 = vmatprep.mubr.msk.bf16.mxu1 %vm1089_vm1, %v1088_v0  ;;  %v485_v55 = vor.u32 %v484_v51, %v480_v50  ;;  %v634_v61 = vsel %vm629_vm4, %v631_v48, %v633_v57  ;;  %v493_v63 = vor.u32 %v491_v59, %v489_v56  ;;  %v635_v2 = vrot.slane %v1078_v62, 1 }
  0x1b   : > { %v497_v1 = vrot.slane %v495_v60, 1  ;;  %v499_v4 = vshrl.u32 %v1077_v54, 16  ;;  %v503_v5 = vshll.u32 %v1078_v62, 16  ;;  %v637_v10 = vrot.slane %v1079_v7, 1 }
  0x1c   : > { %v490_v58 = vsel %vm212_vm3, %v485_v55, %v489_v56  ;;  %v636_v6 = vsel %vm629_vm4, %v633_v57, %v635_v2  ;;  %v507_v12 = vshrl.u32 %v1078_v62, 16  ;;  %v515_v18 = vshrl.u32 %v1079_v7, 16 }
  0x1d   : > { %v498_v3 = vsel %vm212_vm3, %v493_v63, %v497_v1  ;;  %v501_v8 = vor.u32 %v499_v4, %v497_v1  ;;  %v505_v9 = vrot.slane %v503_v5, 1  ;;  %v638_v14 = vsel %vm629_vm4, %v635_v2, %v637_v10  ;;  %v1252_v4 = vld [vmem:[%s1301_s2] ss:$0 sm:$0xff] }
  0x1f   : > { %971 = vmatmul.mubr.msk.bf16.gmra.mxu0 %vm257_vm2, %v232_v24  ;;  %v506_v11 = vsel %vm212_vm3, %v501_v8, %v505_v9  ;;  %v509_v15 = vor.u32 %v507_v12, %v505_v9 }
  0x20   : > { %974 = vmatprep.mubr.msk.bf16.mxu0 %vm1089_vm1, %v1088_v0 }
  0x21   : > { %997 = vmatmul.mubr.msk.bf16.gmra.mxu1 %vm257_vm2, %v1070_v13  ;;  %v511_v13 = vshll.u32 %v1079_v7, 16 }
  0x22   : > { %1000 = vmatprep.mubr.msk.bf16.mxu1 %vm1089_vm1, %v1088_v0 }
  0x23   : > { %v513_v16 = vrot.slane %v511_v13, 1 }
  0x25   : > { %v514_v17 = vsel %vm212_vm3, %v509_v15, %v513_v16  ;;  %v517_v19 = vor.u32 %v515_v18, %v513_v16 }
  0x27   : > { %975 = vmatmul.mubr.msk.bf16.gmra.mxu0 %vm257_vm2, %v240_v32 }
  0x28   : > { %978 = vmatprep.mubr.msk.bf16.mxu0 %vm1089_vm1, %v1088_v0 }
  0x29   : > { %1001 = vmatmul.mubr.msk.bf16.gmra.mxu1 %vm257_vm2, %v1071_v23 }
  0x2a   : > { %1004 = vmatprep.mubr.msk.bf16.mxu1 %vm1089_vm1, %v1088_v0 }
  0x2f   : > { %979 = vmatmul.mubr.msk.bf16.gmra.mxu0 %vm257_vm2, %v248_v40 }
  0x30   : > { %982 = vmatprep.mubr.msk.bf16.mxu0 %vm1089_vm1, %v1088_v0 }
  0x31   : > { %1005 = vmatmul.mubr.msk.bf16.gmra.mxu1 %vm257_vm2, %v890_v41 }
  0x32   : > { %1032 = vmatprep.mubr.msk.bf16.mxu1 %vm1089_vm1, %v1088_v0 }
  0x37   : > { %983 = vmatmul.mubr.msk.bf16.gmra.mxu0 %vm257_vm2, %v251_v49 }
  0x38   : > { %1010 = vmatprep.mubr.msk.bf16.mxu0 %vm1089_vm1, %v1088_v0 }
  0x39   : > { %1033 = vmatmul.mubr.msk.bf16.vlgmr.msra.gmra.mxu1 %vm257_vm2, %v632_v53 }
  0x3a   : > { %1036 = vmatprep.mubr.msk.bf16.mxu1 %vm1089_vm1, %v1088_v0 }
  0x3f   : > { %1011 = vmatmul.mubr.msk.bf16.vlgmr.msra.gmra.mxu0 %vm257_vm2, %v490_v58 }
  0x40   : > { %1014 = vmatprep.mubr.msk.bf16.mxu0 %vm1089_vm1, %v1088_v0 }
  0x41   : > { %1037 = vmatmul.mubr.msk.bf16.gmra.mxu1 %vm257_vm2, %v634_v61 }
  0x42   : > { %1040 = vmatprep.mubr.msk.bf16.mxu1 %vm1089_vm1, %v1088_v0 }
  0x47   : > { %1015 = vmatmul.mubr.msk.bf16.gmra.mxu0 %vm257_vm2, %v498_v3 }
  0x48   : > { %1018 = vmatprep.mubr.msk.bf16.mxu0 %vm1089_vm1, %v1088_v0 }
  0x49   : > { %1041 = vmatmul.mubr.msk.bf16.gmra.mxu1 %vm257_vm2, %v636_v6 }
  0x4a   : > { %1044 = vmatprep.mubr.msk.bf16.mxu1 %vm1089_vm1, %v1088_v0 }
  0x4f   : > { %1019 = vmatmul.mubr.msk.bf16.gmra.mxu0 %vm257_vm2, %v506_v11 }
  0x50   : > { %1022 = vmatprep.mubr.msk.bf16.mxu0 %vm1089_vm1, %v1088_v0 }
  0x51   : > { %1045 = vmatmul.mubr.msk.bf16.gmra.mxu1 %vm257_vm2, %v638_v14 }
  0x52   : > { %1048 = vmatprep.mubr.msk.bf16.mxu1 %vm1089_vm1, %v1088_v0 }
  0x57   : > { %1023 = vmatmul.mubr.msk.bf16.gmra.mxu0 %vm257_vm2, %v514_v17 }
  0x58   : > { %1026 = vmatprep.mubr.msk.bf16.mxu0 %vm1089_vm1, %v1088_v0 }
  0x59   : > { %1049 = vmatmul.mubr.msk.bf16.gmra.mxu1 %vm257_vm2, %v637_v10 }
  0x5f   : > { %1027 = vmatmul.mubr.msk.bf16.gmra.mxu0 %vm257_vm2, %v517_v19 }
  0xd1   : > { %v403_v20 = vpop.f32.mrf.mxu1 }
  0xd3   : > { %v990_v21 = vpop.f32.mrf.mxu1 }
  0xd5   : > { %v406_v22 = vpop.f32.mrf.mxu1 }
  0xd7   : > { %v991_v23 = vpop.f32.mrf.mxu1  ;;  %v311_v24 = vpop.f32.mrf.mxu0 }
  0xd8   : > { %v404_v62 = vadd.f32 %v403_v20, %v311_v24 }
  0xd9   : > { %v411_v25 = vpop.f32.mrf.mxu1  ;;  %v968_v26 = vpop.f32.mrf.mxu0 }
  0xdb   : > { %v994_v27 = vpop.f32.mrf.mxu1  ;;  %v314_v28 = vpop.f32.mrf.mxu0 }
  0xdc   : > { %v407_v6 = vadd.f32 %v406_v22, %v314_v28 }
  0xdd   : > { %v414_v29 = vpop.f32.mrf.mxu1  ;;  %v969_v30 = vpop.f32.mrf.mxu0 }
  0xdf   : > { %v995_v31 = vpop.f32.mrf.mxu1  ;;  %v319_v32 = vpop.f32.mrf.mxu0 }
  0xe0   : > { %v412_v14 = vadd.f32 %v411_v25, %v319_v32 }
  0xe1   : > { %v1231_v33 = vpop.f32.mrf.mxu1  ;;  %v972_v34 = vpop.f32.mrf.mxu0 }
  0xe3   : > { %v998_v0 = vpop.f32.mrf.mxu1  ;;  %v322_v35 = vpop.f32.mrf.mxu0 }
  0xe4   : > { %v415_v24 = vadd.f32 %v414_v29, %v322_v35 }
  0xe5   : > { %v1233_v36 = vpop.f32.mrf.mxu1  ;;  %v973_v37 = vpop.f32.mrf.mxu0 }
  0xe7   : > { %v999_v38 = vpop.f32.mrf.mxu1  ;;  %v327_v39 = vpop.f32.mrf.mxu0 }
  0xe8   : > { %v420_v37 = vadd.f32 %v1231_v33, %v327_v39 }
  0xe9   : > { %v1235_v40 = vpop.f32.mrf.mxu1  ;;  %v976_v41 = vpop.f32.mrf.mxu0 }
  0xeb   : > { %v1002_v42 = vpop.f32.mrf.mxu1  ;;  %v1237_v43 = vpop.f32.mrf.mxu0 }
  0xed   : > { %v1239_v44 = vpop.f32.mrf.mxu1  ;;  %v977_v45 = vpop.f32.mrf.mxu0 }
  0xef   : > { %v1003_v46 = vpop.f32.mrf.mxu1  ;;  %v1241_v47 = vpop.f32.mrf.mxu0 }
  0xf1   : > { %v1243_v48 = vpop.f32.mrf.mxu1  ;;  %v980_v49 = vpop.f32.mrf.mxu0 }
  0xf3   : > { %v1006_v50 = vpop.f32.mrf.mxu1  ;;  %v1245_v51 = vpop.f32.mrf.mxu0 }
  0xf5   : > { %v438_v52 = vpop.f32.mrf.mxu1  ;;  %v981_v53 = vpop.f32.mrf.mxu0 }
  0xf6   : > { %v423_v52 = vadd.f32 %v1233_v36, %v1237_v43 }
  0xf7   : > { %v1007_v54 = vpop.f32.mrf.mxu1  ;;  %v1247_v55 = vpop.f32.mrf.mxu0 }
  0xf9   : > { %v696_v56 = vpop.f32.mrf.mxu1  ;;  %v984_v57 = vpop.f32.mrf.mxu0 }
  0xfb   : > { %v1034_v58 = vpop.f32.mrf.mxu1  ;;  %v346_v59 = vpop.f32.mrf.mxu0 }
  0xfd   : > { %v699_v60 = vpop.f32.mrf.mxu1  ;;  %v985_v61 = vpop.f32.mrf.mxu0 }
  0xfe   : > { %v428_v61 = vadd.f32 %v1235_v40, %v1241_v47 }
  0xff   : > { %v1035_v63 = vpop.f32.mrf.mxu1  ;;  %v575_v1 = vpop.f32.mrf.mxu0 }
 0x100   : > { %v613_v2 = vadd.f32 %v575_v1, %v404_v62 }
 0x101   : > { %v704_v3 = vpop.f32.mrf.mxu1  ;;  %v1012_v5 = vpop.f32.mrf.mxu0 }
 0x102   : > { %v734_v7 = vadd.f32 %v696_v56, %v613_v2 }
 0x103   : > { %v1038_v8 = vpop.f32.mrf.mxu1  ;;  %v578_v9 = vpop.f32.mrf.mxu0 }
 0x104   : > { %v750_v10 = vadd.f32 %v1252_v4, %v734_v7  ;;  %v614_v11 = vadd.f32 %v578_v9, %v407_v6  ;;  %v431_v7 = vadd.f32 %v1239_v44, %v1245_v51 }
 0x105   : > { %v707_v12 = vpop.f32.mrf.mxu1  ;;  %v1013_v13 = vpop.f32.mrf.mxu0 }
 0x106   : > { %v759_v15 = vmax.f32 %v750_v10, 0.0  ;;  %v735_v16 = vadd.f32 %v699_v60, %v614_v11 }
 0x107   : > { %v1039_v17 = vpop.f32.mrf.mxu1  ;;  %v583_v18 = vpop.f32.mrf.mxu0 }
 0x108   : > { %v931_v19 = vpack.c.bf16 %v759_v15, %v759_v15  ;;  %v751_v20 = vadd.f32 %v1252_v4, %v735_v16  ;;  %v615_v21 = vadd.f32 %v583_v18, %v412_v14  ;;  %v436_v15 = vadd.f32 %v1243_v48, %v1247_v55 }
 0x109   : > { %v712_v22 = vpop.f32.mrf.mxu1  ;;  %v1016_v23 = vpop.f32.mrf.mxu0 }
 0x10a   : > { %806 = vst.msk [vmem:[%s1259_s4] sm:$0xf] %vm805_vm5, %v931_v19  ;;  %v760_v25 = vmax.f32 %v751_v20, 0.0  ;;  %v736_v26 = vadd.f32 %v704_v3, %v615_v21 }
 0x10b   : > { %v1042_v27 = vpop.f32.mrf.mxu1  ;;  %v586_v28 = vpop.f32.mrf.mxu0 }
 0x10c   : > { %v932_v30 = vpack.c.bf16 %v760_v25, %v760_v25  ;;  %v752_v31 = vadd.f32 %v1252_v4, %v736_v26  ;;  %v616_v32 = vadd.f32 %v586_v28, %v415_v24 }
 0x10d   : > { %v715_v34 = vpop.f32.mrf.mxu1  ;;  %v1017_v0 = vpop.f32.mrf.mxu0 }
 0x10e   : > { %807 = vst.msk [vmem:[%s1259_s4 + $0x4] sm:$0xf] %vm805_vm5, %v932_v30  ;;  %v761_v38 = vmax.f32 %v752_v31, 0.0  ;;  %v737_v41 = vadd.f32 %v707_v12, %v616_v32 }
 0x10f   : > { %v1043_v29 = vpop.f32.mrf.mxu1  ;;  %v591_v35 = vpop.f32.mrf.mxu0 }
 0x110   : > { %v933_v42 = vpack.c.bf16 %v761_v38, %v761_v38  ;;  %v753_v45 = vadd.f32 %v1252_v4, %v737_v41  ;;  %v617_v46 = vadd.f32 %v591_v35, %v420_v37 }
 0x111   : > { %v720_v49 = vpop.f32.mrf.mxu1  ;;  %v1020_v50 = vpop.f32.mrf.mxu0 }
 0x112   : > { %808 = vst.msk [vmem:[%s1259_s4 + $0x8] sm:$0xf] %vm805_vm5, %v933_v42  ;;  %v762_v53 = vmax.f32 %v753_v45, 0.0  ;;  %v738_v33 = vadd.f32 %v712_v22, %v617_v46 }
 0x113   : > { %v1046_v39 = vpop.f32.mrf.mxu1  ;;  %v594_v54 = vpop.f32.mrf.mxu0 }
 0x114   : > { %v934_v56 = vpack.c.bf16 %v762_v53, %v762_v53  ;;  %v754_v57 = vadd.f32 %v1252_v4, %v738_v33  ;;  %v618_v58 = vadd.f32 %v594_v54, %v423_v52 }
 0x115   : > { %v723_v59 = vpop.f32.mrf.mxu1  ;;  %v1021_v60 = vpop.f32.mrf.mxu0 }
 0x116   : > { %809 = vst.msk [vmem:[%s1259_s4 + $0xc] sm:$0xf] %vm805_vm5, %v934_v56  ;;  %v763_v62 = vmax.f32 %v754_v57, 0.0  ;;  %v739_v36 = vadd.f32 %v715_v34, %v618_v58 }
 0x117   : > { %v1047_v43 = vpop.f32.mrf.mxu1  ;;  %v599_v63 = vpop.f32.mrf.mxu0 }
 0x118   : > { %v935_v1 = vpack.c.bf16 %v763_v62, %v763_v62  ;;  %v755_v2 = vadd.f32 %v1252_v4, %v739_v36  ;;  %v619_v3 = vadd.f32 %v599_v63, %v428_v61 }
 0x119   : > { %v728_v5 = vpop.f32.mrf.mxu1  ;;  %v1024_v6 = vpop.f32.mrf.mxu0 }
 0x11a   : > { %810 = vst.msk [vmem:[%s1259_s4 + $0x10] sm:$0xf] %vm805_vm5, %v935_v1  ;;  %v764_v8 = vmax.f32 %v755_v2, 0.0  ;;  %v740_v40 = vadd.f32 %v720_v49, %v619_v3 }
 0x11b   : > { %v1050_v47 = vpop.f32.mrf.mxu1  ;;  %v602_v9 = vpop.f32.mrf.mxu0 }
 0x11c   : > { %v936_v10 = vpack.c.bf16 %v764_v8, %v764_v8  ;;  %v756_v11 = vadd.f32 %v1252_v4, %v740_v40  ;;  %v620_v12 = vadd.f32 %v602_v9, %v431_v7 }
 0x11d   : > { %v731_v13 = vpop.f32.mrf.mxu1  ;;  %v1025_v14 = vpop.f32.mrf.mxu0 }
 0x11e   : > { %811 = vst.msk [vmem:[%s1259_s4 + $0x14] sm:$0xf] %vm805_vm5, %v936_v10  ;;  %v765_v44 = vmax.f32 %v756_v11, 0.0  ;;  %v741_v51 = vadd.f32 %v723_v59, %v620_v12 }
 0x11f   : > { %v1051_v16 = vpop.f32.mrf.mxu1  ;;  %v607_v17 = vpop.f32.mrf.mxu0 }
 0x120   : > { %v937_v18 = vpack.c.bf16 %v765_v44, %v765_v44  ;;  %v757_v19 = vadd.f32 %v1252_v4, %v741_v51  ;;  %v621_v20 = vadd.f32 %v607_v17, %v436_v15 }
 0x121   : > { %v1028_v21 = vpop.f32.mrf.mxu0 }
 0x122   : > { %812 = vst.msk [vmem:[%s1259_s4 + $0x18] sm:$0xf] %vm805_vm5, %v937_v18  ;;  %v766_v22 = vmax.f32 %v757_v19, 0.0  ;;  %v742_v23 = vadd.f32 %v728_v5, %v621_v20 }
 0x123   : > { %v610_v24 = vpop.f32.mrf.mxu0 }
 0x124   : > { %v938_v25 = vpack.c.bf16 %v766_v22, %v766_v22  ;;  %v758_v48 = vadd.f32 %v1252_v4, %v742_v23 }
 0x125   : > { %v1029_v55 = vpop.f32.mrf.mxu0 }
 0x126   : > { %813 = vst.msk [vmem:[%s1259_s4 + $0x1c] sm:$0xf] %vm805_vm5, %v938_v25  ;;  %v767_v26 = vmax.f32 %v758_v48, 0.0 }
 0x128   : > { %v939_v27 = vpack.c.bf16 %v767_v26, %v767_v26 }
 0x12a   : > { %814 = vst.msk [vmem:[%s1259_s4 + $0x20] sm:$0xf] %vm805_vm5, %v939_v27 }
 0x12b PF: > { %s13_s12 = sadd.s32 1, %s1086_s12  }
 0x12c   : > { %p10_p4 = scmp.ge.s32.totalorder %s13_s12, 4  }
 0x12e   :  { %12 = sbr.rel (!%p10_p4) target bundleno = 1 (0x1), region = 65 }

// kernel: e2e_encoder_forward.6
= control target key start
LH: loop header
LB: loop body
LE: loop exit
PB: predicated region body
PF: predicated region fallthrough
CT: control target
= control target key end

     0   :  { %s885_s12 = smov 0   ;;  %s976_s0 = inlined_call_operand.vmem [shape: bf16[2,32,64], index: 0, kind: input, shape index: {}]   ;;  %s977_s1 = inlined_call_operand.vmem [shape: bf16[4,64,32], index: 1, kind: input, shape index: {}]   ;;  %s978_s2 = inlined_call_operand.vmem [shape: f32[1,32], index: 2, kind: input, shape index: {}]   ;;  %s979_s3 = inlined_call_operand.vmem [shape: bf16[2,20,32], index: 3, kind: output, shape index: {}]  }
   0x1 LB: > { %s682_s13 = sadd.s32 4294967295, %s863_s12   ;;  %p686_p0 = scmp.ge.s32.totalorder %s863_s12, 1  ;;  %s863_s12 = sphi %s885_s12, %s13_s12  }
   0x2   : > { %p137_p1 = scmp.lt.s32.totalorder %s863_s12, 3 }
   0x4   : > { %p138_p2 = pnand %p686_p0, %p137_p1 }
   0x5   : > { %p161_p3 = scmp.lt.s32.totalorder (!%p138_p2), %s682_s13, 1 }
   0x6   : > { %141 = sbr.rel (%p138_p2) target bundleno = 254 (0xfe), region = 32 }
   0xb   : > { %v835_v0 = vld [vmem:[%s977_s1 + $0x38] sm:$0xff]   ;;  %v837_v2 = vld [vmem:[%s977_s1 + $0x30] sm:$0xff]   ;;  %s981_s13 = smov (!%p161_p3, %s682_s13), 1  ;;  %v839_v4 = vld [vmem:[%s977_s1 + $0x28] sm:$0xff]   ;;  %vm241_vm0 = vcmask 523264   ;;  %vm511_vm2 = vcmask 1044480  }
   0xc   : > { %v836_v1 = vld [vmem:[%s977_s1 + $0x18] sm:$0xff]   ;;  %778 = vmatprep.subr.bf16.mxu0 %v835_v0  ;;  %v838_v3 = vld [vmem:[%s977_s1 + $0x10] sm:$0xff]   ;;  %s750_s24 = sshll.u32 %s981_s13, 4  ;;  %v840_v5 = vld [vmem:[%s977_s1 + $0x8] sm:$0xff]   ;;  %vm201_vm1 = vsmask.f32 7424 }
   0xd   : > { %790 = vmatprep.subr.bf16.mxu1 %v836_v1  ;;  %779 = vmatpush3.bf16.msra.mxu0 %v835_v0  ;;  %s917_s29 = scalar_lea.vmem %s976_s0, %s750_s24  ;;  %v841_v6 = vld [vmem:[%s977_s1 + $0x20] sm:$0xff]   ;;  %v846_v10 = vld [vmem:[%s977_s1 + $0x58] sm:$0xff]   ;;  %v848_v21 = vld [vmem:[%s977_s1 + $0x50] sm:$0xff]   ;;  %vm399_vm3 = vsmask.f32 5376  ;;  %s826_s27 = smul.u32 12, %s981_s13 }
   0xe   : > { %791 = vmatpush3.bf16.msra.mxu1 %v836_v1  ;;  %780 = vmatprep.subr.bf16.mxu0 %v837_v2  ;;  %v842_v7 = vld [vmem:[%s977_s1] sm:$0xff]   ;;  %v844_v9 = vld [vmem:[%s917_s29 + $0x8] ss:$0 sps:$4 sm:$0x77]   ;;  %v847_v18 = vld [vmem:[%s977_s1 + $0x78] sm:$0xff]   ;;  %vm625_vm4 = vcmask 254976  }
   0xf   : > { %792 = vmatprep.subr.bf16.mxu1 %v838_v3  ;;  %v843_v8 = vld [vmem:[%s917_s29] sm:$0xff]   ;;  %v210_v13 = vshll.u32 %v844_v9, 16  ;;  %v214_v14 = vshrl.u32 %v844_v9, 16  ;;  %v845_v17 = vld [vmem:[%s917_s29 + $0x8] ss:$0 sps:$4 sm:$0x33]   ;;  %s170_s30 = scalar_lea.vmem %s979_s3, %s826_s27 }
  0x10   : > { %v203_v11 = vshrl.u32 %v843_v8, 16  ;;  %v205_v12 = vshll.u32 %v843_v8, 16  ;;  %798 = vmatprep.mubr.msk.bf16.mxu1 %vm241_vm0, %v843_v8  ;;  %v849_v23 = vld [vmem:[%s977_s1 + $0x70] sm:$0xff]   ;;  %v376_v24 = vld [vmem:[%s917_s29] sm:$0xc]  ;;  %v850_v28 = vld [vmem:[%s977_s1 + $0x48] sm:$0xff]  }
  0x11   : > { %781 = vmatpush3.bf16.msra.mxu0 %v837_v2  ;;  %v212_v16 = vrot.slane %v210_v13, 1  ;;  %v377_v25 = vld [vmem:[%s917_s29 + $0x4] sm:$0xf]  ;;  %v855_v27 = vld [vmem:[%s917_s29 + $0x8] sm:$0x1f]   ;;  %vm622_vm5 = vcmask 257024  }
  0x12   : > { %793 = vmatpush3.bf16.msra.mxu1 %v838_v3  ;;  %782 = vmatprep.subr.bf16.mxu0 %v839_v4  ;;  %v207_v15 = vrot.slane %v205_v12, 1  ;;  %v721_v26 = vcombine.low %v376_v24, %v377_v25  ;;  %v851_v29 = vld [vmem:[%s977_s1 + $0x68] sm:$0xff]   ;;  %v498_v30 = vld [vmem:[%s917_s29] sm:$0x8]  ;;  %v409_v33 = vshrl.u32 %v855_v27, 16  ;;  %v412_v34 = vshll.u32 %v855_v27, 16 }
  0x13   : > { %794 = vmatprep.subr.bf16.mxu1 %v840_v5  ;;  %v216_v20 = vor.u32 %v214_v14, %v212_v16  ;;  %v737_v35 = vcombine.low %v498_v30, %v377_v25  ;;  %v513_v36 = vrot.slane %v855_v27, 3  ;;  %v852_v41 = vld [vmem:[%s977_s1 + $0x40] sm:$0xff]  }
  0x14   : > { %v208_v19 = vor.u32 %v207_v15, %v203_v11  ;;  %v401_v31 = vshrl.u32 %v721_v26, 16  ;;  %v404_v32 = vshll.u32 %v721_v26, 16  ;;  %v411_v39 = vrot.slane %v409_v33, 2  ;;  %v853_v42 = vld [vmem:[%s977_s1 + $0x60] sm:$0xff]  }
  0x15   : > { %783 = vmatpush3.bf16.msra.mxu0 %v839_v4  ;;  %v414_v40 = vrot.slane %v412_v34, 3  ;;  %v512_v43 = vrot.slane %v737_v35, 3  ;;  %v744_v61 = vld [vmem:[%s978_s2] ss:$0 sm:$0xff] }
  0x16   : > { %795 = vmatpush3.bf16.msra.mxu1 %v840_v5  ;;  %784 = vmatprep.subr.bf16.mxu0 %v841_v6  ;;  %v213_v22 = vsel %vm201_vm1, %v208_v19, %v212_v16  ;;  %v403_v37 = vrot.slane %v401_v31, 2  ;;  %v406_v38 = vrot.slane %v404_v32, 3 }
  0x17   : > { %796 = vmatprep.subr.bf16.mxu1 %v842_v7  ;;  %786 = vmatprep.mubr.msk.bf16.mxu0 %vm241_vm0, %v213_v22  ;;  %v415_v45 = vor.u32 %v414_v40, %v411_v39  ;;  %v514_v46 = vsel %vm511_vm2, %v512_v43, %v513_v36 }
  0x18   : > { %v407_v44 = vor.u32 %v406_v38, %v403_v37 }
  0x19   : > { %785 = vmatpush3.bf16.msra.mxu0 %v841_v6 }
  0x1a   : > { %797 = vmatpush3.bf16.msra.mxu1 %v842_v7  ;;  %802 = vmatprep.subr.bf16.mxu0 %v846_v10  ;;  %v416_v47 = vsel %vm399_vm3, %v407_v44, %v415_v45 }
  0x1b   : > { %814 = vmatprep.subr.bf16.mxu1 %v847_v18 }
  0x1c   : > { %787 = vmatmul.mubr.msk.bf16.vlgmr.msra.gmra.mxu0 %vm241_vm0, %v216_v20 }
  0x1d   : > { %799 = vmatmul.mubr.msk.bf16.vlgmr.msra.gmra.mxu1 %vm241_vm0, %v845_v17  ;;  %803 = vmatpush3.bf16.msra.mxu0 %v846_v10 }
  0x1e   : > { %815 = vmatpush3.bf16.msra.mxu1 %v847_v18  ;;  %804 = vmatprep.subr.bf16.mxu0 %v848_v21 }
  0x1f   : > { %816 = vmatprep.subr.bf16.mxu1 %v849_v23  ;;  %810 = vmatprep.mubr.msk.bf16.mxu0 %vm241_vm0, %v416_v47 }
  0x20   : > { %822 = vmatprep.mubr.msk.bf16.mxu1 %vm241_vm0, %v514_v46 }
  0x21   : > { %805 = vmatpush3.bf16.msra.mxu0 %v848_v21 }
  0x22   : > { %817 = vmatpush3.bf16.msra.mxu1 %v849_v23  ;;  %806 = vmatprep.subr.bf16.mxu0 %v850_v28 }
  0x23   : > { %818 = vmatprep.subr.bf16.mxu1 %v851_v29 }
  0x25   : > { %807 = vmatpush3.bf16.msra.mxu0 %v850_v28 }
  0x26   : > { %819 = vmatpush3.bf16.msra.mxu1 %v851_v29  ;;  %808 = vmatprep.subr.bf16.mxu0 %v852_v41 }
  0x27   : > { %820 = vmatprep.subr.bf16.mxu1 %v853_v42 }
  0x29   : > { %809 = vmatpush3.bf16.msra.mxu0 %v852_v41 }
  0x2a   : > { %821 = vmatpush3.bf16.msra.mxu1 %v853_v42 }
  0x2c   : > { %811 = vmatmul.mubr.msk.bf16.vlgmr.msra.gmra.mxu0 %vm241_vm0, %v415_v45 }
  0x2d   : > { %823 = vmatmul.mubr.msk.bf16.vlgmr.msra.gmra.mxu1 %vm241_vm0, %v513_v36 }
  0xdc   : > { %v788_v48 = vpop.f32.mrf.mxu0 }
  0xdd   : > { %v800_v49 = vpop.f32.mrf.mxu1 }
  0xde   : > { %v282_v50 = vpop.f32.mrf.mxu0  ;;  %v371_v56 = vadd.f32 %v800_v49, %v788_v48 }
  0xdf   : > { %v362_v51 = vpop.f32.mrf.mxu1 }
  0xe0   : > { %v789_v52 = vpop.f32.mrf.mxu0  ;;  %v363_v59 = vadd.f32 %v362_v51, %v282_v50 }
  0xe1   : > { %v801_v53 = vpop.f32.mrf.mxu1 }
  0xe2   : > { %v285_v54 = vpop.f32.mrf.mxu0 }
  0xe3   : > { %v365_v55 = vpop.f32.mrf.mxu1 }
  0xe4   : > { %v366_v4 = vadd.f32 %v365_v55, %v285_v54 }
  0xec   : > { %v812_v57 = vpop.f32.mrf.mxu0 }
  0xed   : > { %v824_v58 = vpop.f32.mrf.mxu1  ;;  %v497_v60 = vadd.f32 %v812_v57, %v371_v56 }
  0xee   : > { %v481_v62 = vpop.f32.mrf.mxu0 }
  0xef   : > { %v579_v63 = vpop.f32.mrf.mxu1  ;;  %v595_v0 = vadd.f32 %v824_v58, %v497_v60  ;;  %v495_v1 = vadd.f32 %v481_v62, %v363_v59 }
  0xf0   : > { %v813_v2 = vpop.f32.mrf.mxu0 }
  0xf1   : > { %v825_v3 = vpop.f32.mrf.mxu1  ;;  %v605_v5 = vadd.f32 %v744_v61, %v595_v0  ;;  %v593_v6 = vadd.f32 %v579_v63, %v495_v1 }
  0xf2   : > { %v484_v7 = vpop.f32.mrf.mxu0 }
  0xf3   : > { %v608_v8 = vmax.f32 %v605_v5, 0.0  ;;  %v603_v9 = vadd.f32 %v744_v61, %v593_v6  ;;  %v496_v10 = vadd.f32 %v484_v7, %v366_v4  ;;  %v582_v11 = vpop.f32.mrf.mxu1 }
  0xf5   : > { %v753_v12 = vpack.c.bf16 %v608_v8, %v608_v8  ;;  %v606_v13 = vmax.f32 %v603_v9, 0.0  ;;  %v594_v14 = vadd.f32 %v582_v11, %v496_v10 }
  0xf7   : > { %626 = vst.msk [vmem:[%s170_s30 + $0x8] sm:$0x3] %vm625_vm4, %v753_v12  ;;  %v751_v15 = vpack.c.bf16 %v606_v13, %v606_v13  ;;  %v604_v16 = vadd.f32 %v744_v61, %v594_v14 }
  0xf9   : > { %623 = vst.msk [vmem:[%s170_s30] sm:$0xf] %vm622_vm5, %v751_v15  ;;  %v607_v17 = vmax.f32 %v604_v16, 0.0 }
  0xfb   : > { %v752_v18 = vpack.c.bf16 %v607_v17, %v607_v17 }
  0xfd   : > { %624 = vst.msk [vmem:[%s170_s30 + $0x4] sm:$0xf] %vm622_vm5, %v752_v18 }
  0xfe PF: > { %s13_s12 = sadd.s32 1, %s863_s12  }
  0xff   : > { %p10_p4 = scmp.ge.s32.totalorder %s13_s12, 4  }
 0x101   :  { %12 = sbr.rel (!%p10_p4) target bundleno = 1 (0x1), region = 65 }

// kernel: e2e_encoder_forward.7
= control target key start
LH: loop header
LB: loop body
LE: loop exit
PB: predicated region body
PF: predicated region fallthrough
CT: control target
= control target key end

     0   :  { %s1414_s15 = smov 0   ;;  %s1616_s0 = inlined_call_operand.vmem [shape: bf16[2,48,32], index: 0, kind: input, shape index: {}]   ;;  %s1617_s1 = inlined_call_operand.vmem [shape: bf16[9,32,32], index: 1, kind: input, shape index: {}]   ;;  %s1618_s2 = inlined_call_operand.vmem [shape: f32[1,32], index: 2, kind: input, shape index: {}]   ;;  %s1619_s3 = inlined_call_operand.vmem [shape: f32[24,1], index: 3, kind: input, shape index: {}]   ;;  %s1620_s4 = inlined_call_operand.vmem [shape: bf16[2,48,32], index: 4, kind: output, shape index: {}]  }
   0x1 LB: > { %s1132_s16 = sadd.s32 4294967295, %s1386_s15   ;;  %p1136_p0 = scmp.ge.s32.totalorder %s1386_s15, 1  ;;  %s1386_s15 = sphi %s1414_s15, %s14_s15  }
   0x2   : > { %p162_p1 = scmp.lt.s32.totalorder %s1386_s15, 3 }
   0x4   : > { %p163_p2 = pnand %p1136_p0, %p162_p1 }
   0x5   : > { %p188_p3 = scmp.lt.s32.totalorder (!%p163_p2), %s1132_s16, 1 }
   0x6   : > { %166 = sbr.rel (%p163_p2) target bundleno = 276 (0x114), region = 36 }
   0xb   : > { %v1349_v0 = vld [vmem:[%s1617_s1 + $0x18] sm:$0xff]   ;;  %v1350_v1 = vld [vmem:[%s1617_s1 + $0x8] sm:$0xff]   ;;  %v1351_v2 = vld [vmem:[%s1617_s1 + $0x10] sm:$0xff]   ;;  %s1622_s16 = smov (!%p188_p3, %s1132_s16), 1  ;;  %vm250_vm0 = vcmask 261120   ;;  %v1388_v20 = vmov 0  }
   0xc   : > { %1265 = vmatprep.subr.bf16.mxu0 %v1349_v0  ;;  %1273 = vmatprep.subr.bf16.mxu1 %v1350_v1  ;;  %v1352_v3 = vld [vmem:[%s1617_s1] sm:$0xff]   ;;  %s1337_s25 = smul.u32 24, %s1622_s16  ;;  %v1440_v4 = vld [vmem:[%s1617_s1 + $0x28] sm:$0xff]   ;;  %v1357_v5 = vld [vmem:[%s1617_s1 + $0x38] sm:$0xff]   ;;  %vm222_vm1 = vsmask.f32 7424 }
   0xd   : > { %1266 = vmatpush3.bf16.msra.mxu0 %v1349_v0  ;;  %1274 = vmatpush3.bf16.msra.mxu1 %v1350_v1  ;;  %v1359_v13 = vld [vmem:[%s1617_s1 + $0x30] sm:$0xff]   ;;  %vm380_vm2 = vcmask 1046528   ;;  %vm466_vm3 = vcmask 1044480   ;;  %v1364_v32 = vld [vmem:[%s1617_s1 + $0x58] sm:$0xff]   ;;  %v1358_v36 = vld [vmem:[%s1617_s1 + $0x20] sm:$0xff]   ;;  %vm1011_vm5 = vcmask 257024  }
   0xe   : > { %1267 = vmatprep.subr.bf16.mxu0 %v1351_v2  ;;  %1275 = vmatprep.subr.bf16.mxu1 %v1352_v3  ;;  %s1447_s30 = scalar_lea.vmem %s1616_s0, %s1337_s25  ;;  %v1366_v40 = vld [vmem:[%s1617_s1 + $0x50] sm:$0xff]   ;;  %v1363_v44 = vld [vmem:[%s1617_s1 + $0x48] sm:$0xff]   ;;  %vm548_vm4 = vsmask.f32 4352  ;;  %s1523_s21 = scalar_lea.vmem %s1620_s4, %s1337_s25  ;;  %v1371_v56 = vld [vmem:[%s1617_s1 + $0x78] sm:$0xff]   ;;  %vm730_vm7 = vcmask 1045504  }
   0xf   : > { %v199_v6 = vld [vmem:[%s1447_s30] sm:$0xf]  ;;  %v1454_v7 = vld [vmem:[%s1447_s30 + $0x4] sm:$0xf]  ;;  %v1457_v8 = vld [vmem:[%s1447_s30 + $0x8] sm:$0xf]  ;;  %1347 = vset.pattern.permute.xlu0 %v1388_v20  ;;  %1348 = vset.pattern.permute.xlu1 %v1388_v20 }
  0x10   : > { %v206_v9 = vld [vmem:[%s1447_s30 + $0xc] sm:$0x1]  ;;  %v1143_v10 = vcombine.low %v199_v6, %v1454_v7  ;;  %v1149_v11 = vcombine.low %v1457_v8, %v1457_v8  ;;  %v371_v14 = vld [vmem:[%s1447_s30] sm:$0xe]  ;;  %v1186_v43 = vcombine.low %v1454_v7, %v1457_v8  ;;  %v711_v52 = vld [vmem:[%s1447_s30 + $0x4] sm:$0xc] }
  0x11   : > { %1268 = vmatpush3.bf16.msra.mxu0 %v1351_v2  ;;  %1276 = vmatpush3.bf16.msra.mxu1 %v1352_v3  ;;  %v1465_v12 = vcombine.low %v1457_v8, %v206_v9  ;;  %v1158_v17 = vcombine.low %v371_v14, %v1454_v7  ;;  %v453_v18 = vld [vmem:[%s1447_s30] sm:$0x8]  ;;  %v454_v19 = vld [vmem:[%s1447_s30 + $0xc] sm:$0x7]  ;;  %v1515_v53 = vld [vmem:[%s1447_s30 + $0x8] sm:$0xf] }
  0x12   : > { %1281 = vmatprep.subr.bf16.mxu0 %v1440_v4  ;;  %1289 = vmatprep.subr.bf16.mxu1 %v1357_v5  ;;  %v224_v15 = vshrl.u32 %v1143_v10, 16  ;;  %v226_v16 = vshll.u32 %v1143_v10, 16  ;;  %v1167_v24 = vcombine.low %v453_v18, %v1454_v7  ;;  %v1168_v27 = vcombine.low %v1457_v8, %v454_v19  ;;  %v1487_v34 = vld [vmem:[%s1447_s30 + $0xc] sm:$0xf]  ;;  %v714_v57 = vld [vmem:[%s1447_s30 + $0x10] sm:$0x3] }
  0x13   : > { %1277 = vmatprep.mubr.msk.bf16.mxu1 %vm250_vm0, %v1143_v10  ;;  %v231_v21 = vshll.u32 %v1465_v12, 16  ;;  %v235_v22 = vshrl.u32 %v1465_v12, 16  ;;  %v382_v23 = vrot.slane %v1465_v12, 1  ;;  %v381_v26 = vrot.slane %v1158_v17, 1  ;;  %v713_v54 = vld [vmem:[%s1447_s30 + $0xc] sm:$0xf] }
  0x14   : > { %1278 = vmatmul.mubr.msk.bf16.vlgmr.msra.gmra.mxu1 %vm250_vm0, %v1149_v11  ;;  %v228_v25 = vrot.slane %v226_v16, 1  ;;  %v467_v29 = vrot.slane %v1167_v24, 3  ;;  %v468_v31 = vrot.slane %v1168_v27, 3  ;;  %v1177_v39 = vcombine.low %v1457_v8, %v1487_v34  ;;  %v803_v59 = vld [vmem:[%s1447_s30 + $0x10] sm:$0x7]  ;;  %v1365_v62 = vld [vmem:[%s1617_s1 + $0x40] sm:$0xff]  }
  0x15   : > { %1290 = vmatpush3.bf16.msra.mxu1 %v1357_v5  ;;  %v233_v28 = vrot.slane %v231_v21, 1  ;;  %v383_v37 = vsel %vm380_vm2, %v381_v26, %v382_v23  ;;  %v550_v41 = vshrl.u32 %v1167_v24, 16  ;;  %v553_v42 = vshll.u32 %v1167_v24, 16  ;;  %1016 = vst.msk [vmem:[%s1523_s21 + $0x10] sm:$0xf] %vm1011_vm5, %v1388_v20  ;;  %v1373_v5 = vld [vmem:[%s1617_s1 + $0x70] sm:$0xff]  }
  0x16   : > { %1291 = vmatprep.subr.bf16.mxu1 %v1359_v13  ;;  %v229_v30 = vor.u32 %v228_v25, %v224_v15  ;;  %v469_v38 = vsel %vm466_vm3, %v467_v29, %v468_v31  ;;  %v558_v45 = vshrl.u32 %v1177_v39, 16  ;;  %v561_v46 = vshll.u32 %v1177_v39, 16  ;;  %1017 = vst.msk [vmem:[%s1523_s21 + $0x14] sm:$0xf] %vm1011_vm5, %v1388_v20  ;;  %1012 = vst.msk [vmem:[%s1523_s21] sm:$0xf] %vm1011_vm5, %v1388_v20 }
  0x17   : > { %v237_v33 = vor.u32 %v235_v22, %v233_v28  ;;  %1293 = vmatprep.mubr.msk.bf16.mxu1 %vm250_vm0, %v469_v38  ;;  %v552_v47 = vrot.slane %v550_v41, 3  ;;  %v555_v48 = vrot.slane %v553_v42, 4  ;;  %v1196_v58 = vcombine.low %v711_v52, %v1515_v53  ;;  %1013 = vst.msk [vmem:[%s1523_s21 + $0x4] sm:$0xf] %vm1011_vm5, %v1388_v20  ;;  %1014 = vst.msk [vmem:[%s1523_s21 + $0x8] sm:$0xf] %vm1011_vm5, %v1388_v20 }
  0x18   : > { %v234_v35 = vsel %vm222_vm1, %v229_v30, %v233_v28  ;;  %v560_v49 = vrot.slane %v558_v45, 3  ;;  %v563_v50 = vrot.slane %v561_v46, 4  ;;  %v1187_v60 = vcombine.low %v1487_v34, %v1487_v34  ;;  %1015 = vst.msk [vmem:[%s1523_s21 + $0xc] sm:$0xf] %vm1011_vm5, %v1388_v20  ;;  %v990_v8 = vld [vmem:[%s1619_s3] sm:$0xff]  ;;  %v992_v11 = vld [vmem:[%s1619_s3 + $0x10] sm:$0xff] }
  0x19   : > { %1292 = vmatpush3.bf16.msra.mxu1 %v1359_v13  ;;  %1269 = vmatprep.mubr.msk.bf16.mxu0 %vm250_vm0, %v234_v35  ;;  %v556_v51 = vor.u32 %v555_v48, %v552_v47  ;;  %v1533_v61 = vcombine.low %v713_v54, %v803_v59  ;;  %v1197_v0 = vcombine.low %v713_v54, %v714_v57  ;;  %v814_v1 = vshrl.u32 %v1196_v58, 16  ;;  %v1369_v12 = vld [vmem:[%s1617_s1 + $0x68] sm:$0xff]   ;;  %v899_v17 = vld [vmem:[%s1447_s30 + $0x4] sm:$0x8] }
  0x1a   : > { %1270 = vmatmul.mubr.msk.bf16.vlgmr.msra.gmra.mxu0 %vm250_vm0, %v237_v33  ;;  %1305 = vmatprep.subr.bf16.mxu1 %v1364_v32  ;;  %v564_v55 = vor.u32 %v563_v50, %v560_v49  ;;  %v817_v2 = vshll.u32 %v1196_v58, 16  ;;  %v731_v13 = vrot.slane %v1196_v58, 2  ;;  %vm812_vm6 = vsmask.f32 5376  ;;  %v991_v18 = vld [vmem:[%s1619_s3 + $0x8] sm:$0xff]  ;;  %v1372_v20 = vld [vmem:[%s1617_s1 + $0x60] sm:$0xff]  }
  0x1b   : > { %1282 = vmatpush3.bf16.msra.mxu0 %v1440_v4  ;;  %1285 = vmatprep.mubr.msk.bf16.mxu0 %vm250_vm0, %v383_v37  ;;  %v822_v3 = vshrl.u32 %v1533_v61, 16  ;;  %v825_v4 = vshll.u32 %v1533_v61, 16  ;;  %v816_v6 = vrot.slane %v814_v1, 2  ;;  %v732_v14 = vrot.slane %v1197_v0, 2  ;;  %v1378_v26 = vld [vmem:[%s1617_s1 + $0x80] sm:$0xff]  }
  0x1c   : > { %1283 = vmatprep.subr.bf16.mxu0 %v1358_v36  ;;  %1294 = vmatmul.mubr.msk.bf16.vlgmr.msra.gmra.mxu1 %vm250_vm0, %v468_v31  ;;  %v565_v63 = vsel %vm548_vm4, %v556_v51, %v564_v55  ;;  %v819_v7 = vrot.slane %v817_v2, 3  ;;  %v1215_v22 = vcombine.low %v899_v17, %v1515_v53  ;;  %v909_v25 = vrot.slane %v1533_v61, 3 }
  0x1d   : > { %1306 = vmatpush3.bf16.msra.mxu1 %v1364_v32  ;;  %1309 = vmatprep.mubr.msk.bf16.mxu1 %vm250_vm0, %v1186_v43  ;;  %v824_v9 = vrot.slane %v822_v3, 2  ;;  %v827_v10 = vrot.slane %v825_v4, 3  ;;  %v733_v21 = vsel %vm730_vm7, %v731_v13, %v732_v14  ;;  %vm1064_vm8 = vcmask 257027  }
  0x1e   : > { %1307 = vmatprep.subr.bf16.mxu1 %v1366_v40  ;;  %v820_v15 = vor.u32 %v819_v7, %v816_v6  ;;  %995 = vperm.xlu0 %1347, %v990_v8   ;;  %v908_v24 = vrot.slane %v1215_v22, 3  ;;  %vm1065_vm9 = vsmask.f32 7950  ;;  %vm1028_vm10 = vsmask.f32 3328 }
  0x1f   : > { %1284 = vmatpush3.bf16.msra.mxu0 %v1358_v36  ;;  %v828_v16 = vor.u32 %v827_v10, %v824_v9  ;;  %1005 = vperm.xlu1 %1348, %v992_v11   ;;  %vm1066_vm11 = vmand %vm1064_vm8, %vm1065_vm9  ;;  %vm1029_vm13 = vsmask.f32 7440 }
  0x20   : > { %1297 = vmatprep.subr.bf16.mxu0 %v1363_v44  ;;  %v910_v27 = vsel %vm466_vm3, %v908_v24, %v909_v25  ;;  %vm1073_vm12 = vmand %vm1011_vm5, %vm1028_vm10 }
  0x21   : > { %1308 = vmatpush3.bf16.msra.mxu1 %v1366_v40  ;;  %v829_v19 = vsel %vm812_vm6, %v820_v15, %v828_v16  ;;  %vm1030_vm14 = vmor %vm1028_vm10, %vm1029_vm13 }
  0x22   : > { %1286 = vmatmul.mubr.msk.bf16.vlgmr.msra.gmra.mxu0 %vm250_vm0, %v382_v23  ;;  %1321 = vmatprep.subr.bf16.mxu1 %v1371_v56  ;;  %v1377_v23 = vld [vmem:[%s1617_s1 + $0x88] sm:$0xff]  }
  0x23   : > { %1298 = vmatpush3.bf16.msra.mxu0 %v1363_v44  ;;  %1301 = vmatprep.mubr.msk.bf16.mxu0 %vm250_vm0, %v565_v63 }
  0x24   : > { %1299 = vmatprep.subr.bf16.mxu0 %v1365_v62  ;;  %1310 = vmatmul.mubr.msk.bf16.vlgmr.msra.gmra.mxu1 %vm250_vm0, %v1187_v60 }
  0x25   : > { %1322 = vmatpush3.bf16.msra.mxu1 %v1371_v56  ;;  %1325 = vmatprep.mubr.msk.bf16.mxu1 %vm250_vm0, %v829_v19 }
  0x26   : > { %1323 = vmatprep.subr.bf16.mxu1 %v1373_v5  ;;  %1000 = vperm.xlu0 %1347, %v991_v18  }
  0x27   : > { %1300 = vmatpush3.bf16.msra.mxu0 %v1365_v62 }
  0x28   : > { %1313 = vmatprep.subr.bf16.mxu0 %v1369_v12 }
  0x29   : > { %1324 = vmatpush3.bf16.msra.mxu1 %v1373_v5 }
  0x2a   : > { %1302 = vmatmul.mubr.msk.bf16.vlgmr.msra.gmra.mxu0 %vm250_vm0, %v564_v55 }
  0x2b   : > { %1314 = vmatpush3.bf16.msra.mxu0 %v1369_v12  ;;  %1317 = vmatprep.mubr.msk.bf16.mxu0 %vm250_vm0, %v733_v21 }
  0x2c   : > { %1315 = vmatprep.subr.bf16.mxu0 %v1372_v20  ;;  %1326 = vmatmul.mubr.msk.bf16.vlgmr.msra.gmra.mxu1 %vm250_vm0, %v828_v16 }
  0x2f   : > { %1316 = vmatpush3.bf16.msra.mxu0 %v1372_v20 }
  0x30   : > { %1329 = vmatprep.subr.bf16.mxu0 %v1377_v23 }
  0x32   : > { %1318 = vmatmul.mubr.msk.bf16.vlgmr.msra.gmra.mxu0 %vm250_vm0, %v732_v14  ;;  %v1220_v14 = vld [vmem:[%s1618_s2] ss:$0 sm:$0xff] }
  0x33   : > { %1330 = vmatpush3.bf16.msra.mxu0 %v1377_v23  ;;  %1333 = vmatprep.mubr.msk.bf16.mxu0 %vm250_vm0, %v910_v27 }
  0x34   : > { %1331 = vmatprep.subr.bf16.mxu0 %v1378_v26 }
  0x37   : > { %1332 = vmatpush3.bf16.msra.mxu0 %v1378_v26 }
  0x3a   : > { %1334 = vmatmul.mubr.msk.bf16.vlgmr.msra.gmra.mxu0 %vm250_vm0, %v909_v25 }
  0x99   : > { %v996_v25 = vpop.permute.xlu0 %995 }
  0x9a   : > { %v1006_v19 = vpop.permute.xlu1 %1005 }
  0xd4   : > { %v1279_v28 = vpop.f32.mrf.mxu1 }
  0xd6   : > { %v357_v29 = vpop.f32.mrf.mxu1 }
  0xd8   : > { %v1280_v30 = vpop.f32.mrf.mxu1 }
  0xda   : > { %v360_v31 = vpop.f32.mrf.mxu1  ;;  %v1271_v32 = vpop.f32.mrf.mxu0 }
  0xdb   : > { %v366_v45 = vadd.f32 %v1279_v28, %v1271_v32 }
  0xdc   : > { %v291_v33 = vpop.f32.mrf.mxu0  ;;  %v1295_v34 = vpop.f32.mrf.mxu1 }
  0xdd   : > { %v358_v48 = vadd.f32 %v357_v29, %v291_v33 }
  0xde   : > { %v1272_v35 = vpop.f32.mrf.mxu0  ;;  %v522_v36 = vpop.f32.mrf.mxu1 }
  0xe0   : > { %v294_v37 = vpop.f32.mrf.mxu0  ;;  %v1296_v38 = vpop.f32.mrf.mxu1 }
  0xe1   : > { %v361_v55 = vadd.f32 %v360_v31, %v294_v37 }
  0xe2   : > { %v1287_v39 = vpop.f32.mrf.mxu0  ;;  %v525_v40 = vpop.f32.mrf.mxu1 }
  0xe3   : > { %v452_v49 = vadd.f32 %v1287_v39, %v366_v45 }
  0xe4   : > { %v436_v41 = vpop.f32.mrf.mxu0  ;;  %v1311_v42 = vpop.f32.mrf.mxu1 }
  0xe5   : > { %v450_v52 = vadd.f32 %v436_v41, %v358_v48  ;;  %v538_v56 = vadd.f32 %v1295_v34, %v452_v49  ;;  %v1067_v41 = vld [vmem:[%s1523_s21] sm:$0x8] }
  0xe6   : > { %v1288_v43 = vpop.f32.mrf.mxu0  ;;  %v694_v44 = vpop.f32.mrf.mxu1 }
  0xe7   : > { %v536_v59 = vadd.f32 %v522_v36, %v450_v52 }
  0xe8   : > { %v439_v46 = vpop.f32.mrf.mxu0  ;;  %v1312_v47 = vpop.f32.mrf.mxu1 }
  0xe9   : > { %v451_v60 = vadd.f32 %v439_v46, %v361_v55  ;;  %v1074_v46 = vld [vmem:[%s1523_s21 + $0xc] sm:$0xf] }
  0xea   : > { %v1303_v50 = vpop.f32.mrf.mxu0  ;;  %v697_v51 = vpop.f32.mrf.mxu1 }
  0xeb   : > { %v634_v61 = vadd.f32 %v1303_v50, %v538_v56  ;;  %v537_v2 = vadd.f32 %v525_v40, %v451_v60  ;;  %v1001_v40 = vpop.permute.xlu0 %1000 }
  0xec   : > { %v618_v53 = vpop.f32.mrf.mxu0  ;;  %v1327_v54 = vpop.f32.mrf.mxu1 }
  0xed   : > { %v632_v0 = vadd.f32 %v618_v53, %v536_v59  ;;  %v710_v3 = vadd.f32 %v1311_v42, %v634_v61 }
  0xee   : > { %v1304_v57 = vpop.f32.mrf.mxu0  ;;  %v882_v58 = vpop.f32.mrf.mxu1 }
  0xef   : > { %v708_v5 = vadd.f32 %v694_v44, %v632_v0 }
  0xf0   : > { %v621_v62 = vpop.f32.mrf.mxu0  ;;  %v1328_v63 = vpop.f32.mrf.mxu1 }
  0xf1   : > { %v633_v6 = vadd.f32 %v621_v62, %v537_v2 }
  0xf2   : > { %v1319_v1 = vpop.f32.mrf.mxu0  ;;  %v885_v22 = vpop.f32.mrf.mxu1 }
  0xf3   : > { %v802_v7 = vadd.f32 %v1319_v1, %v710_v3  ;;  %v709_v11 = vadd.f32 %v697_v51, %v633_v6 }
  0xf4   : > { %v786_v4 = vpop.f32.mrf.mxu0 }
  0xf5   : > { %v800_v9 = vadd.f32 %v786_v4, %v708_v5  ;;  %v898_v12 = vadd.f32 %v1327_v54, %v802_v7 }
  0xf6   : > { %v1320_v8 = vpop.f32.mrf.mxu0 }
  0xf7   : > { %v896_v15 = vadd.f32 %v882_v58, %v800_v9 }
  0xf8   : > { %v789_v10 = vpop.f32.mrf.mxu0 }
  0xf9   : > { %v801_v16 = vadd.f32 %v789_v10, %v709_v11 }
  0xfa   : > { %v1335_v13 = vpop.f32.mrf.mxu0 }
  0xfb   : > { %v979_v17 = vadd.f32 %v1335_v13, %v898_v12  ;;  %v897_v24 = vadd.f32 %v885_v22, %v801_v16 }
  0xfc   : > { %v963_v18 = vpop.f32.mrf.mxu0 }
  0xfd   : > { %v977_v20 = vadd.f32 %v963_v18, %v896_v15  ;;  %v989_v21 = vadd.f32 %v1220_v14, %v979_v17 }
  0xfe   : > { %v1336_v23 = vpop.f32.mrf.mxu0 }
  0xff   : > { %v987_v26 = vadd.f32 %v1220_v14, %v977_v20  ;;  %v1010_v27 = vmul.f32 %v1006_v19, %v989_v21 }
 0x100   : > { %v966_v28 = vpop.f32.mrf.mxu0 }
 0x101   : > { %v1008_v29 = vmul.f32 %v996_v25, %v987_v26  ;;  %v1228_v30 = vpack.c.bf16 %v1010_v27, %v1010_v27  ;;  %v978_v31 = vadd.f32 %v966_v28, %v897_v24 }
 0x103   : > { %v1226_v32 = vpack.c.bf16 %v1008_v29, %v1008_v29  ;;  %v1051_v33 = vshll.u32 %v1228_v30, 16  ;;  %v1055_v34 = vshrl.u32 %v1228_v30, 16  ;;  %v988_v35 = vadd.f32 %v1220_v14, %v978_v31 }
 0x105   : > { %v1032_v36 = vshll.u32 %v1226_v32, 16  ;;  %v1035_v37 = vshrl.u32 %v1226_v32, 16  ;;  %v1053_v38 = vrot.slane %v1051_v33, 5  ;;  %v1057_v39 = vrot.slane %v1055_v34, 4 }
 0x106   : > { %v1009_v42 = vmul.f32 %v1001_v40, %v988_v35 }
 0x107   : > { %v1034_v43 = vrot.slane %v1032_v36, 5  ;;  %v1037_v44 = vrot.slane %v1035_v37, 4  ;;  %v1058_v45 = vor.u32 %v1057_v39, %v1053_v38 }
 0x108   : > { %v1227_v47 = vpack.c.bf16 %v1009_v42, %v1009_v42 }
 0x109   : > { %v1038_v48 = vor.u32 %v1037_v44, %v1034_v43  ;;  %v1068_v49 = vsel %vm1066_vm11, %v1034_v43, %v1067_v41  ;;  %v1059_v50 = vrot.slane %v1058_v45, 4 }
 0x10a   : > { %1069 = vst [vmem:[%s1523_s21] sm:$0x8] %v1068_v49  ;;  %v1041_v51 = vshll.u32 %v1227_v47, 16  ;;  %v1045_v52 = vshrl.u32 %v1227_v47, 16 }
 0x10b   : > { %v1039_v53 = vrot.slane %v1038_v48, 4  ;;  %v1075_v54 = vsel %vm1073_vm12, %v1059_v50, %v1074_v46 }
 0x10c   : > { %1076 = vst [vmem:[%s1523_s21 + $0xc] sm:$0xf] %v1075_v54  ;;  %v1043_v55 = vrot.slane %v1041_v51, 5  ;;  %v1047_v56 = vrot.slane %v1045_v52, 4 }
 0x10e   : > { %v1044_v57 = vsel %vm1030_vm14, %v1039_v53, %v1043_v55  ;;  %v1048_v58 = vor.u32 %v1047_v56, %v1043_v55 }
 0x10f   : > { %1070 = vst.msk [vmem:[%s1523_s21 + $0x4] sm:$0xf] %vm1011_vm5, %v1044_v57 }
 0x110   : > { %v1049_v59 = vrot.slane %v1048_v58, 4 }
 0x112   : > { %v1054_v60 = vsel %vm1030_vm14, %v1049_v59, %v1053_v38 }
 0x113   : > { %1071 = vst.msk [vmem:[%s1523_s21 + $0x8] sm:$0xf] %vm1011_vm5, %v1054_v60 }
 0x114 PF: > { %s14_s15 = sadd.s32 1, %s1386_s15  }
 0x115   : > { %p11_p4 = scmp.ge.s32.totalorder %s14_s15, 4  }
 0x117   :  { %13 = sbr.rel (!%p11_p4) target bundleno = 1 (0x1), region = 74 }

// kernel: e2e_encoder_forward.8
= control target key start
LH: loop header
LB: loop body
LE: loop exit
PB: predicated region body
PF: predicated region fallthrough
CT: control target
= control target key end

     0   :  { %s1486_s15 = smov 0   ;;  %s1711_s0 = inlined_call_operand.vmem [shape: bf16[2,48,32], index: 0, kind: input, shape index: {}]   ;;  %s1712_s1 = inlined_call_operand.vmem [shape: bf16[9,32,16], index: 1, kind: input, shape index: {}]   ;;  %s1713_s2 = inlined_call_operand.vmem [shape: bf16[1,16,32], index: 2, kind: input, shape index: {}]   ;;  %s1714_s3 = inlined_call_operand.vmem [shape: f32[24,1], index: 3, kind: input, shape index: {}]   ;;  %s1715_s4 = inlined_call_operand.vmem [shape: bf16[2,48,32], index: 4, kind: output, shape index: {}]  }
   0x1 LB: > { %s1203_s16 = sadd.s32 4294967295, %s1458_s15   ;;  %p1207_p0 = scmp.ge.s32.totalorder %s1458_s15, 1  ;;  %s1458_s15 = sphi %s1486_s15, %s14_s15  }
   0x2   : > { %p162_p1 = scmp.lt.s32.totalorder %s1458_s15, 3 }
   0x4   : > { %p163_p2 = pnand %p1207_p0, %p162_p1 }
   0x5   : > { %p188_p3 = scmp.lt.s32.totalorder (!%p163_p2), %s1203_s16, 1 }
   0x6   : > { %166 = sbr.rel (%p163_p2) target bundleno = 475 (0x1db), region = 36 }
   0xb   : > { %v1433_v0 = vld [vmem:[%s1712_s1 + $0x18] sm:$0xff]   ;;  %v1434_v1 = vld [vmem:[%s1712_s1 + $0x8] sm:$0xff]   ;;  %v1435_v2 = vld [vmem:[%s1712_s1 + $0x10] sm:$0xff]   ;;  %s1717_s16 = smov (!%p188_p3, %s1203_s16), 1  ;;  %v1460_v3 = vmov 0   ;;  %vm254_vm0 = vcmask 261120  }
   0xc   : > { %1343 = vmatprep.subr.bf16.mxu0 %v1433_v0  ;;  %1431 = vset.pattern.permute.xlu0 %v1460_v3  ;;  %v1436_v4 = vld [vmem:[%s1712_s1] sm:$0xff]   ;;  %s1421_s25 = smul.u32 24, %s1717_s16  ;;  %v1513_v5 = vld [vmem:[%s1712_s1 + $0x28] sm:$0xff]   ;;  %v1438_v6 = vld [vmem:[%s1712_s1 + $0x38] sm:$0xff]   ;;  %vm226_vm1 = vsmask.f32 7424 }
   0xd   : > { %1344 = vmatpush3.bf16.msra.mxu0 %v1433_v0  ;;  %1351 = vmatprep.subr.bf16.mxu1 %v1434_v1  ;;  %v1440_v22 = vld [vmem:[%s1712_s1 + $0x30] sm:$0xff]   ;;  %vm385_vm2 = vcmask 1046528   ;;  %vm473_vm3 = vcmask 1044480   ;;  %v1442_v40 = vld [vmem:[%s1712_s1 + $0x58] sm:$0xff]   ;;  %v1439_v46 = vld [vmem:[%s1712_s1 + $0x20] sm:$0xff]   ;;  %vm742_vm6 = vcmask 1045504  }
   0xe   : > { %1352 = vmatpush3.bf16.msra.mxu1 %v1434_v1  ;;  %1345 = vmatprep.subr.bf16.mxu0 %v1435_v2  ;;  %s1521_s30 = scalar_lea.vmem %s1711_s0, %s1421_s25  ;;  %v1444_v50 = vld [vmem:[%s1712_s1 + $0x50] sm:$0xff]   ;;  %v1441_v54 = vld [vmem:[%s1712_s1 + $0x48] sm:$0xff]   ;;  %vm556_vm4 = vsmask.f32 4352  ;;  %vm825_vm5 = vsmask.f32 5376  ;;  %s1671_s20 = scalar_lea.vmem %s1715_s4, %s1421_s25 }
   0xf   : > { %1353 = vmatprep.subr.bf16.mxu1 %v1436_v4  ;;  %1432 = vset.pattern.permute.xlu1 %v1460_v3  ;;  %v199_v7 = vld [vmem:[%s1521_s30] sm:$0xf]  ;;  %v1528_v8 = vld [vmem:[%s1521_s30 + $0x4] sm:$0xf]  ;;  %v1531_v9 = vld [vmem:[%s1521_s30 + $0x8] sm:$0xf] }
  0x10   : > { %v202_v10 = vmax.bf16 %v1460_v3, %v199_v7  ;;  %v1536_v11 = vmax.bf16 %v1460_v3, %v1528_v8  ;;  %v1540_v12 = vmax.bf16 %v1460_v3, %v1531_v9  ;;  %v209_v13 = vld [vmem:[%s1521_s30 + $0xc] sm:$0x1]  ;;  %v375_v15 = vld [vmem:[%s1521_s30] sm:$0xe]  ;;  %v719_v58 = vld [vmem:[%s1521_s30 + $0x4] sm:$0xc] }
  0x11   : > { %1346 = vmatpush3.bf16.msra.mxu0 %v1435_v2  ;;  %v210_v14 = vmax.bf16 %v1460_v3, %v209_v13  ;;  %v376_v18 = vmax.bf16 %v1460_v3, %v375_v15  ;;  %v1551_v19 = vld [vmem:[%s1521_s30] sm:$0x8]  ;;  %v459_v20 = vld [vmem:[%s1521_s30 + $0xc] sm:$0x7]  ;;  %v720_v59 = vld [vmem:[%s1521_s30 + $0x8] sm:$0xf]  ;;  %v723_v0 = vmax.bf16 %v1460_v3, %v719_v58 }
  0x12   : > { %1354 = vmatpush3.bf16.msra.mxu1 %v1436_v4  ;;  %1359 = vmatprep.subr.bf16.mxu0 %v1513_v5  ;;  %v1214_v16 = vcombine.low %v202_v10, %v1536_v11  ;;  %v1220_v17 = vcombine.low %v1540_v12, %v1540_v12  ;;  %v460_v23 = vmax.bf16 %v1460_v3, %v1551_v19  ;;  %v1572_v37 = vld [vmem:[%s1521_s30 + $0xc] sm:$0xf]  ;;  %v722_v63 = vld [vmem:[%s1521_s30 + $0x10] sm:$0x3]  ;;  %v1446_v10 = vld [vmem:[%s1712_s1 + $0x78] sm:$0xff]   ;;  %vm1007_vm7 = vcmask 130048  }
  0x13   : > { %1367 = vmatprep.subr.bf16.mxu1 %v1438_v6  ;;  %v1555_v21 = vcombine.low %v1540_v12, %v210_v14  ;;  %v461_v24 = vmax.bf16 %v1460_v3, %v459_v20  ;;  %v1229_v27 = vcombine.low %v376_v18, %v1536_v11  ;;  %v1579_v41 = vmax.bf16 %v1460_v3, %v1572_v37  ;;  %v721_v60 = vld [vmem:[%s1521_s30 + $0xc] sm:$0xf]  ;;  %v815_v2 = vld [vmem:[%s1521_s30 + $0x10] sm:$0x7]  ;;  %v1443_v14 = vld [vmem:[%s1712_s1 + $0x40] sm:$0xff]  }
  0x14   : > { %v228_v25 = vshrl.u32 %v1214_v16, 16  ;;  %v230_v26 = vshll.u32 %v1214_v16, 16  ;;  %1355 = vmatprep.mubr.msk.bf16.mxu1 %vm254_vm0, %v1214_v16  ;;  %v1238_v31 = vcombine.low %v460_v23, %v1536_v11  ;;  %v1257_v53 = vcombine.low %v1536_v11, %v1540_v12  ;;  %v912_v23 = vld [vmem:[%s1521_s30 + $0x4] sm:$0x8] }
  0x15   : > { %v235_v28 = vshll.u32 %v1555_v21, 16  ;;  %v239_v29 = vshrl.u32 %v1555_v21, 16  ;;  %1356 = vmatmul.mubr.msk.bf16.vlgmr.msra.gmra.mxu1 %vm254_vm0, %v1220_v17  ;;  %v387_v30 = vrot.slane %v1555_v21, 1  ;;  %v386_v33 = vrot.slane %v1229_v27, 1  ;;  %v1445_v21 = vld [vmem:[%s1712_s1 + $0x68] sm:$0xff]  }
  0x16   : > { %v232_v32 = vrot.slane %v230_v26, 1  ;;  %1368 = vmatpush3.bf16.msra.mxu1 %v1438_v6  ;;  %v1239_v34 = vcombine.low %v1540_v12, %v461_v24  ;;  %v474_v36 = vrot.slane %v1238_v31, 3  ;;  %v558_v43 = vshrl.u32 %v1238_v31, 16  ;;  %v1448_v24 = vld [vmem:[%s1712_s1 + $0x70] sm:$0xff]  }
  0x17   : > { %v237_v35 = vrot.slane %v235_v28, 1  ;;  %1369 = vmatprep.subr.bf16.mxu1 %v1440_v22  ;;  %v561_v44 = vshll.u32 %v1238_v31, 16  ;;  %v388_v47 = vsel %vm385_vm2, %v386_v33, %v387_v30  ;;  %v1248_v49 = vcombine.low %v1540_v12, %v1579_v41 }
  0x18   : > { %v233_v38 = vor.u32 %v232_v32, %v228_v25  ;;  %v475_v39 = vrot.slane %v1239_v34, 3  ;;  %v560_v51 = vrot.slane %v558_v43, 3  ;;  %v724_v1 = vmax.bf16 %v1460_v3, %v720_v59 }
  0x19   : > { %v241_v42 = vor.u32 %v239_v29, %v237_v35  ;;  %v563_v52 = vrot.slane %v561_v44, 4  ;;  %v566_v55 = vshrl.u32 %v1248_v49, 16  ;;  %v569_v56 = vshll.u32 %v1248_v49, 16  ;;  %v1451_v44 = vld [vmem:[%s1713_s2] sm:$0xff]  }
  0x1a   : > { %v238_v45 = vsel %vm226_vm1, %v233_v38, %v237_v35  ;;  %1370 = vmatpush3.bf16.msra.mxu1 %v1440_v22  ;;  %v476_v48 = vsel %vm473_vm3, %v474_v36, %v475_v39  ;;  %v725_v4 = vmax.bf16 %v1460_v3, %v721_v60  ;;  %v816_v6 = vmax.bf16 %v1460_v3, %v815_v2  ;;  %v1447_v35 = vld [vmem:[%s1712_s1 + $0x60] sm:$0xff]  }
  0x1b   : > { %1347 = vmatprep.mubr.msk.bf16.mxu0 %vm254_vm0, %v238_v45  ;;  %1371 = vmatprep.mubr.msk.bf16.mxu1 %vm254_vm0, %v476_v48  ;;  %v564_v57 = vor.u32 %v563_v52, %v560_v51  ;;  %v568_v61 = vrot.slane %v566_v55, 3  ;;  %v571_v62 = vrot.slane %v569_v56, 4  ;;  %v1267_v11 = vcombine.low %v723_v0, %v724_v1  ;;  %v1083_v45 = vld [vmem:[%s1714_s3] sm:$0xff] }
  0x1c   : > { %1348 = vmatmul.mubr.msk.bf16.vlgmr.msra.gmra.mxu0 %vm254_vm0, %v241_v42  ;;  %1383 = vmatprep.subr.bf16.mxu1 %v1442_v40  ;;  %v1258_v12 = vcombine.low %v1579_v41, %v1579_v41  ;;  %v1277_v13 = vcombine.low %v725_v4, %v816_v6  ;;  %v913_v32 = vmax.bf16 %v1460_v3, %v912_v23  ;;  %v1450_v42 = vld [vmem:[%s1712_s1 + $0x80] sm:$0xff]   ;;  %vm1111_vm8 = vcmask 257024  }
  0x1d   : > { %1360 = vmatpush3.bf16.msra.mxu0 %v1513_v5  ;;  %1363 = vmatprep.mubr.msk.bf16.mxu0 %vm254_vm0, %v388_v47  ;;  %v726_v5 = vmax.bf16 %v1460_v3, %v722_v63  ;;  %v572_v7 = vor.u32 %v571_v62, %v568_v61  ;;  %v827_v17 = vshrl.u32 %v1267_v11, 16  ;;  %v830_v18 = vshll.u32 %v1267_v11, 16  ;;  %v1084_v47 = vld [vmem:[%s1714_s3 + $0x8] sm:$0xff]  ;;  %1115 = vst.msk [vmem:[%s1671_s20 + $0xc] sm:$0xf] %vm1111_vm8, %v1460_v3 }
  0x1e   : > { %1361 = vmatprep.subr.bf16.mxu0 %v1439_v46  ;;  %1372 = vmatmul.mubr.msk.bf16.vlgmr.msra.gmra.mxu1 %vm254_vm0, %v475_v39  ;;  %v835_v20 = vshrl.u32 %v1277_v13, 16  ;;  %v838_v22 = vshll.u32 %v1277_v13, 16  ;;  %v743_v29 = vrot.slane %v1267_v11, 2  ;;  %v1286_v38 = vcombine.low %v913_v32, %v724_v1  ;;  %v1449_v39 = vld [vmem:[%s1712_s1 + $0x88] sm:$0xff]   ;;  %1116 = vst.msk [vmem:[%s1671_s20 + $0x10] sm:$0xf] %vm1111_vm8, %v1460_v3 }
  0x1f   : > { %1384 = vmatpush3.bf16.msra.mxu1 %v1442_v40  ;;  %1387 = vmatprep.mubr.msk.bf16.mxu1 %vm254_vm0, %v1257_v53  ;;  %v573_v15 = vsel %vm556_vm4, %v564_v57, %v572_v7  ;;  %v1268_v16 = vcombine.low %v725_v4, %v726_v5  ;;  %v829_v25 = vrot.slane %v827_v17, 2  ;;  %v832_v26 = vrot.slane %v830_v18, 3  ;;  %1117 = vst.msk [vmem:[%s1671_s20 + $0x14] sm:$0xf] %vm1111_vm8, %v1460_v3 }
  0x20   : > { %1385 = vmatprep.subr.bf16.mxu1 %v1444_v50  ;;  %v837_v27 = vrot.slane %v835_v20, 2  ;;  %v840_v28 = vrot.slane %v838_v22, 3  ;;  %v922_v40 = vrot.slane %v1286_v38, 3  ;;  %v923_v41 = vrot.slane %v1277_v13, 3  ;;  %1088 = vperm.xlu0 %1431, %v1083_v45   ;;  %1112 = vst.msk [vmem:[%s1671_s20] sm:$0xf] %vm1111_vm8, %v1460_v3 }
  0x21   : > { %1362 = vmatpush3.bf16.msra.mxu0 %v1439_v46  ;;  %v833_v31 = vor.u32 %v832_v26, %v829_v25  ;;  %v1085_v46 = vld [vmem:[%s1714_s3 + $0x10] sm:$0xff]  ;;  %1113 = vst.msk [vmem:[%s1671_s20 + $0x4] sm:$0xf] %vm1111_vm8, %v1460_v3  ;;  %1114 = vst.msk [vmem:[%s1671_s20 + $0x8] sm:$0xf] %vm1111_vm8, %v1460_v3  ;;  %vm1134_vm10 = vcmask 257027  }
  0x22   : > { %1375 = vmatprep.subr.bf16.mxu0 %v1441_v54  ;;  %v841_v33 = vor.u32 %v840_v28, %v837_v27  ;;  %v924_v43 = vsel %vm473_vm3, %v922_v40, %v923_v41  ;;  %1096 = vperm.xlu1 %1432, %v1085_v46   ;;  %vm1143_vm9 = vsmask.f32 3328  ;;  %vm1135_vm11 = vsmask.f32 7950 }
  0x23   : > { %1386 = vmatpush3.bf16.msra.mxu1 %v1444_v50  ;;  %vm1144_vm12 = vmand %vm1111_vm8, %vm1143_vm9 }
  0x24   : > { %1364 = vmatmul.mubr.msk.bf16.vlgmr.msra.gmra.mxu0 %vm254_vm0, %v387_v30  ;;  %1399 = vmatprep.subr.bf16.mxu1 %v1446_v10  ;;  %v744_v30 = vrot.slane %v1268_v16, 2  ;;  %v842_v34 = vsel %vm825_vm5, %v833_v31, %v841_v33  ;;  %vm1136_vm13 = vmand %vm1134_vm10, %vm1135_vm11 }
  0x25   : > { %1376 = vmatpush3.bf16.msra.mxu0 %v1441_v54  ;;  %1379 = vmatprep.mubr.msk.bf16.mxu0 %vm254_vm0, %v573_v15 }
  0x26   : > { %1377 = vmatprep.subr.bf16.mxu0 %v1443_v14  ;;  %1388 = vmatmul.mubr.msk.bf16.vlgmr.msra.gmra.mxu1 %vm254_vm0, %v1258_v12  ;;  %v745_v36 = vsel %vm742_vm6, %v743_v29, %v744_v30 }
  0x27   : > { %1400 = vmatpush3.bf16.msra.mxu1 %v1446_v10  ;;  %1403 = vmatprep.mubr.msk.bf16.mxu1 %vm254_vm0, %v842_v34 }
  0x28   : > { %1401 = vmatprep.subr.bf16.mxu1 %v1448_v24  ;;  %1092 = vperm.xlu0 %1431, %v1084_v47  }
  0x29   : > { %1378 = vmatpush3.bf16.msra.mxu0 %v1443_v14 }
  0x2a   : > { %1391 = vmatprep.subr.bf16.mxu0 %v1445_v21 }
  0x2b   : > { %1402 = vmatpush3.bf16.msra.mxu1 %v1448_v24 }
  0x2c   : > { %1380 = vmatmul.mubr.msk.bf16.vlgmr.msra.gmra.mxu0 %vm254_vm0, %v572_v7  ;;  %1415 = vmatprep.subr.bf16.mxu1 %v1451_v44 }
  0x2d   : > { %1392 = vmatpush3.bf16.msra.mxu0 %v1445_v21  ;;  %1395 = vmatprep.mubr.msk.bf16.mxu0 %vm254_vm0, %v745_v36 }
  0x2e   : > { %1393 = vmatprep.subr.bf16.mxu0 %v1447_v35  ;;  %1404 = vmatmul.mubr.msk.bf16.vlgmr.msra.gmra.mxu1 %vm254_vm0, %v841_v33 }
  0x2f   : > { %1416 = vmatpush3.bf16.msra.mxu1 %v1451_v44 }
  0x31   : > { %1394 = vmatpush3.bf16.msra.mxu0 %v1447_v35 }
  0x32   : > { %1407 = vmatprep.subr.bf16.mxu0 %v1449_v39 }
  0x34   : > { %1396 = vmatmul.mubr.msk.bf16.vlgmr.msra.gmra.mxu0 %vm254_vm0, %v744_v30 }
  0x35   : > { %1408 = vmatpush3.bf16.msra.mxu0 %v1449_v39  ;;  %1411 = vmatprep.mubr.msk.bf16.mxu0 %vm254_vm0, %v924_v43 }
  0x36   : > { %1409 = vmatprep.subr.bf16.mxu0 %v1450_v42 }
  0x39   : > { %1410 = vmatpush3.bf16.msra.mxu0 %v1450_v42 }
  0x3c   : > { %1412 = vmatmul.mubr.msk.bf16.vlgmr.msra.gmra.mxu0 %vm254_vm0, %v923_v41 }
  0xd5   : > { %v1357_v48 = vpop.f32.mrf.mxu1 }
  0xd7   : > { %v361_v49 = vpop.f32.mrf.mxu1 }
  0xd9   : > { %v1358_v50 = vpop.f32.mrf.mxu1 }
  0xdb   : > { %v364_v51 = vpop.f32.mrf.mxu1 }
  0xdc   : > { %v1349_v52 = vpop.f32.mrf.mxu0 }
  0xdd   : > { %v370_v4 = vadd.f32 %v1357_v48, %v1349_v52 }
  0xde   : > { %v295_v53 = vpop.f32.mrf.mxu0  ;;  %v1373_v54 = vpop.f32.mrf.mxu1 }
  0xdf   : > { %v362_v7 = vadd.f32 %v361_v49, %v295_v53 }
  0xe0   : > { %v1350_v55 = vpop.f32.mrf.mxu0  ;;  %v529_v56 = vpop.f32.mrf.mxu1 }
  0xe1   : > { %v1097_v55 = vpop.permute.xlu1 %1096 }
  0xe2   : > { %v298_v57 = vpop.f32.mrf.mxu0  ;;  %v1374_v58 = vpop.f32.mrf.mxu1 }
  0xe3   : > { %v365_v13 = vadd.f32 %v364_v51, %v298_v57 }
  0xe4   : > { %v1365_v59 = vpop.f32.mrf.mxu0  ;;  %v532_v60 = vpop.f32.mrf.mxu1 }
  0xe5   : > { %v457_v10 = vadd.f32 %v1365_v59, %v370_v4  ;;  %v1101_v59 = vrot.slane %v1097_v55, 1 }
  0xe6   : > { %v441_v61 = vpop.f32.mrf.mxu0  ;;  %v1389_v62 = vpop.f32.mrf.mxu1 }
  0xe7   : > { %v455_v14 = vadd.f32 %v441_v61, %v362_v7  ;;  %v545_v18 = vadd.f32 %v1373_v54, %v457_v10  ;;  %v1089_v54 = vpop.permute.xlu0 %1088 }
  0xe8   : > { %v1366_v63 = vpop.f32.mrf.mxu0  ;;  %v702_v0 = vpop.f32.mrf.mxu1 }
  0xe9   : > { %v543_v23 = vadd.f32 %v529_v56, %v455_v14  ;;  %v1065_v56 = vunpack.c.l.bf16 %v1572_v37  ;;  %v1145_v37 = vld [vmem:[%s1671_s20 + $0xc] sm:$0xf] }
  0xea   : > { %v444_v1 = vpop.f32.mrf.mxu0  ;;  %v1390_v2 = vpop.f32.mrf.mxu1 }
  0xeb   : > { %v456_v17 = vadd.f32 %v444_v1, %v365_v13  ;;  %v1093_v1 = vpop.permute.xlu0 %1092  ;;  %v1137_v13 = vld [vmem:[%s1671_s20] sm:$0x8] }
  0xec   : > { %v1381_v5 = vpop.f32.mrf.mxu0  ;;  %v705_v6 = vpop.f32.mrf.mxu1 }
  0xed   : > { %v642_v24 = vadd.f32 %v1381_v5, %v545_v18  ;;  %v544_v26 = vadd.f32 %v532_v60, %v456_v17  ;;  %v1062_v60 = vunpack.c.l.bf16 %v1551_v19  ;;  %v1064_v19 = vunpack.c.l.bf16 %v1531_v9 }
  0xee   : > { %v626_v11 = vpop.f32.mrf.mxu0  ;;  %v1405_v12 = vpop.f32.mrf.mxu1 }
  0xef   : > { %v640_v27 = vadd.f32 %v626_v11, %v543_v23  ;;  %v718_v29 = vadd.f32 %v1389_v62, %v642_v24  ;;  %v1098_v62 = vrot.slane %v1089_v54, 1  ;;  %v1099_v11 = vrot.slane %v1093_v1, 1 }
  0xf0   : > { %v1382_v15 = vpop.f32.mrf.mxu0  ;;  %v895_v16 = vpop.f32.mrf.mxu1 }
  0xf1   : > { %v716_v31 = vadd.f32 %v702_v0, %v640_v27  ;;  %v1100_v9 = vsel %vm385_vm2, %v1098_v62, %v1099_v11 }
  0xf2   : > { %v629_v20 = vpop.f32.mrf.mxu0  ;;  %v1406_v22 = vpop.f32.mrf.mxu1 }
  0xf3   : > { %v641_v21 = vadd.f32 %v629_v20, %v544_v26  ;;  %v1102_v22 = vsel %vm385_vm2, %v1099_v11, %v1101_v59 }
  0xf4   : > { %v1397_v25 = vpop.f32.mrf.mxu0  ;;  %v898_v42 = vpop.f32.mrf.mxu1 }
  0xf5   : > { %v814_v32 = vadd.f32 %v1397_v25, %v718_v29  ;;  %v717_v34 = vadd.f32 %v705_v6, %v641_v21  ;;  %v1063_v6 = vunpack.c.l.bf16 %v1528_v8 }
  0xf6   : > { %v798_v28 = vpop.f32.mrf.mxu0 }
  0xf7   : > { %v812_v35 = vadd.f32 %v798_v28, %v716_v31  ;;  %v911_v39 = vadd.f32 %v1405_v12, %v814_v32 }
  0xf8   : > { %v1398_v30 = vpop.f32.mrf.mxu0 }
  0xf9   : > { %v909_v41 = vadd.f32 %v895_v16, %v812_v35 }
  0xfa   : > { %v801_v33 = vpop.f32.mrf.mxu0 }
  0xfb   : > { %v813_v38 = vadd.f32 %v801_v33, %v717_v34 }
  0xfc   : > { %v1413_v36 = vpop.f32.mrf.mxu0 }
  0xfd   : > { %v993_v43 = vadd.f32 %v1413_v36, %v911_v39  ;;  %v910_v45 = vadd.f32 %v898_v42, %v813_v38 }
  0xfe   : > { %v977_v40 = vpop.f32.mrf.mxu0 }
  0xff   : > { %v991_v46 = vadd.f32 %v977_v40, %v909_v41  ;;  %v996_v49 = vmax.f32 %v993_v43, 0.0 }
 0x100   : > { %v1414_v44 = vpop.f32.mrf.mxu0 }
 0x101   : > { %v994_v50 = vmax.f32 %v991_v46, 0.0  ;;  %v998_v53 = vpack.c.bf16 %v996_v49, %v996_v49 }
 0x102   : > { %v980_v47 = vpop.f32.mrf.mxu0 }
 0x103   : > { %v992_v48 = vadd.f32 %v980_v47, %v910_v45 }
 0x105   : > { %v995_v51 = vmax.f32 %v992_v48, 0.0 }
 0x107   : > { %v997_v52 = vpack.c.bf16 %v995_v51, %v994_v50 }
 0x109   : > { %1417 = vmatprep.mubr.msk.bf16.mxu1 %vm1007_vm7, %v997_v52 }
 0x10a   : > { %1418 = vmatmul.mubr.msk.bf16.vlgmr.msra.gmra.mxu1 %vm1007_vm7, %v998_v53 }
 0x1ca   : > { %v1419_v57 = vpop.f32.mrf.mxu1 }
 0x1cb   : > { %v1073_v58 = vrot.slane %v1419_v57, 1 }
 0x1cc   : > { %v1048_v61 = vpop.f32.mrf.mxu1 }
 0x1cd   : > { %v1082_v63 = vadd.f32 %v1073_v58, %v1065_v56  ;;  %v1070_v0 = vrot.slane %v1048_v61, 1 }
 0x1ce   : > { %v1420_v2 = vpop.f32.mrf.mxu1 }
 0x1cf   : > { %v1110_v4 = vmul.f32 %v1101_v59, %v1082_v63  ;;  %v1079_v3 = vadd.f32 %v1070_v0, %v1062_v60 }
 0x1d0   : > { %v1051_v5 = vpop.f32.mrf.mxu1 }
 0x1d1   : > { %v1303_v7 = vpack.c.bf16 %v1110_v4, %v1110_v4  ;;  %v1107_v10 = vmul.f32 %v1098_v62, %v1079_v3  ;;  %v1071_v12 = vrot.slane %v1051_v5, 1 }
 0x1d3   : > { %v1146_v14 = vsel %vm1144_vm12, %v1303_v7, %v1145_v37  ;;  %v1300_v15 = vpack.c.bf16 %v1107_v10, %v1107_v10  ;;  %v1072_v16 = vsel %vm385_vm2, %v1070_v0, %v1071_v12  ;;  %v1074_v17 = vsel %vm385_vm2, %v1071_v12, %v1073_v58 }
 0x1d4   : > { %1147 = vst [vmem:[%s1671_s20 + $0xc] sm:$0xf] %v1146_v14  ;;  %v1080_v18 = vadd.f32 %v1072_v16, %v1063_v6  ;;  %v1081_v8 = vadd.f32 %v1074_v17, %v1064_v19 }
 0x1d5   : > { %v1138_v20 = vsel %vm1136_vm13, %v1300_v15, %v1137_v13 }
 0x1d6   : > { %1139 = vst [vmem:[%s1671_s20] sm:$0x8] %v1138_v20  ;;  %v1108_v23 = vmul.f32 %v1100_v9, %v1080_v18  ;;  %v1109_v24 = vmul.f32 %v1102_v22, %v1081_v8 }
 0x1d8   : > { %v1301_v25 = vpack.c.bf16 %v1108_v23, %v1108_v23  ;;  %v1302_v26 = vpack.c.bf16 %v1109_v24, %v1109_v24 }
 0x1da   : > { %1140 = vst.msk [vmem:[%s1671_s20 + $0x4] sm:$0xf] %vm1111_vm8, %v1301_v25  ;;  %1141 = vst.msk [vmem:[%s1671_s20 + $0x8] sm:$0xf] %vm1111_vm8, %v1302_v26 }
 0x1db PF: > { %s14_s15 = sadd.s32 1, %s1458_s15  }
 0x1dc   : > { %p11_p4 = scmp.ge.s32.totalorder %s14_s15, 4  }
 0x1de   :  { %13 = sbr.rel (!%p11_p4) target bundleno = 1 (0x1), region = 74 }

// kernel: e2e_encoder_forward.9
= control target key start
LH: loop header
LB: loop body
LE: loop exit
PB: predicated region body
PF: predicated region fallthrough
CT: control target
= control target key end

     0   :  { %s1566_s18 = smov 0   ;;  %s1763_s0 = inlined_call_operand.vmem [shape: bf16[2,48,32], index: 0, kind: input, shape index: {}]   ;;  %s1764_s1 = inlined_call_operand.vmem [shape: bf16[9,32,16], index: 1, kind: input, shape index: {}]   ;;  %s1765_s2 = inlined_call_operand.vmem [shape: bf16[1,16,32], index: 2, kind: input, shape index: {}]   ;;  %s1766_s3 = inlined_call_operand.vmem [shape: bf16[1,32,8], index: 3, kind: input, shape index: {}]   ;;  %s1767_s4 = inlined_call_operand.vmem [shape: f32[1,8], index: 4, kind: input, shape index: {}]   ;;  %s1768_s5 = inlined_call_operand.vmem [shape: f32[2,24,8], index: 5, kind: output, shape index: {}]  }
   0x1 LB: > { %s1269_s19 = sadd.s32 4294967295, %s1533_s18   ;;  %p1273_p0 = scmp.ge.s32.totalorder %s1533_s18, 1  ;;  %s1533_s18 = sphi %s1566_s18, %s15_s18  }
   0x2   : > { %p187_p1 = scmp.lt.s32.totalorder %s1533_s18, 3 }
   0x4   : > { %p188_p2 = pnand %p1273_p0, %p187_p1 }
   0x5   : > { %p215_p3 = scmp.lt.s32.totalorder (!%p188_p2), %s1269_s19, 1 }
   0x6   : > { %191 = sbr.rel (%p188_p2) target bundleno = 684 (0x2ac), region = 40 }
   0xb   : > { %v1506_v0 = vld [vmem:[%s1764_s1 + $0x18] sm:$0xff]   ;;  %v1507_v1 = vld [vmem:[%s1764_s1 + $0x8] sm:$0xff]   ;;  %v1508_v2 = vld [vmem:[%s1764_s1 + $0x10] sm:$0xff]   ;;  %s1770_s19 = smov (!%p215_p3, %s1269_s19), 1  ;;  %v1535_v9 = vmov 0   ;;  %vm281_vm0 = vcmask 261120  }
   0xc   : > { %1410 = vmatprep.subr.bf16.mxu0 %v1506_v0  ;;  %1418 = vmatprep.subr.bf16.mxu1 %v1507_v1  ;;  %v1509_v3 = vld [vmem:[%s1764_s1] sm:$0xff]   ;;  %s1496_s28 = smul.u32 24, %s1770_s19  ;;  %v1592_v4 = vld [vmem:[%s1764_s1 + $0x28] sm:$0xff]   ;;  %v1511_v5 = vld [vmem:[%s1764_s1 + $0x38] sm:$0xff]   ;;  %vm253_vm1 = vsmask.f32 7424 }
   0xd   : > { %1411 = vmatpush3.bf16.msra.mxu0 %v1506_v0  ;;  %1419 = vmatpush3.bf16.msra.mxu1 %v1507_v1  ;;  %v1513_v22 = vld [vmem:[%s1764_s1 + $0x30] sm:$0xff]   ;;  %vm412_vm2 = vcmask 1046528   ;;  %vm500_vm3 = vcmask 1044480   ;;  %v1515_v40 = vld [vmem:[%s1764_s1 + $0x58] sm:$0xff]   ;;  %v1512_v46 = vld [vmem:[%s1764_s1 + $0x20] sm:$0xff]   ;;  %vm769_vm6 = vcmask 1045504  }
   0xe   : > { %1412 = vmatprep.subr.bf16.mxu0 %v1508_v2  ;;  %1420 = vmatprep.subr.bf16.mxu1 %v1509_v3  ;;  %s1599_s8 = scalar_lea.vmem %s1763_s0, %s1496_s28  ;;  %v1517_v50 = vld [vmem:[%s1764_s1 + $0x50] sm:$0xff]   ;;  %v1514_v54 = vld [vmem:[%s1764_s1 + $0x48] sm:$0xff]   ;;  %vm583_vm4 = vsmask.f32 4352  ;;  %vm852_vm5 = vsmask.f32 5376  ;;  %s224_s25 = scalar_lea.vmem %s1768_s5, %s1496_s28 }
   0xf   : > { %v226_v6 = vld [vmem:[%s1599_s8] sm:$0xf]  ;;  %v1606_v7 = vld [vmem:[%s1599_s8 + $0x4] sm:$0xf]  ;;  %v1609_v8 = vld [vmem:[%s1599_s8 + $0x8] sm:$0xf] }
  0x10   : > { %v229_v10 = vmax.bf16 %v1535_v9, %v226_v6  ;;  %v1614_v11 = vmax.bf16 %v1535_v9, %v1606_v7  ;;  %v1618_v12 = vmax.bf16 %v1535_v9, %v1609_v8  ;;  %v236_v13 = vld [vmem:[%s1599_s8 + $0xc] sm:$0x1]  ;;  %v402_v15 = vld [vmem:[%s1599_s8] sm:$0xe]  ;;  %v746_v58 = vld [vmem:[%s1599_s8 + $0x4] sm:$0xc] }
  0x11   : > { %1413 = vmatpush3.bf16.msra.mxu0 %v1508_v2  ;;  %1421 = vmatpush3.bf16.msra.mxu1 %v1509_v3  ;;  %v237_v14 = vmax.bf16 %v1535_v9, %v236_v13  ;;  %v403_v18 = vmax.bf16 %v1535_v9, %v402_v15  ;;  %v1629_v19 = vld [vmem:[%s1599_s8] sm:$0x8]  ;;  %v486_v20 = vld [vmem:[%s1599_s8 + $0xc] sm:$0x7]  ;;  %v747_v59 = vld [vmem:[%s1599_s8 + $0x8] sm:$0xf]  ;;  %v750_v0 = vmax.bf16 %v1535_v9, %v746_v58 }
  0x12   : > { %1426 = vmatprep.subr.bf16.mxu0 %v1592_v4  ;;  %1434 = vmatprep.subr.bf16.mxu1 %v1511_v5  ;;  %v1280_v16 = vcombine.low %v229_v10, %v1614_v11  ;;  %v1286_v17 = vcombine.low %v1618_v12, %v1618_v12  ;;  %v487_v23 = vmax.bf16 %v1535_v9, %v1629_v19  ;;  %v1650_v37 = vld [vmem:[%s1599_s8 + $0xc] sm:$0xf]  ;;  %v749_v63 = vld [vmem:[%s1599_s8 + $0x10] sm:$0x3]  ;;  %v1519_v10 = vld [vmem:[%s1764_s1 + $0x78] sm:$0xff]   ;;  %vm1034_vm7 = vcmask 130048  }
  0x13   : > { %v1633_v21 = vcombine.low %v1618_v12, %v237_v14  ;;  %v488_v24 = vmax.bf16 %v1535_v9, %v486_v20  ;;  %v1295_v27 = vcombine.low %v403_v18, %v1614_v11  ;;  %v1657_v41 = vmax.bf16 %v1535_v9, %v1650_v37  ;;  %v748_v60 = vld [vmem:[%s1599_s8 + $0xc] sm:$0xf]  ;;  %v842_v2 = vld [vmem:[%s1599_s8 + $0x10] sm:$0x7]  ;;  %v1516_v14 = vld [vmem:[%s1764_s1 + $0x40] sm:$0xff]  }
  0x14   : > { %v255_v25 = vshrl.u32 %v1280_v16, 16  ;;  %v257_v26 = vshll.u32 %v1280_v16, 16  ;;  %1422 = vmatprep.mubr.msk.bf16.mxu1 %vm281_vm0, %v1280_v16  ;;  %v1304_v31 = vcombine.low %v487_v23, %v1614_v11  ;;  %v1323_v53 = vcombine.low %v1614_v11, %v1618_v12  ;;  %v1521_v16 = vld [vmem:[%s1764_s1 + $0x70] sm:$0xff]  }
  0x15   : > { %v262_v28 = vshll.u32 %v1633_v21, 16  ;;  %v266_v29 = vshrl.u32 %v1633_v21, 16  ;;  %1423 = vmatmul.mubr.msk.bf16.vlgmr.msra.gmra.mxu1 %vm281_vm0, %v1286_v17  ;;  %v414_v30 = vrot.slane %v1633_v21, 1  ;;  %v413_v33 = vrot.slane %v1295_v27, 1 }
  0x16   : > { %v259_v32 = vrot.slane %v257_v26, 1  ;;  %1435 = vmatpush3.bf16.msra.mxu1 %v1511_v5  ;;  %v1305_v34 = vcombine.low %v1618_v12, %v488_v24  ;;  %v501_v36 = vrot.slane %v1304_v31, 3  ;;  %v585_v43 = vshrl.u32 %v1304_v31, 16  ;;  %v939_v24 = vld [vmem:[%s1599_s8 + $0x4] sm:$0x8] }
  0x17   : > { %v264_v35 = vrot.slane %v262_v28, 1  ;;  %1436 = vmatprep.subr.bf16.mxu1 %v1513_v22  ;;  %v588_v44 = vshll.u32 %v1304_v31, 16  ;;  %v415_v47 = vsel %vm412_vm2, %v413_v33, %v414_v30  ;;  %v1314_v49 = vcombine.low %v1618_v12, %v1657_v41 }
  0x18   : > { %v260_v38 = vor.u32 %v259_v32, %v255_v25  ;;  %v502_v39 = vrot.slane %v1305_v34, 3  ;;  %v587_v51 = vrot.slane %v585_v43, 3  ;;  %v751_v1 = vmax.bf16 %v1535_v9, %v747_v59  ;;  %v1524_v43 = vld [vmem:[%s1765_s2] sm:$0xff]  }
  0x19   : > { %v268_v42 = vor.u32 %v266_v29, %v264_v35  ;;  %v590_v52 = vrot.slane %v588_v44, 4  ;;  %v593_v55 = vshrl.u32 %v1314_v49, 16  ;;  %v596_v56 = vshll.u32 %v1314_v49, 16  ;;  %v1518_v29 = vld [vmem:[%s1764_s1 + $0x68] sm:$0xff]  }
  0x1a   : > { %v265_v45 = vsel %vm253_vm1, %v260_v38, %v264_v35  ;;  %1437 = vmatpush3.bf16.msra.mxu1 %v1513_v22  ;;  %v503_v48 = vsel %vm500_vm3, %v501_v36, %v502_v39  ;;  %v752_v3 = vmax.bf16 %v1535_v9, %v748_v60  ;;  %v843_v5 = vmax.bf16 %v1535_v9, %v842_v2  ;;  %v1520_v35 = vld [vmem:[%s1764_s1 + $0x60] sm:$0xff]  }
  0x1b   : > { %1414 = vmatprep.mubr.msk.bf16.mxu0 %vm281_vm0, %v265_v45  ;;  %1438 = vmatprep.mubr.msk.bf16.mxu1 %vm281_vm0, %v503_v48  ;;  %v591_v57 = vor.u32 %v590_v52, %v587_v51  ;;  %v595_v61 = vrot.slane %v593_v55, 3  ;;  %v598_v62 = vrot.slane %v596_v56, 4  ;;  %v1333_v11 = vcombine.low %v750_v0, %v751_v1 }
  0x1c   : > { %1415 = vmatmul.mubr.msk.bf16.vlgmr.msra.gmra.mxu0 %vm281_vm0, %v268_v42  ;;  %1450 = vmatprep.subr.bf16.mxu1 %v1515_v40  ;;  %v1324_v12 = vcombine.low %v1657_v41, %v1657_v41  ;;  %v1343_v13 = vcombine.low %v752_v3, %v843_v5  ;;  %v1523_v41 = vld [vmem:[%s1764_s1 + $0x80] sm:$0xff]   ;;  %vm1210_vm8 = vcmask 64512  }
  0x1d   : > { %1427 = vmatpush3.bf16.msra.mxu0 %v1592_v4  ;;  %1430 = vmatprep.mubr.msk.bf16.mxu0 %vm281_vm0, %v415_v47  ;;  %v753_v4 = vmax.bf16 %v1535_v9, %v749_v63  ;;  %v599_v6 = vor.u32 %v598_v62, %v595_v61  ;;  %v854_v18 = vshrl.u32 %v1333_v11, 16  ;;  %v857_v20 = vshll.u32 %v1333_v11, 16 }
  0x1e   : > { %1428 = vmatprep.subr.bf16.mxu0 %v1512_v46  ;;  %1439 = vmatmul.mubr.msk.bf16.vlgmr.msra.gmra.mxu1 %vm281_vm0, %v502_v39  ;;  %v862_v22 = vshrl.u32 %v1343_v13, 16  ;;  %v865_v23 = vshll.u32 %v1343_v13, 16  ;;  %v770_v31 = vrot.slane %v1333_v11, 2 }
  0x1f   : > { %1451 = vmatpush3.bf16.msra.mxu1 %v1515_v40  ;;  %1454 = vmatprep.mubr.msk.bf16.mxu1 %vm281_vm0, %v1323_v53  ;;  %v600_v15 = vsel %vm583_vm4, %v591_v57, %v599_v6  ;;  %v1334_v17 = vcombine.low %v752_v3, %v753_v4  ;;  %v856_v25 = vrot.slane %v854_v18, 2  ;;  %v859_v26 = vrot.slane %v857_v20, 3 }
  0x20   : > { %1452 = vmatprep.subr.bf16.mxu1 %v1517_v50  ;;  %v864_v27 = vrot.slane %v862_v22, 2  ;;  %v867_v28 = vrot.slane %v865_v23, 3  ;;  %v950_v40 = vrot.slane %v1343_v13, 3 }
  0x21   : > { %1429 = vmatpush3.bf16.msra.mxu0 %v1512_v46  ;;  %v771_v21 = vrot.slane %v1334_v17, 2  ;;  %v860_v32 = vor.u32 %v859_v26, %v856_v25 }
  0x22   : > { %1442 = vmatprep.subr.bf16.mxu0 %v1514_v54  ;;  %v868_v33 = vor.u32 %v867_v28, %v864_v27 }
  0x23   : > { %1453 = vmatpush3.bf16.msra.mxu1 %v1517_v50  ;;  %v772_v36 = vsel %vm769_vm6, %v770_v31, %v771_v21 }
  0x24   : > { %1431 = vmatmul.mubr.msk.bf16.vlgmr.msra.gmra.mxu0 %vm281_vm0, %v414_v30  ;;  %1466 = vmatprep.subr.bf16.mxu1 %v1519_v10  ;;  %v940_v30 = vmax.bf16 %v1535_v9, %v939_v24  ;;  %v869_v34 = vsel %vm852_vm5, %v860_v32, %v868_v33  ;;  %v1522_v9 = vld [vmem:[%s1764_s1 + $0x88] sm:$0xff]  }
  0x25   : > { %1443 = vmatpush3.bf16.msra.mxu0 %v1514_v54  ;;  %1446 = vmatprep.mubr.msk.bf16.mxu0 %vm281_vm0, %v600_v15 }
  0x26   : > { %1444 = vmatprep.subr.bf16.mxu0 %v1516_v14  ;;  %1455 = vmatmul.mubr.msk.bf16.vlgmr.msra.gmra.mxu1 %vm281_vm0, %v1324_v12  ;;  %v1352_v38 = vcombine.low %v940_v30, %v751_v1 }
  0x27   : > { %1467 = vmatpush3.bf16.msra.mxu1 %v1519_v10  ;;  %1470 = vmatprep.mubr.msk.bf16.mxu1 %vm281_vm0, %v869_v34 }
  0x28   : > { %1468 = vmatprep.subr.bf16.mxu1 %v1521_v16  ;;  %v949_v39 = vrot.slane %v1352_v38, 3 }
  0x29   : > { %1445 = vmatpush3.bf16.msra.mxu0 %v1516_v14 }
  0x2a   : > { %1458 = vmatprep.subr.bf16.mxu0 %v1518_v29  ;;  %v951_v42 = vsel %vm500_vm3, %v949_v39, %v950_v40 }
  0x2b   : > { %1469 = vmatpush3.bf16.msra.mxu1 %v1521_v16 }
  0x2c   : > { %1447 = vmatmul.mubr.msk.bf16.vlgmr.msra.gmra.mxu0 %vm281_vm0, %v599_v6  ;;  %1482 = vmatprep.subr.bf16.mxu1 %v1524_v43 }
  0x2d   : > { %1459 = vmatpush3.bf16.msra.mxu0 %v1518_v29  ;;  %1462 = vmatprep.mubr.msk.bf16.mxu0 %vm281_vm0, %v772_v36 }
  0x2e   : > { %1460 = vmatprep.subr.bf16.mxu0 %v1520_v35  ;;  %1471 = vmatmul.mubr.msk.bf16.vlgmr.msra.gmra.mxu1 %vm281_vm0, %v868_v33 }
  0x2f   : > { %1483 = vmatpush3.bf16.msra.mxu1 %v1524_v43 }
  0x31   : > { %1461 = vmatpush3.bf16.msra.mxu0 %v1520_v35 }
  0x32   : > { %1474 = vmatprep.subr.bf16.mxu0 %v1522_v9 }
  0x34   : > { %1463 = vmatmul.mubr.msk.bf16.vlgmr.msra.gmra.mxu0 %vm281_vm0, %v771_v21 }
  0x35   : > { %1475 = vmatpush3.bf16.msra.mxu0 %v1522_v9  ;;  %1478 = vmatprep.mubr.msk.bf16.mxu0 %vm281_vm0, %v951_v42 }
  0x36   : > { %1476 = vmatprep.subr.bf16.mxu0 %v1523_v41 }
  0x39   : > { %1477 = vmatpush3.bf16.msra.mxu0 %v1523_v41 }
  0x3c   : > { %1479 = vmatmul.mubr.msk.bf16.vlgmr.msra.gmra.mxu0 %vm281_vm0, %v950_v40 }
  0xd5   : > { %v1424_v44 = vpop.f32.mrf.mxu1 }
  0xd7   : > { %v388_v45 = vpop.f32.mrf.mxu1 }
  0xd9   : > { %v1425_v46 = vpop.f32.mrf.mxu1 }
  0xdb   : > { %v391_v47 = vpop.f32.mrf.mxu1 }
  0xdc   : > { %v1416_v48 = vpop.f32.mrf.mxu0 }
  0xdd   : > { %v397_v63 = vadd.f32 %v1424_v44, %v1416_v48 }
  0xde   : > { %v322_v49 = vpop.f32.mrf.mxu0  ;;  %v1440_v50 = vpop.f32.mrf.mxu1 }
  0xdf   : > { %v389_v2 = vadd.f32 %v388_v45, %v322_v49  ;;  %v1525_v49 = vld [vmem:[%s1766_s3 + $0x8] sm:$0xff]  }
  0xe0   : > { %v1417_v51 = vpop.f32.mrf.mxu0  ;;  %v556_v52 = vpop.f32.mrf.mxu1  ;;  %1488 = vmatprep.subr.bf16.mxu0 %v1525_v49 }
  0xe1   : > { %1489 = vmatpush3.bf16.msra.mxu0 %v1525_v49 }
  0xe2   : > { %v325_v53 = vpop.f32.mrf.mxu0  ;;  %v1441_v54 = vpop.f32.mrf.mxu1 }
  0xe3   : > { %v392_v6 = vadd.f32 %v391_v47, %v325_v53  ;;  %v1092_v53 = vunpack.c.l.bf16 %v1650_v37 }
  0xe4   : > { %v1432_v55 = vpop.f32.mrf.mxu0  ;;  %v559_v56 = vpop.f32.mrf.mxu1 }
  0xe5   : > { %v484_v3 = vadd.f32 %v1432_v55, %v397_v63  ;;  %v1089_v55 = vunpack.c.l.bf16 %v1629_v19 }
  0xe6   : > { %v468_v57 = vpop.f32.mrf.mxu0  ;;  %v1456_v58 = vpop.f32.mrf.mxu1 }
  0xe7   : > { %v482_v10 = vadd.f32 %v468_v57, %v389_v2  ;;  %v572_v14 = vadd.f32 %v1440_v50, %v484_v3  ;;  %v1526_v50 = vld [vmem:[%s1766_s3] sm:$0xff]  }
  0xe8   : > { %v1433_v59 = vpop.f32.mrf.mxu0  ;;  %v729_v60 = vpop.f32.mrf.mxu1  ;;  %1490 = vmatprep.subr.bf16.mxu0 %v1526_v50 }
  0xe9   : > { %v570_v17 = vadd.f32 %v556_v52, %v482_v10  ;;  %1491 = vmatpush3.bf16.msra.mxu0 %v1526_v50  ;;  %v1090_v59 = vunpack.c.l.bf16 %v1606_v7 }
  0xea   : > { %v471_v61 = vpop.f32.mrf.mxu0  ;;  %v1457_v62 = vpop.f32.mrf.mxu1 }
  0xeb   : > { %v483_v13 = vadd.f32 %v471_v61, %v392_v6 }
  0xec   : > { %v1448_v0 = vpop.f32.mrf.mxu0  ;;  %v732_v1 = vpop.f32.mrf.mxu1 }
  0xed   : > { %v669_v18 = vadd.f32 %v1448_v0, %v572_v14  ;;  %v571_v22 = vadd.f32 %v559_v56, %v483_v13 }
  0xee   : > { %v653_v4 = vpop.f32.mrf.mxu0  ;;  %v1472_v5 = vpop.f32.mrf.mxu1 }
  0xef   : > { %v667_v23 = vadd.f32 %v653_v4, %v570_v17  ;;  %v745_v26 = vadd.f32 %v1456_v58, %v669_v18 }
  0xf0   : > { %v1449_v11 = vpop.f32.mrf.mxu0  ;;  %v922_v12 = vpop.f32.mrf.mxu1 }
  0xf1   : > { %v743_v28 = vadd.f32 %v729_v60, %v667_v23  ;;  %v1091_v60 = vunpack.c.l.bf16 %v1609_v8 }
  0xf2   : > { %v656_v15 = vpop.f32.mrf.mxu0  ;;  %v1473_v16 = vpop.f32.mrf.mxu1 }
  0xf3   : > { %v668_v25 = vadd.f32 %v656_v15, %v571_v22  ;;  %v1360_v22 = vld [vmem:[%s1767_s4] ss:$0 sm:$0xff] }
  0xf4   : > { %v1464_v20 = vpop.f32.mrf.mxu0  ;;  %v925_v38 = vpop.f32.mrf.mxu1 }
  0xf5   : > { %v841_v29 = vadd.f32 %v1464_v20, %v745_v26  ;;  %v744_v21 = vadd.f32 %v732_v1, %v668_v25 }
  0xf6   : > { %v825_v24 = vpop.f32.mrf.mxu0 }
  0xf7   : > { %v839_v32 = vadd.f32 %v825_v24, %v743_v28  ;;  %v938_v34 = vadd.f32 %v1472_v5, %v841_v29 }
  0xf8   : > { %v1465_v27 = vpop.f32.mrf.mxu0 }
  0xf9   : > { %v936_v36 = vadd.f32 %v922_v12, %v839_v32 }
  0xfa   : > { %v828_v31 = vpop.f32.mrf.mxu0 }
  0xfb   : > { %v840_v33 = vadd.f32 %v828_v31, %v744_v21 }
  0xfc   : > { %v1480_v30 = vpop.f32.mrf.mxu0 }
  0xfd   : > { %v1020_v9 = vadd.f32 %v1480_v30, %v938_v34  ;;  %v937_v40 = vadd.f32 %v925_v38, %v840_v33 }
  0xfe   : > { %v1004_v35 = vpop.f32.mrf.mxu0 }
  0xff   : > { %v1018_v41 = vadd.f32 %v1004_v35, %v936_v36  ;;  %v1023_v44 = vmax.f32 %v1020_v9, 0.0 }
 0x100   : > { %v1481_v39 = vpop.f32.mrf.mxu0 }
 0x101   : > { %v1021_v45 = vmax.f32 %v1018_v41, 0.0  ;;  %v1025_v48 = vpack.c.bf16 %v1023_v44, %v1023_v44 }
 0x102   : > { %v1007_v42 = vpop.f32.mrf.mxu0 }
 0x103   : > { %v1019_v43 = vadd.f32 %v1007_v42, %v937_v40 }
 0x105   : > { %v1022_v46 = vmax.f32 %v1019_v43, 0.0 }
 0x107   : > { %v1024_v47 = vpack.c.bf16 %v1022_v46, %v1021_v45 }
 0x109   : > { %1484 = vmatprep.mubr.msk.bf16.mxu1 %vm1034_vm7, %v1024_v47 }
 0x10a   : > { %1485 = vmatmul.mubr.msk.bf16.vlgmr.msra.gmra.mxu1 %vm1034_vm7, %v1025_v48 }
 0x1ca   : > { %v1486_v51 = vpop.f32.mrf.mxu1 }
 0x1cb   : > { %v1100_v54 = vrot.slane %v1486_v51, 1 }
 0x1cc   : > { %v1075_v52 = vpop.f32.mrf.mxu1 }
 0x1cd   : > { %v1097_v56 = vrot.slane %v1075_v52, 1  ;;  %v1109_v62 = vadd.f32 %v1100_v54, %v1092_v53 }
 0x1ce   : > { %v1487_v57 = vpop.f32.mrf.mxu1 }
 0x1cf   : > { %v1106_v63 = vadd.f32 %v1097_v56, %v1089_v55  ;;  %v1113_v37 = vmax.f32 %v1109_v62, 0.0 }
 0x1d0   : > { %v1078_v58 = vpop.f32.mrf.mxu1 }
 0x1d1   : > { %v1098_v61 = vrot.slane %v1078_v58, 1  ;;  %v1110_v4 = vmax.f32 %v1106_v63, 0.0 }
 0x1d3   : > { %v1099_v0 = vsel %vm412_vm2, %v1097_v56, %v1098_v61  ;;  %v1101_v1 = vsel %vm412_vm2, %v1098_v61, %v1100_v54 }
 0x1d4   : > { %v1107_v2 = vadd.f32 %v1099_v0, %v1090_v59  ;;  %v1108_v3 = vadd.f32 %v1101_v1, %v1091_v60 }
 0x1d6   : > { %v1111_v5 = vmax.f32 %v1107_v2, 0.0  ;;  %v1112_v19 = vmax.f32 %v1108_v3, 0.0 }
 0x1d8   : > { %v1114_v6 = vpack.c.bf16 %v1111_v5, %v1110_v4  ;;  %v1115_v10 = vpack.c.bf16 %v1113_v37, %v1112_v19 }
 0x1da   : > { %v1128_v11 = vshrl.u32 %v1114_v6, 16  ;;  %v1131_v7 = vshll.u32 %v1114_v6, 16  ;;  %v1136_v12 = vshrl.u32 %v1115_v10, 16  ;;  %v1139_v8 = vshll.u32 %v1115_v10, 16 }
 0x1dc   : > { %v1130_v13 = vrot.slane %v1128_v11, 3  ;;  %v1133_v14 = vrot.slane %v1131_v7, 4  ;;  %v1138_v15 = vrot.slane %v1136_v12, 3  ;;  %v1141_v16 = vrot.slane %v1139_v8, 4 }
 0x1de   : > { %v1134_v17 = vor.u32 %v1133_v14, %v1130_v13  ;;  %v1142_v18 = vor.u32 %v1141_v16, %v1138_v15 }
 0x1e0   : > { %v1143_v20 = vsel %vm583_vm4, %v1134_v17, %v1142_v18 }
 0x1e1   : > { %1492 = vmatprep.mubr.msk.bf16.mxu0 %vm281_vm0, %v1143_v20 }
 0x1e2   : > { %1493 = vmatmul.mubr.msk.bf16.vlgmr.msra.gmra.mxu0 %vm281_vm0, %v1142_v18 }
 0x2a2   : > { %v1494_v23 = vpop.f32.mrf.mxu0 }
 0x2a3   : > { %v1205_v24 = vadd.f32 %v1494_v23, %v1360_v22 }
 0x2a4   : > { %v1196_v25 = vpop.f32.mrf.mxu0 }
 0x2a5   : > { %1213 = vst.msk [vmem:[%s224_s25 + $0x10] sm:$0xff] %vm1210_vm8, %v1205_v24  ;;  %v1197_v26 = vadd.f32 %v1360_v22, %v1196_v25 }
 0x2a6   : > { %v1495_v27 = vpop.f32.mrf.mxu0 }
 0x2a7   : > { %1211 = vst.msk [vmem:[%s224_s25] sm:$0xff] %vm1210_vm8, %v1197_v26 }
 0x2a8   : > { %v1199_v28 = vpop.f32.mrf.mxu0 }
 0x2a9   : > { %v1200_v29 = vadd.f32 %v1360_v22, %v1199_v28 }
 0x2ab   : > { %1212 = vst.msk [vmem:[%s224_s25 + $0x8] sm:$0xff] %vm1210_vm8, %v1200_v29 }
 0x2ac PF: > { %s15_s18 = sadd.s32 1, %s1533_s18  }
 0x2ad   : > { %p12_p4 = scmp.ge.s32.totalorder %s15_s18, 4  }
 0x2af   :  { %14 = sbr.rel (!%p12_p4) target bundleno = 1 (0x1), region = 78 }

</bundles_post_ra>
